<compile_context>
chip_gen: v7x
topology: tpu7x:2x2x1
jax: 0.10.0
libtpu: 0.0.40
codegen_flags: <defaults>
</compile_context>

<pallas_src>
import math

import jax
import jax.numpy as jnp
from jax import lax
from jax.experimental import pallas as pl
from jax.experimental.pallas import tpu as pltpu

TM = 512            # row tile for the tiled GEMM (per perf review)
BN_EPS = 1e-5
LEAKY_SLOPE = 0.2


# ------------------------------ Pallas kernels ------------------------------

def _apply_act(y, act):
    if act == "leaky":
        return jnp.where(y >= 0, y, LEAKY_SLOPE * y)
    if act == "tanh":
        return jnp.tanh(y)
    return y


def _make_gemm_act_kernel(act):
    def kernel(a_ref, w_ref, o_ref):
        y = jnp.dot(a_ref[...], w_ref[...], preferred_element_type=jnp.float32)
        o_ref[...] = _apply_act(y, act)
    return kernel


def pallas_gemm_act(a, w, act="none"):
    """(M,K) @ (K,OC) with the elementwise activation fused as an epilogue.

    Inputs are cast to bf16 for the MXU; accumulation stays f32. Rows are
    tiled with a cdiv grid (the ragged last block is handled by Pallas'
    masked partial store) and the row axis is marked "parallel" so v7x can
    shard grid steps across both TensorCores.
    # TODO(synk): tile K/OC with a VMEM accumulator for realistic GANomaly
    # sizes where the untiled weight would exceed v7x's 64 MiB VMEM.
    """
    M, K = a.shape
    OC = w.shape[1]
    a = a.astype(jnp.bfloat16)
    w = w.astype(jnp.bfloat16)
    tm = M if M <= TM else TM
    return pl.pallas_call(
        _make_gemm_act_kernel(act),
        out_shape=jax.ShapeDtypeStruct((M, OC), jnp.float32),
        grid=(pl.cdiv(M, tm),),
        in_specs=[pl.BlockSpec((tm, K), lambda i: (i, 0)),
                  pl.BlockSpec((K, OC), lambda i: (0, 0))],
        out_specs=pl.BlockSpec((tm, OC), lambda i: (i, 0)),
        compiler_params=pltpu.CompilerParams(
            dimension_semantics=("parallel",)),
    )(a, w)


def _make_gemm_bn_act_kernel(act):
    def kernel(a_ref, w_ref, g_ref, b_ref, o_ref):
        y = jnp.dot(a_ref[...], w_ref[...], preferred_element_type=jnp.float32)
        mean = jnp.mean(y, axis=0, keepdims=True)
        var = jnp.mean(jnp.square(y - mean), axis=0, keepdims=True)
        scale = g_ref[...] * lax.rsqrt(var + BN_EPS)
        shift = b_ref[...] - mean * scale
        o_ref[...] = _apply_act(y * scale + shift, act)
    return kernel


def pallas_gemm_bn_act(a, w, gamma, beta, act="leaky"):
    """Conv GEMM + training-mode BatchNorm (batch stats, biased var) +
    activation, fully fused: one kernel, one HBM write of the activations.
    Uses a single block over all rows so the batch statistics are exact.
    # TODO(synk): for image sizes where (M, OC) no longer fits in VMEM, switch
    # to a tiled two-pass variant (in-kernel partial sums, then affine).
    """
    M, K = a.shape
    OC = w.shape[1]
    a = a.astype(jnp.bfloat16)
    w = w.astype(jnp.bfloat16)
    return pl.pallas_call(
        _make_gemm_bn_act_kernel(act),
        out_shape=jax.ShapeDtypeStruct((M, OC), jnp.float32),
        grid=(1,),
        in_specs=[pl.BlockSpec((M, K), lambda i: (0, 0)),
                  pl.BlockSpec((K, OC), lambda i: (0, 0)),
                  pl.BlockSpec((1, OC), lambda i: (0, 0)),
                  pl.BlockSpec((1, OC), lambda i: (0, 0))],
        out_specs=pl.BlockSpec((M, OC), lambda i: (0, 0)),
    )(a, w,
      gamma.reshape(1, OC).astype(jnp.float32),
      beta.reshape(1, OC).astype(jnp.float32))


def _make_bn_act_kernel(act):
    def kernel(x_ref, g_ref, b_ref, o_ref):
        x = x_ref[...]
        mean = jnp.mean(x, axis=0, keepdims=True)
        var = jnp.mean(jnp.square(x - mean), axis=0, keepdims=True)
        scale = g_ref[...] * lax.rsqrt(var + BN_EPS)
        shift = b_ref[...] - mean * scale
        o_ref[...] = _apply_act(x * scale + shift, act)
    return kernel


def pallas_bn_act(x2d, gamma, beta, act="leaky"):
    """BatchNorm (batch stats) + activation on an (M, C) channels-last matrix;
    stats, affine and activation in a single fused kernel pass."""
    M, C = x2d.shape
    return pl.pallas_call(
        _make_bn_act_kernel(act),
        out_shape=jax.ShapeDtypeStruct((M, C), jnp.float32),
        grid=(1,),
        in_specs=[pl.BlockSpec((M, C), lambda i: (0, 0)),
                  pl.BlockSpec((1, C), lambda i: (0, 0)),
                  pl.BlockSpec((1, C), lambda i: (0, 0))],
        out_specs=pl.BlockSpec((M, C), lambda i: (0, 0)),
    )(x2d.astype(jnp.float32),
      gamma.reshape(1, C).astype(jnp.float32),
      beta.reshape(1, C).astype(jnp.float32))


# ---------------------------- conv building blocks ---------------------------

def _im2col(x_nhwc, w_oihw, stride, padding):
    """Patch matrix (N*OH*OW, KH*KW*IC) and weight matrix (KH*KW*IC, OC).

    # TODO(synk): for non-toy image sizes replace host-side im2col with an
    # implicit-GEMM kernel (per-tap index maps + VMEM accumulator) so the
    # patch tensor is never materialized in HBM.
    """
    N, H, W, C = x_nhwc.shape
    OC, IC, KH, KW = w_oihw.shape
    xp = jnp.pad(x_nhwc, ((0, 0), (padding, padding), (padding, padding), (0, 0)))
    OH = (H + 2 * padding - KH) // stride + 1
    OW = (W + 2 * padding - KW) // stride + 1
    cols = []
    for kh in range(KH):
        for kw in range(KW):
            cols.append(xp[:,
                           kh:kh + (OH - 1) * stride + 1:stride,
                           kw:kw + (OW - 1) * stride + 1:stride, :])
    patches = jnp.concatenate(cols, axis=-1).reshape(N * OH * OW, KH * KW * IC)
    wmat = jnp.transpose(w_oihw, (2, 3, 1, 0)).reshape(KH * KW * IC, OC)
    return patches, wmat, (N, OH, OW, OC)


def conv2d_act(x_nhwc, w_oihw, stride, padding, act="none"):
    """Conv2d (bias=False) with the activation fused into the GEMM epilogue."""
    patches, wmat, oshape = _im2col(x_nhwc, w_oihw, stride, padding)
    return pallas_gemm_act(patches, wmat, act).reshape(oshape)


def conv2d_bn_act(x_nhwc, w_oihw, gamma, beta, stride, padding, act="leaky"):
    """Conv2d + BatchNorm (batch stats) + activation fused into one kernel."""
    patches, wmat, oshape = _im2col(x_nhwc, w_oihw, stride, padding)
    return pallas_gemm_bn_act(patches, wmat, gamma, beta, act).reshape(oshape)


def conv_transpose2d_s1_bn_act(x_nhwc, w_iohw, gamma, beta, padding, act="leaky"):
    """stride-1 ConvTranspose2d + BN + act (decoder latent layer): equivalent
    direct conv with spatially-flipped, channel-swapped weights."""
    KH = w_iohw.shape[2]
    w_conv = jnp.transpose(w_iohw[:, :, ::-1, ::-1], (1, 0, 2, 3))   # -> OIHW
    return conv2d_bn_act(x_nhwc, w_conv, gamma, beta,
                         stride=1, padding=KH - 1 - padding, act=act)


_PHASE_TAPS = {0: (3, 1), 1: (2, 0)}    # output parity -> kernel taps (window order)


def conv_transpose2d_s2(x_nhwc, w_iohw, act="none"):
    """stride-2, padding-1, 4x4 ConvTranspose2d via sub-pixel decomposition.

    Each of the 4 output phases is an independent stride-1 conv with a 2x2
    sub-kernel (no zero-dilation, no wasted MXU FLOPs); the elementwise
    activation is fused into the phase GEMM epilogue and phases are
    interleaved back into NHWC with a cheap stack/transpose/reshape.
    """
    N, H, W, C = x_nhwc.shape
    IC, OC, KH, KW = w_iohw.shape
    assert (KH, KW) == (4, 4), "sub-pixel path assumes a 4x4 kernel"
    phase_outs = []
    for ph in (0, 1):
        for pw in (0, 1):
            pad_h = (1, 0) if ph == 0 else (0, 1)
            pad_w = (1, 0) if pw == 0 else (0, 1)
            xp = jnp.pad(x_nhwc, ((0, 0), pad_h, pad_w, (0, 0)))
            cols, ws = [], []
            for dh, kh in enumerate(_PHASE_TAPS[ph]):
                for dw, kw in enumerate(_PHASE_TAPS[pw]):
                    cols.append(xp[:, dh:dh + H, dw:dw + W, :])
                    ws.append(w_iohw[:, :, kh, kw])          # (IC, OC)
            patches = jnp.concatenate(cols, axis=-1).reshape(N * H * W, 4 * IC)
            wmat = jnp.concatenate(ws, axis=0)               # (4*IC, OC)
            phase_outs.append(
                pallas_gemm_act(patches, wmat, act).reshape(N, H, W, OC))
    stacked = jnp.stack(phase_outs, axis=0).reshape(2, 2, N, H, W, OC)
    # out[n, 2q+ph, 2r+pw, c] = phase[(ph, pw)][n, q, r, c]
    return jnp.transpose(stacked, (2, 3, 0, 4, 1, 5)).reshape(N, 2 * H, 2 * W, OC)


def conv_transpose2d_s2_bn_act(x_nhwc, w_iohw, gamma, beta, act="leaky"):
    """stride-2 ConvTranspose2d + BN + act. BN batch stats span all four
    sub-pixel phases, so the stats+affine+act run as one fused pass after the
    phase GEMMs."""
    y = conv_transpose2d_s2(x_nhwc, w_iohw, act="none")
    N, OH, OW, OC = y.shape
    return pallas_bn_act(y.reshape(N * OH * OW, OC), gamma, beta,
                         act).reshape(N, OH, OW, OC)


# -------------------------------- network parts ------------------------------

def encoder_forward(params, x_nhwc):
    x = conv2d_act(x_nhwc, params["conv1_w"], stride=2, padding=4, act="leaky")
    for (w, g, b) in params["pyramid"]:
        x = conv2d_bn_act(x, w, g, b, stride=2, padding=1, act="leaky")
    x = conv2d_act(x, params["final_w"], stride=1, padding=0, act="none")
    return x                                               # (N, 1, 1, latent)


def decoder_forward(params, z_nhwc):
    x = conv_transpose2d_s1_bn_act(z_nhwc, params["latent_w"],
                                   params["latent_g"], params["latent_b"],
                                   padding=0, act="leaky")
    for (w, g, b) in params["pyramid"]:
        x = conv_transpose2d_s2_bn_act(x, w, g, b, act="leaky")
    x = conv_transpose2d_s2(x, params["final_w"], act="tanh")
    return x


def generator_forward(params, x_nchw):
    x = jnp.transpose(x_nchw, (0, 2, 3, 1))                # NCHW -> NHWC
    latent_i = encoder_forward(params["enc1"], x)
    gen_image = decoder_forward(params["dec"], latent_i)
    latent_o = encoder_forward(params["enc2"], gen_image)
    return (jnp.transpose(gen_image, (0, 3, 1, 2)),
            jnp.transpose(latent_i, (0, 3, 1, 2)),
            jnp.transpose(latent_o, (0, 3, 1, 2)))


# --------------------------------- param init --------------------------------

def _enc_params(key, img_size, latent, img_ch, nf):
    ks = jax.random.split(key, 8)
    p = {"conv1_w": 0.05 * jax.random.normal(ks[0], (nf, img_ch, 4, 4), jnp.float32)}
    pyr, feats, pyramid_dim, i = [], nf, min(img_size) // 2, 1
    while pyramid_dim > 4:
        w = 0.05 * jax.random.normal(ks[i], (feats * 2, feats, 4, 4), jnp.float32)
        pyr.append((w, jnp.ones((feats * 2,), jnp.float32),
                    jnp.zeros((feats * 2,), jnp.float32)))
        feats *= 2
        pyramid_dim //= 2
        i += 1
    p["pyramid"] = tuple(pyr)
    p["final_w"] = 0.05 * jax.random.normal(ks[i], (latent, feats, 4, 4), jnp.float32)
    return p


def _dec_params(key, img_size, latent, img_ch, nf):
    ks = jax.random.split(key, 8)
    exp_factor = math.ceil(math.log(min(img_size) // 2, 2)) - 2
    feats = nf * 2 ** exp_factor
    p = {"latent_w": 0.05 * jax.random.normal(ks[0], (latent, feats, 4, 4), jnp.float32),
         "latent_g": jnp.ones((feats,), jnp.float32),
         "latent_b": jnp.zeros((feats,), jnp.float32)}
    pyr, pyramid_dim, i = [], min(img_size) // 2, 1
    while pyramid_dim > 4:
        w = 0.05 * jax.random.normal(ks[i], (feats, feats // 2, 4, 4), jnp.float32)
        pyr.append((w, jnp.ones((feats // 2,), jnp.float32),
                    jnp.zeros((feats // 2,), jnp.float32)))
        feats //= 2
        pyramid_dim //= 2
        i += 1
    p["pyramid"] = tuple(pyr)
    p["final_w"] = 0.05 * jax.random.normal(ks[i], (feats, img_ch, 4, 4), jnp.float32)
    return p


def init_generator_params(key, img_size, latent, img_ch, nf):
    k1, k2, k3 = jax.random.split(key, 3)
    return {"enc1": _enc_params(k1, img_size, latent, img_ch, nf),
            "dec": _dec_params(k2, img_size, latent, img_ch, nf),
            "enc2": _enc_params(k3, img_size, latent, img_ch, nf)}


# ------------------------------------ main ------------------------------------

if __name__ == "__main__":
    img_size = (32, 32)
    latent_vec_size = 16
    img_channels = 3
    n_features = 8
    batch = 2

    key = jax.random.PRNGKey(0)
    pkey, xkey = jax.random.split(key)
    params = init_generator_params(pkey, img_size, latent_vec_size,
                                   img_channels, n_features)
    x = jax.random.normal(xkey, (batch, img_channels, *img_size), jnp.float32)

    fwd = jax.jit(generator_forward)
    gen_image, latent_i, latent_o = fwd(params, x)
    jax.block_until_ready((gen_image, latent_i, latent_o))

    assert gen_image.shape == (batch, img_channels, *img_size), gen_image.shape
    assert latent_i.shape == (batch, latent_vec_size, 1, 1), latent_i.shape
    assert latent_o.shape == (batch, latent_vec_size, 1, 1), latent_o.shape
    assert bool(jnp.all(jnp.isfinite(gen_image)))
    print("KERNEL_OK")
</pallas_src>

<mosaic_0001>
module attributes {stable_mosaic.version = 11 : i64} {
  func.func @kernel(%arg0: i32, %arg1: memref<512x48xbf16, #tpu.memory_space<vmem>>, %arg2: memref<48x8xbf16, #tpu.memory_space<vmem>>, %arg3: memref<512x8xf32, #tpu.memory_space<vmem>>) attributes {dimension_semantics = [#tpu.dimension_semantics<parallel>], iteration_bounds = array<i64: 2>, scalar_prefetch = 0 : i64, scratch_operands = 0 : i64, tpu.core_type = #tpu.core_type<tc>, window_params = [{transform_indices = @transform_0, window_bounds = array<i64: 512, 48>}, {pipeline_mode = #tpu.pipeline_mode<synchronous>, transform_indices = @transform_1, window_bounds = array<i64: 48, 8>}, {transform_indices = @transform_2, window_bounds = array<i64: 512, 8>}]} {
    %c0 = arith.constant 0 : index
    %c0_0 = arith.constant 0 : index
    %0 = vector.load %arg1[%c0, %c0_0] : memref<512x48xbf16, #tpu.memory_space<vmem>>, vector<512x48xbf16>
    %c0_1 = arith.constant 0 : index
    %c0_2 = arith.constant 0 : index
    %1 = vector.load %arg2[%c0_1, %c0_2] : memref<48x8xbf16, #tpu.memory_space<vmem>>, vector<48x8xbf16>
    %cst = arith.constant dense<0.000000e+00> : vector<512x8xf32>
    %2 = tpu.matmul %0, %1, %cst {dimension_numbers = #tpu.dot_dimension_numbers<[1], [0], [0], [1], [0, 0, 1, 1], [], []>} : vector<512x48xbf16>, vector<48x8xbf16>, vector<512x8xf32> -> vector<512x8xf32>
    %cst_3 = arith.constant 0.000000e+00 : f32
    %3 = vector.broadcast %cst_3 : f32 to vector<512x8xf32>
    %4 = arith.cmpf oge, %2, %3 : vector<512x8xf32>
    %cst_4 = arith.constant 2.000000e-01 : f32
    %5 = vector.broadcast %cst_4 : f32 to vector<512x8xf32>
    %6 = arith.mulf %5, %2 : vector<512x8xf32>
    %7 = arith.select %4, %2, %6 : vector<512x8xi1>, vector<512x8xf32>
    %c0_5 = arith.constant 0 : index
    %c0_6 = arith.constant 0 : index
    %8 = vector.load %arg3[%c0_5, %c0_6] : memref<512x8xf32, #tpu.memory_space<vmem>>, vector<512x8xf32>
    tpu.vector_store %arg3[%c0_5, %c0_6], %7 {strides = array<i32>} : memref<512x8xf32, #tpu.memory_space<vmem>>, vector<512x8xf32>,
    return
  }
  func.func @transform_0(%arg0: i32) -> (i32, i32) {
    %c0_i32 = arith.constant 0 : i32
    %c0_i32_0 = arith.constant 0 : i32
    return %arg0, %c0_i32 : i32, i32
  }
  func.func @transform_1(%arg0: i32) -> (i32, i32) {
    %c0_i32 = arith.constant 0 : i32
    %c0_i32_0 = arith.constant 0 : i32
    %c0_i32_1 = arith.constant 0 : i32
    return %c0_i32, %c0_i32_0 : i32, i32
  }
  func.func @transform_2(%arg0: i32) -> (i32, i32) {
    %c0_i32 = arith.constant 0 : i32
    %c0_i32_0 = arith.constant 0 : i32
    return %arg0, %c0_i32 : i32, i32
  }
}

module attributes {stable_mosaic.version = 11 : i64} {
  func.func @kernel(%arg0: i32, %arg1: memref<162x128xbf16, #tpu.memory_space<vmem>>, %arg2: memref<128x16xbf16, #tpu.memory_space<vmem>>, %arg3: memref<1x16xf32, #tpu.memory_space<vmem>>, %arg4: memref<1x16xf32, #tpu.memory_space<vmem>>, %arg5: memref<162x16xf32, #tpu.memory_space<vmem>>) attributes {dimension_semantics = [#tpu.dimension_semantics<arbitrary>], iteration_bounds = array<i64: 1>, scalar_prefetch = 0 : i64, scratch_operands = 0 : i64, tpu.core_type = #tpu.core_type<tc>, window_params = [{pipeline_mode = #tpu.pipeline_mode<synchronous>, transform_indices = @transform_0, window_bounds = array<i64: 162, 128>}, {pipeline_mode = #tpu.pipeline_mode<synchronous>, transform_indices = @transform_1, window_bounds = array<i64: 128, 16>}, {pipeline_mode = #tpu.pipeline_mode<synchronous>, transform_indices = @transform_2, window_bounds = array<i64: 1, 16>}, {pipeline_mode = #tpu.pipeline_mode<synchronous>, transform_indices = @transform_3, window_bounds = array<i64: 1, 16>}, {pipeline_mode = #tpu.pipeline_mode<synchronous>, transform_indices = @transform_4, window_bounds = array<i64: 162, 16>}]} {
    %c0 = arith.constant 0 : index
    %c0_0 = arith.constant 0 : index
    %0 = vector.load %arg1[%c0, %c0_0] : memref<162x128xbf16, #tpu.memory_space<vmem>>, vector<162x128xbf16>
    %c0_1 = arith.constant 0 : index
    %c0_2 = arith.constant 0 : index
    %1 = vector.load %arg2[%c0_1, %c0_2] : memref<128x16xbf16, #tpu.memory_space<vmem>>, vector<128x16xbf16>
    %cst = arith.constant dense<0.000000e+00> : vector<162x16xf32>
    %2 = tpu.matmul %0, %1, %cst {dimension_numbers = #tpu.dot_dimension_numbers<[1], [0], [0], [1], [0, 0, 1, 1], [], []>} : vector<162x128xbf16>, vector<128x16xbf16>, vector<162x16xf32> -> vector<162x16xf32>
    %cst_3 = arith.constant dense<0.000000e+00> : vector<16xf32>
    %3 = vector.multi_reduction <add>, %2, %cst_3 [0] : vector<162x16xf32> to vector<16xf32>
    %4 = vector.shape_cast %3 : vector<16xf32> to vector<1x16xf32>
    %cst_4 = arith.constant 1.620000e+02 : f32
    %5 = vector.broadcast %cst_4 : f32 to vector<1x16xf32>
    %6 = arith.divf %4, %5 : vector<1x16xf32>
    %7 = vector.broadcast %6 : vector<1x16xf32> to vector<162x16xf32>
    %8 = arith.subf %2, %7 : vector<162x16xf32>
    %9 = arith.mulf %8, %8 : vector<162x16xf32>
    %cst_5 = arith.constant dense<0.000000e+00> : vector<16xf32>
    %10 = vector.multi_reduction <add>, %9, %cst_5 [0] : vector<162x16xf32> to vector<16xf32>
    %11 = vector.shape_cast %10 : vector<16xf32> to vector<1x16xf32>
    %cst_6 = arith.constant 1.620000e+02 : f32
    %12 = vector.broadcast %cst_6 : f32 to vector<1x16xf32>
    %13 = arith.divf %11, %12 : vector<1x16xf32>
    %c0_7 = arith.constant 0 : index
    %c0_8 = arith.constant 0 : index
    %14 = vector.load %arg3[%c0_7, %c0_8] : memref<1x16xf32, #tpu.memory_space<vmem>>, vector<1x16xf32>
    %cst_9 = arith.constant 9.99999974E-6 : f32
    %15 = vector.broadcast %cst_9 : f32 to vector<1x16xf32>
    %16 = arith.addf %13, %15 : vector<1x16xf32>
    %17 = math.rsqrt %16 : vector<1x16xf32>
    %18 = arith.mulf %14, %17 : vector<1x16xf32>
    %c0_10 = arith.constant 0 : index
    %c0_11 = arith.constant 0 : index
    %19 = vector.load %arg4[%c0_10, %c0_11] : memref<1x16xf32, #tpu.memory_space<vmem>>, vector<1x16xf32>
    %20 = arith.mulf %6, %18 : vector<1x16xf32>
    %21 = arith.subf %19, %20 : vector<1x16xf32>
    %22 = vector.broadcast %18 : vector<1x16xf32> to vector<162x16xf32>
    %23 = arith.mulf %2, %22 : vector<162x16xf32>
    %24 = vector.broadcast %21 : vector<1x16xf32> to vector<162x16xf32>
    %25 = arith.addf %23, %24 : vector<162x16xf32>
    %cst_12 = arith.constant 0.000000e+00 : f32
    %26 = vector.broadcast %cst_12 : f32 to vector<162x16xf32>
    %27 = arith.cmpf oge, %25, %26 : vector<162x16xf32>
    %cst_13 = arith.constant 2.000000e-01 : f32
    %28 = vector.broadcast %cst_13 : f32 to vector<162x16xf32>
    %29 = arith.mulf %28, %25 : vector<162x16xf32>
    %30 = arith.select %27, %25, %29 : vector<162x16xi1>, vector<162x16xf32>
    %c0_14 = arith.constant 0 : index
    %c0_15 = arith.constant 0 : index
    %31 = vector.load %arg5[%c0_14, %c0_15] : memref<162x16xf32, #tpu.memory_space<vmem>>, vector<162x16xf32>
    tpu.vector_store %arg5[%c0_14, %c0_15], %30 {strides = array<i32>} : memref<162x16xf32, #tpu.memory_space<vmem>>, vector<162x16xf32>,
    return
  }
  func.func @transform_0(%arg0: i32) -> (i32, i32) {
    %c0_i32 = arith.constant 0 : i32
    %c0_i32_0 = arith.constant 0 : i32
    %c0_i32_1 = arith.constant 0 : i32
    return %c0_i32, %c0_i32_0 : i32, i32
  }
  func.func @transform_1(%arg0: i32) -> (i32, i32) {
    %c0_i32 = arith.constant 0 : i32
    %c0_i32_0 = arith.constant 0 : i32
    %c0_i32_1 = arith.constant 0 : i32
    return %c0_i32, %c0_i32_0 : i32, i32
  }
  func.func @transform_2(%arg0: i32) -> (i32, i32) {
    %c0_i32 = arith.constant 0 : i32
    %c0_i32_0 = arith.constant 0 : i32
    %c0_i32_1 = arith.constant 0 : i32
    return %c0_i32, %c0_i32_0 : i32, i32
  }
  func.func @transform_3(%arg0: i32) -> (i32, i32) {
    %c0_i32 = arith.constant 0 : i32
    %c0_i32_0 = arith.constant 0 : i32
    %c0_i32_1 = arith.constant 0 : i32
    return %c0_i32, %c0_i32_0 : i32, i32
  }
  func.func @transform_4(%arg0: i32) -> (i32, i32) {
    %c0_i32 = arith.constant 0 : i32
    %c0_i32_0 = arith.constant 0 : i32
    %c0_i32_1 = arith.constant 0 : i32
    return %c0_i32, %c0_i32_0 : i32, i32
  }
}

module attributes {stable_mosaic.version = 11 : i64} {
  func.func @kernel(%arg0: i32, %arg1: memref<32x256xbf16, #tpu.memory_space<vmem>>, %arg2: memref<256x32xbf16, #tpu.memory_space<vmem>>, %arg3: memref<1x32xf32, #tpu.memory_space<vmem>>, %arg4: memref<1x32xf32, #tpu.memory_space<vmem>>, %arg5: memref<32x32xf32, #tpu.memory_space<vmem>>) attributes {dimension_semantics = [#tpu.dimension_semantics<arbitrary>], iteration_bounds = array<i64: 1>, scalar_prefetch = 0 : i64, scratch_operands = 0 : i64, tpu.core_type = #tpu.core_type<tc>, window_params = [{pipeline_mode = #tpu.pipeline_mode<synchronous>, transform_indices = @transform_0, window_bounds = array<i64: 32, 256>}, {pipeline_mode = #tpu.pipeline_mode<synchronous>, transform_indices = @transform_1, window_bounds = array<i64: 256, 32>}, {pipeline_mode = #tpu.pipeline_mode<synchronous>, transform_indices = @transform_2, window_bounds = array<i64: 1, 32>}, {pipeline_mode = #tpu.pipeline_mode<synchronous>, transform_indices = @transform_3, window_bounds = array<i64: 1, 32>}, {pipeline_mode = #tpu.pipeline_mode<synchronous>, transform_indices = @transform_4, window_bounds = array<i64: 32, 32>}]} {
    %c0 = arith.constant 0 : index
    %c0_0 = arith.constant 0 : index
    %0 = vector.load %arg1[%c0, %c0_0] : memref<32x256xbf16, #tpu.memory_space<vmem>>, vector<32x256xbf16>
    %c0_1 = arith.constant 0 : index
    %c0_2 = arith.constant 0 : index
    %1 = vector.load %arg2[%c0_1, %c0_2] : memref<256x32xbf16, #tpu.memory_space<vmem>>, vector<256x32xbf16>
    %cst = arith.constant dense<0.000000e+00> : vector<32x32xf32>
    %2 = tpu.matmul %0, %1, %cst {dimension_numbers = #tpu.dot_dimension_numbers<[1], [0], [0], [1], [0, 0, 1, 1], [], []>} : vector<32x256xbf16>, vector<256x32xbf16>, vector<32x32xf32> -> vector<32x32xf32>
    %cst_3 = arith.constant dense<0.000000e+00> : vector<32xf32>
    %3 = vector.multi_reduction <add>, %2, %cst_3 [0] : vector<32x32xf32> to vector<32xf32>
    %4 = vector.shape_cast %3 : vector<32xf32> to vector<1x32xf32>
    %cst_4 = arith.constant 3.200000e+01 : f32
    %5 = vector.broadcast %cst_4 : f32 to vector<1x32xf32>
    %6 = arith.divf %4, %5 : vector<1x32xf32>
    %7 = vector.broadcast %6 : vector<1x32xf32> to vector<32x32xf32>
    %8 = arith.subf %2, %7 : vector<32x32xf32>
    %9 = arith.mulf %8, %8 : vector<32x32xf32>
    %cst_5 = arith.constant dense<0.000000e+00> : vector<32xf32>
    %10 = vector.multi_reduction <add>, %9, %cst_5 [0] : vector<32x32xf32> to vector<32xf32>
    %11 = vector.shape_cast %10 : vector<32xf32> to vector<1x32xf32>
    %cst_6 = arith.constant 3.200000e+01 : f32
    %12 = vector.broadcast %cst_6 : f32 to vector<1x32xf32>
    %13 = arith.divf %11, %12 : vector<1x32xf32>
    %c0_7 = arith.constant 0 : index
    %c0_8 = arith.constant 0 : index
    %14 = vector.load %arg3[%c0_7, %c0_8] : memref<1x32xf32, #tpu.memory_space<vmem>>, vector<1x32xf32>
    %cst_9 = arith.constant 9.99999974E-6 : f32
    %15 = vector.broadcast %cst_9 : f32 to vector<1x32xf32>
    %16 = arith.addf %13, %15 : vector<1x32xf32>
    %17 = math.rsqrt %16 : vector<1x32xf32>
    %18 = arith.mulf %14, %17 : vector<1x32xf32>
    %c0_10 = arith.constant 0 : index
    %c0_11 = arith.constant 0 : index
    %19 = vector.load %arg4[%c0_10, %c0_11] : memref<1x32xf32, #tpu.memory_space<vmem>>, vector<1x32xf32>
    %20 = arith.mulf %6, %18 : vector<1x32xf32>
    %21 = arith.subf %19, %20 : vector<1x32xf32>
    %22 = vector.broadcast %18 : vector<1x32xf32> to vector<32x32xf32>
    %23 = arith.mulf %2, %22 : vector<32x32xf32>
    %24 = vector.broadcast %21 : vector<1x32xf32> to vector<32x32xf32>
    %25 = arith.addf %23, %24 : vector<32x32xf32>
    %cst_12 = arith.constant 0.000000e+00 : f32
    %26 = vector.broadcast %cst_12 : f32 to vector<32x32xf32>
    %27 = arith.cmpf oge, %25, %26 : vector<32x32xf32>
    %cst_13 = arith.constant 2.000000e-01 : f32
    %28 = vector.broadcast %cst_13 : f32 to vector<32x32xf32>
    %29 = arith.mulf %28, %25 : vector<32x32xf32>
    %30 = arith.select %27, %25, %29 : vector<32x32xi1>, vector<32x32xf32>
    %c0_14 = arith.constant 0 : index
    %c0_15 = arith.constant 0 : index
    %31 = vector.load %arg5[%c0_14, %c0_15] : memref<32x32xf32, #tpu.memory_space<vmem>>, vector<32x32xf32>
    tpu.vector_store %arg5[%c0_14, %c0_15], %30 {strides = array<i32>} : memref<32x32xf32, #tpu.memory_space<vmem>>, vector<32x32xf32>,
    return
  }
  func.func @transform_0(%arg0: i32) -> (i32, i32) {
    %c0_i32 = arith.constant 0 : i32
    %c0_i32_0 = arith.constant 0 : i32
    %c0_i32_1 = arith.constant 0 : i32
    return %c0_i32, %c0_i32_0 : i32, i32
  }
  func.func @transform_1(%arg0: i32) -> (i32, i32) {
    %c0_i32 = arith.constant 0 : i32
    %c0_i32_0 = arith.constant 0 : i32
    %c0_i32_1 = arith.constant 0 : i32
    return %c0_i32, %c0_i32_0 : i32, i32
  }
  func.func @transform_2(%arg0: i32) -> (i32, i32) {
    %c0_i32 = arith.constant 0 : i32
    %c0_i32_0 = arith.constant 0 : i32
    %c0_i32_1 = arith.constant 0 : i32
    return %c0_i32, %c0_i32_0 : i32, i32
  }
  func.func @transform_3(%arg0: i32) -> (i32, i32) {
    %c0_i32 = arith.constant 0 : i32
    %c0_i32_0 = arith.constant 0 : i32
    %c0_i32_1 = arith.constant 0 : i32
    return %c0_i32, %c0_i32_0 : i32, i32
  }
  func.func @transform_4(%arg0: i32) -> (i32, i32) {
    %c0_i32 = arith.constant 0 : i32
    %c0_i32_0 = arith.constant 0 : i32
    %c0_i32_1 = arith.constant 0 : i32
    return %c0_i32, %c0_i32_0 : i32, i32
  }
}

module attributes {stable_mosaic.version = 11 : i64} {
  func.func @kernel(%arg0: i32, %arg1: memref<2x512xbf16, #tpu.memory_space<vmem>>, %arg2: memref<512x16xbf16, #tpu.memory_space<vmem>>, %arg3: memref<2x16xf32, #tpu.memory_space<vmem>>) attributes {dimension_semantics = [#tpu.dimension_semantics<parallel>], iteration_bounds = array<i64: 1>, scalar_prefetch = 0 : i64, scratch_operands = 0 : i64, tpu.core_type = #tpu.core_type<tc>, window_params = [{transform_indices = @transform_0, window_bounds = array<i64: 2, 512>}, {pipeline_mode = #tpu.pipeline_mode<synchronous>, transform_indices = @transform_1, window_bounds = array<i64: 512, 16>}, {transform_indices = @transform_2, window_bounds = array<i64: 2, 16>}]} {
    %c0 = arith.constant 0 : index
    %c0_0 = arith.constant 0 : index
    %0 = vector.load %arg1[%c0, %c0_0] : memref<2x512xbf16, #tpu.memory_space<vmem>>, vector<2x512xbf16>
    %c0_1 = arith.constant 0 : index
    %c0_2 = arith.constant 0 : index
    %1 = vector.load %arg2[%c0_1, %c0_2] : memref<512x16xbf16, #tpu.memory_space<vmem>>, vector<512x16xbf16>
    %cst = arith.constant dense<0.000000e+00> : vector<2x16xf32>
    %2 = tpu.matmul %0, %1, %cst {dimension_numbers = #tpu.dot_dimension_numbers<[1], [0], [0], [1], [0, 0, 1, 1], [], []>} : vector<2x512xbf16>, vector<512x16xbf16>, vector<2x16xf32> -> vector<2x16xf32>
    %c0_3 = arith.constant 0 : index
    %c0_4 = arith.constant 0 : index
    %3 = vector.load %arg3[%c0_3, %c0_4] : memref<2x16xf32, #tpu.memory_space<vmem>>, vector<2x16xf32>
    tpu.vector_store %arg3[%c0_3, %c0_4], %2 {strides = array<i32>} : memref<2x16xf32, #tpu.memory_space<vmem>>, vector<2x16xf32>,
    return
  }
  func.func @transform_0(%arg0: i32) -> (i32, i32) {
    %c0_i32 = arith.constant 0 : i32
    %c0_i32_0 = arith.constant 0 : i32
    return %arg0, %c0_i32 : i32, i32
  }
  func.func @transform_1(%arg0: i32) -> (i32, i32) {
    %c0_i32 = arith.constant 0 : i32
    %c0_i32_0 = arith.constant 0 : i32
    %c0_i32_1 = arith.constant 0 : i32
    return %c0_i32, %c0_i32_0 : i32, i32
  }
  func.func @transform_2(%arg0: i32) -> (i32, i32) {
    %c0_i32 = arith.constant 0 : i32
    %c0_i32_0 = arith.constant 0 : i32
    return %arg0, %c0_i32 : i32, i32
  }
}

module attributes {stable_mosaic.version = 11 : i64} {
  func.func @kernel(%arg0: i32, %arg1: memref<32x128xbf16, #tpu.memory_space<vmem>>, %arg2: memref<128x16xbf16, #tpu.memory_space<vmem>>, %arg3: memref<32x16xf32, #tpu.memory_space<vmem>>) attributes {dimension_semantics = [#tpu.dimension_semantics<parallel>], iteration_bounds = array<i64: 1>, scalar_prefetch = 0 : i64, scratch_operands = 0 : i64, tpu.core_type = #tpu.core_type<tc>, window_params = [{transform_indices = @transform_0, window_bounds = array<i64: 32, 128>}, {pipeline_mode = #tpu.pipeline_mode<synchronous>, transform_indices = @transform_1, window_bounds = array<i64: 128, 16>}, {transform_indices = @transform_2, window_bounds = array<i64: 32, 16>}]} {
    %c0 = arith.constant 0 : index
    %c0_0 = arith.constant 0 : index
    %0 = vector.load %arg1[%c0, %c0_0] : memref<32x128xbf16, #tpu.memory_space<vmem>>, vector<32x128xbf16>
    %c0_1 = arith.constant 0 : index
    %c0_2 = arith.constant 0 : index
    %1 = vector.load %arg2[%c0_1, %c0_2] : memref<128x16xbf16, #tpu.memory_space<vmem>>, vector<128x16xbf16>
    %cst = arith.constant dense<0.000000e+00> : vector<32x16xf32>
    %2 = tpu.matmul %0, %1, %cst {dimension_numbers = #tpu.dot_dimension_numbers<[1], [0], [0], [1], [0, 0, 1, 1], [], []>} : vector<32x128xbf16>, vector<128x16xbf16>, vector<32x16xf32> -> vector<32x16xf32>
    %c0_3 = arith.constant 0 : index
    %c0_4 = arith.constant 0 : index
    %3 = vector.load %arg3[%c0_3, %c0_4] : memref<32x16xf32, #tpu.memory_space<vmem>>, vector<32x16xf32>
    tpu.vector_store %arg3[%c0_3, %c0_4], %2 {strides = array<i32>} : memref<32x16xf32, #tpu.memory_space<vmem>>, vector<32x16xf32>,
    return
  }
  func.func @transform_0(%arg0: i32) -> (i32, i32) {
    %c0_i32 = arith.constant 0 : i32
    %c0_i32_0 = arith.constant 0 : i32
    return %arg0, %c0_i32 : i32, i32
  }
  func.func @transform_1(%arg0: i32) -> (i32, i32) {
    %c0_i32 = arith.constant 0 : i32
    %c0_i32_0 = arith.constant 0 : i32
    %c0_i32_1 = arith.constant 0 : i32
    return %c0_i32, %c0_i32_0 : i32, i32
  }
  func.func @transform_2(%arg0: i32) -> (i32, i32) {
    %c0_i32 = arith.constant 0 : i32
    %c0_i32_0 = arith.constant 0 : i32
    return %arg0, %c0_i32 : i32, i32
  }
}

module attributes {stable_mosaic.version = 11 : i64} {
  func.func @kernel(%arg0: i32, %arg1: memref<128x16xf32, #tpu.memory_space<vmem>>, %arg2: memref<1x16xf32, #tpu.memory_space<vmem>>, %arg3: memref<1x16xf32, #tpu.memory_space<vmem>>, %arg4: memref<128x16xf32, #tpu.memory_space<vmem>>) attributes {dimension_semantics = [#tpu.dimension_semantics<arbitrary>], iteration_bounds = array<i64: 1>, scalar_prefetch = 0 : i64, scratch_operands = 0 : i64, tpu.core_type = #tpu.core_type<tc>, window_params = [{pipeline_mode = #tpu.pipeline_mode<synchronous>, transform_indices = @transform_0, window_bounds = array<i64: 128, 16>}, {pipeline_mode = #tpu.pipeline_mode<synchronous>, transform_indices = @transform_1, window_bounds = array<i64: 1, 16>}, {pipeline_mode = #tpu.pipeline_mode<synchronous>, transform_indices = @transform_2, window_bounds = array<i64: 1, 16>}, {pipeline_mode = #tpu.pipeline_mode<synchronous>, transform_indices = @transform_3, window_bounds = array<i64: 128, 16>}]} {
    %c0 = arith.constant 0 : index
    %c0_0 = arith.constant 0 : index
    %0 = vector.load %arg1[%c0, %c0_0] : memref<128x16xf32, #tpu.memory_space<vmem>>, vector<128x16xf32>
    %cst = arith.constant dense<0.000000e+00> : vector<16xf32>
    %1 = vector.multi_reduction <add>, %0, %cst [0] : vector<128x16xf32> to vector<16xf32>
    %2 = vector.shape_cast %1 : vector<16xf32> to vector<1x16xf32>
    %cst_1 = arith.constant 1.280000e+02 : f32
    %3 = vector.broadcast %cst_1 : f32 to vector<1x16xf32>
    %4 = arith.divf %2, %3 : vector<1x16xf32>
    %5 = vector.broadcast %4 : vector<1x16xf32> to vector<128x16xf32>
    %6 = arith.subf %0, %5 : vector<128x16xf32>
    %7 = arith.mulf %6, %6 : vector<128x16xf32>
    %cst_2 = arith.constant dense<0.000000e+00> : vector<16xf32>
    %8 = vector.multi_reduction <add>, %7, %cst_2 [0] : vector<128x16xf32> to vector<16xf32>
    %9 = vector.shape_cast %8 : vector<16xf32> to vector<1x16xf32>
    %cst_3 = arith.constant 1.280000e+02 : f32
    %10 = vector.broadcast %cst_3 : f32 to vector<1x16xf32>
    %11 = arith.divf %9, %10 : vector<1x16xf32>
    %c0_4 = arith.constant 0 : index
    %c0_5 = arith.constant 0 : index
    %12 = vector.load %arg2[%c0_4, %c0_5] : memref<1x16xf32, #tpu.memory_space<vmem>>, vector<1x16xf32>
    %cst_6 = arith.constant 9.99999974E-6 : f32
    %13 = vector.broadcast %cst_6 : f32 to vector<1x16xf32>
    %14 = arith.addf %11, %13 : vector<1x16xf32>
    %15 = math.rsqrt %14 : vector<1x16xf32>
    %16 = arith.mulf %12, %15 : vector<1x16xf32>
    %c0_7 = arith.constant 0 : index
    %c0_8 = arith.constant 0 : index
    %17 = vector.load %arg3[%c0_7, %c0_8] : memref<1x16xf32, #tpu.memory_space<vmem>>, vector<1x16xf32>
    %18 = arith.mulf %4, %16 : vector<1x16xf32>
    %19 = arith.subf %17, %18 : vector<1x16xf32>
    %20 = vector.broadcast %16 : vector<1x16xf32> to vector<128x16xf32>
    %21 = arith.mulf %0, %20 : vector<128x16xf32>
    %22 = vector.broadcast %19 : vector<1x16xf32> to vector<128x16xf32>
    %23 = arith.addf %21, %22 : vector<128x16xf32>
    %cst_9 = arith.constant 0.000000e+00 : f32
    %24 = vector.broadcast %cst_9 : f32 to vector<128x16xf32>
    %25 = arith.cmpf oge, %23, %24 : vector<128x16xf32>
    %cst_10 = arith.constant 2.000000e-01 : f32
    %26 = vector.broadcast %cst_10 : f32 to vector<128x16xf32>
    %27 = arith.mulf %26, %23 : vector<128x16xf32>
    %28 = arith.select %25, %23, %27 : vector<128x16xi1>, vector<128x16xf32>
    %c0_11 = arith.constant 0 : index
    %c0_12 = arith.constant 0 : index
    %29 = vector.load %arg4[%c0_11, %c0_12] : memref<128x16xf32, #tpu.memory_space<vmem>>, vector<128x16xf32>
    tpu.vector_store %arg4[%c0_11, %c0_12], %28 {strides = array<i32>} : memref<128x16xf32, #tpu.memory_space<vmem>>, vector<128x16xf32>,
    return
  }
  func.func @transform_0(%arg0: i32) -> (i32, i32) {
    %c0_i32 = arith.constant 0 : i32
    %c0_i32_0 = arith.constant 0 : i32
    %c0_i32_1 = arith.constant 0 : i32
    return %c0_i32, %c0_i32_0 : i32, i32
  }
  func.func @transform_1(%arg0: i32) -> (i32, i32) {
    %c0_i32 = arith.constant 0 : i32
    %c0_i32_0 = arith.constant 0 : i32
    %c0_i32_1 = arith.constant 0 : i32
    return %c0_i32, %c0_i32_0 : i32, i32
  }
  func.func @transform_2(%arg0: i32) -> (i32, i32) {
    %c0_i32 = arith.constant 0 : i32
    %c0_i32_0 = arith.constant 0 : i32
    %c0_i32_1 = arith.constant 0 : i32
    return %c0_i32, %c0_i32_0 : i32, i32
  }
  func.func @transform_3(%arg0: i32) -> (i32, i32) {
    %c0_i32 = arith.constant 0 : i32
    %c0_i32_0 = arith.constant 0 : i32
    %c0_i32_1 = arith.constant 0 : i32
    return %c0_i32, %c0_i32_0 : i32, i32
  }
}

module attributes {stable_mosaic.version = 11 : i64} {
  func.func @kernel(%arg0: i32, %arg1: memref<128x64xbf16, #tpu.memory_space<vmem>>, %arg2: memref<64x8xbf16, #tpu.memory_space<vmem>>, %arg3: memref<128x8xf32, #tpu.memory_space<vmem>>) attributes {dimension_semantics = [#tpu.dimension_semantics<parallel>], iteration_bounds = array<i64: 1>, scalar_prefetch = 0 : i64, scratch_operands = 0 : i64, tpu.core_type = #tpu.core_type<tc>, window_params = [{transform_indices = @transform_0, window_bounds = array<i64: 128, 64>}, {pipeline_mode = #tpu.pipeline_mode<synchronous>, transform_indices = @transform_1, window_bounds = array<i64: 64, 8>}, {transform_indices = @transform_2, window_bounds = array<i64: 128, 8>}]} {
    %c0 = arith.constant 0 : index
    %c0_0 = arith.constant 0 : index
    %0 = vector.load %arg1[%c0, %c0_0] : memref<128x64xbf16, #tpu.memory_space<vmem>>, vector<128x64xbf16>
    %c0_1 = arith.constant 0 : index
    %c0_2 = arith.constant 0 : index
    %1 = vector.load %arg2[%c0_1, %c0_2] : memref<64x8xbf16, #tpu.memory_space<vmem>>, vector<64x8xbf16>
    %cst = arith.constant dense<0.000000e+00> : vector<128x8xf32>
    %2 = tpu.matmul %0, %1, %cst {dimension_numbers = #tpu.dot_dimension_numbers<[1], [0], [0], [1], [0, 0, 1, 1], [], []>} : vector<128x64xbf16>, vector<64x8xbf16>, vector<128x8xf32> -> vector<128x8xf32>
    %c0_3 = arith.constant 0 : index
    %c0_4 = arith.constant 0 : index
    %3 = vector.load %arg3[%c0_3, %c0_4] : memref<128x8xf32, #tpu.memory_space<vmem>>, vector<128x8xf32>
    tpu.vector_store %arg3[%c0_3, %c0_4], %2 {strides = array<i32>} : memref<128x8xf32, #tpu.memory_space<vmem>>, vector<128x8xf32>,
    return
  }
  func.func @transform_0(%arg0: i32) -> (i32, i32) {
    %c0_i32 = arith.constant 0 : i32
    %c0_i32_0 = arith.constant 0 : i32
    return %arg0, %c0_i32 : i32, i32
  }
  func.func @transform_1(%arg0: i32) -> (i32, i32) {
    %c0_i32 = arith.constant 0 : i32
    %c0_i32_0 = arith.constant 0 : i32
    %c0_i32_1 = arith.constant 0 : i32
    return %c0_i32, %c0_i32_0 : i32, i32
  }
  func.func @transform_2(%arg0: i32) -> (i32, i32) {
    %c0_i32 = arith.constant 0 : i32
    %c0_i32_0 = arith.constant 0 : i32
    return %arg0, %c0_i32 : i32, i32
  }
}

module attributes {stable_mosaic.version = 11 : i64} {
  func.func @kernel(%arg0: i32, %arg1: memref<512x8xf32, #tpu.memory_space<vmem>>, %arg2: memref<1x8xf32, #tpu.memory_space<vmem>>, %arg3: memref<1x8xf32, #tpu.memory_space<vmem>>, %arg4: memref<512x8xf32, #tpu.memory_space<vmem>>) attributes {dimension_semantics = [#tpu.dimension_semantics<arbitrary>], iteration_bounds = array<i64: 1>, scalar_prefetch = 0 : i64, scratch_operands = 0 : i64, tpu.core_type = #tpu.core_type<tc>, window_params = [{pipeline_mode = #tpu.pipeline_mode<synchronous>, transform_indices = @transform_0, window_bounds = array<i64: 512, 8>}, {pipeline_mode = #tpu.pipeline_mode<synchronous>, transform_indices = @transform_1, window_bounds = array<i64: 1, 8>}, {pipeline_mode = #tpu.pipeline_mode<synchronous>, transform_indices = @transform_2, window_bounds = array<i64: 1, 8>}, {pipeline_mode = #tpu.pipeline_mode<synchronous>, transform_indices = @transform_3, window_bounds = array<i64: 512, 8>}]} {
    %c0 = arith.constant 0 : index
    %c0_0 = arith.constant 0 : index
    %0 = vector.load %arg1[%c0, %c0_0] : memref<512x8xf32, #tpu.memory_space<vmem>>, vector<512x8xf32>
    %cst = arith.constant dense<0.000000e+00> : vector<8xf32>
    %1 = vector.multi_reduction <add>, %0, %cst [0] : vector<512x8xf32> to vector<8xf32>
    %2 = vector.shape_cast %1 : vector<8xf32> to vector<1x8xf32>
    %cst_1 = arith.constant 5.120000e+02 : f32
    %3 = vector.broadcast %cst_1 : f32 to vector<1x8xf32>
    %4 = arith.divf %2, %3 : vector<1x8xf32>
    %5 = vector.broadcast %4 : vector<1x8xf32> to vector<512x8xf32>
    %6 = arith.subf %0, %5 : vector<512x8xf32>
    %7 = arith.mulf %6, %6 : vector<512x8xf32>
    %cst_2 = arith.constant dense<0.000000e+00> : vector<8xf32>
    %8 = vector.multi_reduction <add>, %7, %cst_2 [0] : vector<512x8xf32> to vector<8xf32>
    %9 = vector.shape_cast %8 : vector<8xf32> to vector<1x8xf32>
    %cst_3 = arith.constant 5.120000e+02 : f32
    %10 = vector.broadcast %cst_3 : f32 to vector<1x8xf32>
    %11 = arith.divf %9, %10 : vector<1x8xf32>
    %c0_4 = arith.constant 0 : index
    %c0_5 = arith.constant 0 : index
    %12 = vector.load %arg2[%c0_4, %c0_5] : memref<1x8xf32, #tpu.memory_space<vmem>>, vector<1x8xf32>
    %cst_6 = arith.constant 9.99999974E-6 : f32
    %13 = vector.broadcast %cst_6 : f32 to vector<1x8xf32>
    %14 = arith.addf %11, %13 : vector<1x8xf32>
    %15 = math.rsqrt %14 : vector<1x8xf32>
    %16 = arith.mulf %12, %15 : vector<1x8xf32>
    %c0_7 = arith.constant 0 : index
    %c0_8 = arith.constant 0 : index
    %17 = vector.load %arg3[%c0_7, %c0_8] : memref<1x8xf32, #tpu.memory_space<vmem>>, vector<1x8xf32>
    %18 = arith.mulf %4, %16 : vector<1x8xf32>
    %19 = arith.subf %17, %18 : vector<1x8xf32>
    %20 = vector.broadcast %16 : vector<1x8xf32> to vector<512x8xf32>
    %21 = arith.mulf %0, %20 : vector<512x8xf32>
    %22 = vector.broadcast %19 : vector<1x8xf32> to vector<512x8xf32>
    %23 = arith.addf %21, %22 : vector<512x8xf32>
    %cst_9 = arith.constant 0.000000e+00 : f32
    %24 = vector.broadcast %cst_9 : f32 to vector<512x8xf32>
    %25 = arith.cmpf oge, %23, %24 : vector<512x8xf32>
    %cst_10 = arith.constant 2.000000e-01 : f32
    %26 = vector.broadcast %cst_10 : f32 to vector<512x8xf32>
    %27 = arith.mulf %26, %23 : vector<512x8xf32>
    %28 = arith.select %25, %23, %27 : vector<512x8xi1>, vector<512x8xf32>
    %c0_11 = arith.constant 0 : index
    %c0_12 = arith.constant 0 : index
    %29 = vector.load %arg4[%c0_11, %c0_12] : memref<512x8xf32, #tpu.memory_space<vmem>>, vector<512x8xf32>
    tpu.vector_store %arg4[%c0_11, %c0_12], %28 {strides = array<i32>} : memref<512x8xf32, #tpu.memory_space<vmem>>, vector<512x8xf32>,
    return
  }
  func.func @transform_0(%arg0: i32) -> (i32, i32) {
    %c0_i32 = arith.constant 0 : i32
    %c0_i32_0 = arith.constant 0 : i32
    %c0_i32_1 = arith.constant 0 : i32
    return %c0_i32, %c0_i32_0 : i32, i32
  }
  func.func @transform_1(%arg0: i32) -> (i32, i32) {
    %c0_i32 = arith.constant 0 : i32
    %c0_i32_0 = arith.constant 0 : i32
    %c0_i32_1 = arith.constant 0 : i32
    return %c0_i32, %c0_i32_0 : i32, i32
  }
  func.func @transform_2(%arg0: i32) -> (i32, i32) {
    %c0_i32 = arith.constant 0 : i32
    %c0_i32_0 = arith.constant 0 : i32
    %c0_i32_1 = arith.constant 0 : i32
    return %c0_i32, %c0_i32_0 : i32, i32
  }
  func.func @transform_3(%arg0: i32) -> (i32, i32) {
    %c0_i32 = arith.constant 0 : i32
    %c0_i32_0 = arith.constant 0 : i32
    %c0_i32_1 = arith.constant 0 : i32
    return %c0_i32, %c0_i32_0 : i32, i32
  }
}

module attributes {stable_mosaic.version = 11 : i64} {
  func.func @kernel(%arg0: i32, %arg1: memref<512x32xbf16, #tpu.memory_space<vmem>>, %arg2: memref<32x3xbf16, #tpu.memory_space<vmem>>, %arg3: memref<512x3xf32, #tpu.memory_space<vmem>>) attributes {dimension_semantics = [#tpu.dimension_semantics<parallel>], iteration_bounds = array<i64: 1>, scalar_prefetch = 0 : i64, scratch_operands = 0 : i64, tpu.core_type = #tpu.core_type<tc>, window_params = [{transform_indices = @transform_0, window_bounds = array<i64: 512, 32>}, {pipeline_mode = #tpu.pipeline_mode<synchronous>, transform_indices = @transform_1, window_bounds = array<i64: 32, 3>}, {transform_indices = @transform_2, window_bounds = array<i64: 512, 3>}]} {
    %c0 = arith.constant 0 : index
    %c0_0 = arith.constant 0 : index
    %0 = vector.load %arg1[%c0, %c0_0] : memref<512x32xbf16, #tpu.memory_space<vmem>>, vector<512x32xbf16>
    %c0_1 = arith.constant 0 : index
    %c0_2 = arith.constant 0 : index
    %1 = vector.load %arg2[%c0_1, %c0_2] : memref<32x3xbf16, #tpu.memory_space<vmem>>, vector<32x3xbf16>
    %cst = arith.constant dense<0.000000e+00> : vector<512x3xf32>
    %2 = tpu.matmul %0, %1, %cst {dimension_numbers = #tpu.dot_dimension_numbers<[1], [0], [0], [1], [0, 0, 1, 1], [], []>} : vector<512x32xbf16>, vector<32x3xbf16>, vector<512x3xf32> -> vector<512x3xf32>
    %3 = math.tanh %2 : vector<512x3xf32>
    %c0_3 = arith.constant 0 : index
    %c0_4 = arith.constant 0 : index
    %4 = vector.load %arg3[%c0_3, %c0_4] : memref<512x3xf32, #tpu.memory_space<vmem>>, vector<512x3xf32>
    tpu.vector_store %arg3[%c0_3, %c0_4], %3 {strides = array<i32>} : memref<512x3xf32, #tpu.memory_space<vmem>>, vector<512x3xf32>,
    return
  }
  func.func @transform_0(%arg0: i32) -> (i32, i32) {
    %c0_i32 = arith.constant 0 : i32
    %c0_i32_0 = arith.constant 0 : i32
    return %arg0, %c0_i32 : i32, i32
  }
  func.func @transform_1(%arg0: i32) -> (i32, i32) {
    %c0_i32 = arith.constant 0 : i32
    %c0_i32_0 = arith.constant 0 : i32
    %c0_i32_1 = arith.constant 0 : i32
    return %c0_i32, %c0_i32_0 : i32, i32
  }
  func.func @transform_2(%arg0: i32) -> (i32, i32) {
    %c0_i32 = arith.constant 0 : i32
    %c0_i32_0 = arith.constant 0 : i32
    return %arg0, %c0_i32 : i32, i32
  }
}

module attributes {stable_mosaic.version = 11 : i64} {
  func.func @kernel(%arg0: i32, %arg1: memref<2x512xbf16, #tpu.memory_space<vmem>>, %arg2: memref<512x16xbf16, #tpu.memory_space<vmem>>, %arg3: memref<2x16xf32, #tpu.memory_space<vmem>>) attributes {dimension_semantics = [#tpu.dimension_semantics<parallel>], iteration_bounds = array<i64: 1>, scalar_prefetch = 0 : i64, scratch_operands = 0 : i64, tpu.core_type = #tpu.core_type<tc>, window_params = [{transform_indices = @transform_0, window_bounds = array<i64: 2, 512>}, {pipeline_mode = #tpu.pipeline_mode<synchronous>, transform_indices = @transform_1, window_bounds = array<i64: 512, 16>}, {transform_indices = @transform_2, window_bounds = array<i64: 2, 16>}]} {
    %c0 = arith.constant 0 : index
    %c0_0 = arith.constant 0 : index
    %0 = vector.load %arg1[%c0, %c0_0] : memref<2x512xbf16, #tpu.memory_space<vmem>>, vector<2x512xbf16>
    %c0_1 = arith.constant 0 : index
    %c0_2 = arith.constant 0 : index
    %1 = vector.load %arg2[%c0_1, %c0_2] : memref<512x16xbf16, #tpu.memory_space<vmem>>, vector<512x16xbf16>
    %cst = arith.constant dense<0.000000e+00> : vector<2x16xf32>
    %2 = tpu.matmul %0, %1, %cst {dimension_numbers = #tpu.dot_dimension_numbers<[1], [0], [0], [1], [0, 0, 1, 1], [], []>} : vector<2x512xbf16>, vector<512x16xbf16>, vector<2x16xf32> -> vector<2x16xf32>
    %c0_3 = arith.constant 0 : index
    %c0_4 = arith.constant 0 : index
    %3 = vector.load %arg3[%c0_3, %c0_4] : memref<2x16xf32, #tpu.memory_space<vmem>>, vector<2x16xf32>
    tpu.vector_store %arg3[%c0_3, %c0_4], %2 {strides = array<i32>} : memref<2x16xf32, #tpu.memory_space<vmem>>, vector<2x16xf32>,
    return
  }
  func.func @transform_0(%arg0: i32) -> (i32, i32) {
    %c0_i32 = arith.constant 0 : i32
    %c0_i32_0 = arith.constant 0 : i32
    return %arg0, %c0_i32 : i32, i32
  }
  func.func @transform_1(%arg0: i32) -> (i32, i32) {
    %c0_i32 = arith.constant 0 : i32
    %c0_i32_0 = arith.constant 0 : i32
    %c0_i32_1 = arith.constant 0 : i32
    return %c0_i32, %c0_i32_0 : i32, i32
  }
  func.func @transform_2(%arg0: i32) -> (i32, i32) {
    %c0_i32 = arith.constant 0 : i32
    %c0_i32_0 = arith.constant 0 : i32
    return %arg0, %c0_i32 : i32, i32
  }
}

</mosaic_0001>

<bundles_post_ra>
// kernel: generator_forward.23
= control target key start
LH: loop header
LB: loop body
LE: loop exit
PB: predicated region body
PF: predicated region fallthrough
CT: control target
= control target key end

     0   :  { %s1955_s9 = smov 0   ;;  %s1957_s10 = smov 0   ;;  %s2404_s0 = inlined_call_operand.vmem [shape: bf16[722,48], index: 0, kind: input, shape index: {}]   ;;  %s2405_s1 = inlined_call_operand.vmem [shape: bf16[48,8], index: 1, kind: input, shape index: {}]   ;;  %s2406_s2 = inlined_call_operand.vmem [shape: f32[722,8], index: 2, kind: output, shape index: {}]  }
   0x1   :  { %s1959_s11 = smov 0  }
   0x2 LB: > { %s1968_s12 = sadd.s32 4294967295, %s1906_s11   ;;  %s1970_s13 = sadd.s32 1, %s1906_s11   ;;  %s1906_s11 = sphi %s1959_s11, %s2415_s11   ;;  %s1902_s10 = sphi %s1957_s10, %s2414_s10   ;;  %s1898_s9 = sphi %s1955_s9, %s2413_s9  }
   0x3   : > { %s63_s14 = ssub.s32 %s1906_s11, %s1970_s13  ;;  %s66_s15 = sadd.s32 1, %s1902_s10 }
   0x4   : > { %p64_p0 = scmp.eq.s32.totalorder %s63_s14, 0  ;;  %p76_p1 = scmp.ne.s32.totalorder %s1902_s10, %s1898_s9 }
   0x5   : > { %p77_p2 = scmp.eq.s32.totalorder %s1968_s12, 1  ;;  %p1527_p3 = scmp.ge.s32.totalorder %s1906_s11, 1 }
   0x6   : > { %s1978_s16 = scalar_select %p64_p0, %s1902_s10, %s66_s15  }
   0x7   : > { %p1980_p4 = por %p77_p2, %p76_p1  ;;  %p121_p5 = scmp.lt.s32.totalorder %s1906_s11, 3 }
   0x9   : > { %p122_p6 = pnand %p1527_p3, %p121_p5 }
   0xa   : > { %v1817_v0 = vld [vmem:[%s2405_s1] sm:$0xff] (!%p122_p6)   ;;  %s1988_s20 = sshll.u32 (!%p122_p6), %s1968_s12, 6  ;;  %v1818_v1 = vld [vmem:[%s2405_s1 + $0x8] sm:$0xff] (!%p122_p6)   ;;  %v1819_v2 = vld [vmem:[%s2405_s1 + $0x10] sm:$0xff] (!%p122_p6)   ;;  %vm414_vm0 = vcmask (!%p122_p6), 392192   ;;  %s143_s30 = sand.u32 (!%p122_p6), 1, %s1898_s9  }
   0xb   : > { %125 = sbr.rel (%p122_p6) target bundleno = 375 (0x177), region = 28  ;;  %p151_p7 = scmp.lt.s32.totalorder (!%p122_p6), %s1988_s20, 90  ;;  %1653 = vmatprep.subr.bf16.mxu0 (!%p122_p6), %v1817_v0  ;;  %1723 = vmatprep.subr.bf16.mxu1 (!%p122_p6), %v1817_v0  ;;  %vm992_vm1 = vcmask (!%p122_p6), 64512  }
   0xc   : > { %1654 = vmatpush3.bf16.msra.mxu0 (!%p122_p6), %v1817_v0  ;;  %1726 = vmatpush3.bf16.msra.mxu1 (!%p122_p6), %v1817_v0  ;;  %s1528_s3 = sshll.u32 (!%p122_p6), %s143_s30, 9 }
   0xd   : > { %1655 = vmatprep.subr.bf16.mxu0 (!%p122_p6), %v1818_v1  ;;  %1724 = vmatprep.subr.bf16.mxu1 (!%p122_p6), %v1818_v1  ;;  %s2068_s4 = scalar_lea.vmem (!%p122_p6), [#allocation2], %s1528_s3  }
  0x10   : > { %1656 = vmatpush3.bf16.msra.mxu0 (!%p122_p6), %v1818_v1  ;;  %1727 = vmatpush3.bf16.msra.mxu1 (!%p122_p6), %v1818_v1 }
  0x11   : > { %1657 = vmatprep.subr.bf16.mxu0 (!%p122_p6), %v1819_v2  ;;  %1725 = vmatprep.subr.bf16.mxu1 (!%p122_p6), %v1819_v2 }
  0x12   : > { %s152_s23 = scalar_select %p151_p7, %s1988_s20, 90 }
  0x13   : > { %s1065_s5 = ssub.s32 (%p1980_p4), 91, %s1988_s20  ;;  %s1615_s6 = sshll.u32 (%p1980_p4), %s1968_s12, 9 }
  0x14   : > { %s1530_s26 = sshll.u32 %s152_s23, 2  ;;  %1658 = vmatpush3.bf16.msra.mxu0 %v1819_v2  ;;  %1728 = vmatpush3.bf16.msra.mxu1 %v1819_v2  ;;  %p1066_p8 = scmp.lt.s32.totalorder (%p1980_p4), %s1065_s5, 64 }
  0x15   : > { %s2001_s29 = scalar_lea.vmem %s2404_s0, %s1530_s26  ;;  %s2205_s9 = scalar_lea.vmem (%p1980_p4), %s2406_s2, %s1615_s6  }
  0x16   : > { %v1820_v3 = vld [vmem:[%s2001_s29] sm:$0xff]   ;;  %v1822_v5 = vld [vmem:[%s2001_s29 + $0x8] sm:$0xff]   ;;  %v1824_v7 = vld [vmem:[%s2001_s29 + $0x10] sm:$0xff]  }
  0x17   : > { %v1821_v4 = vld [vmem:[%s2001_s29 + $0x80] sm:$0xff]   ;;  %1659 = vmatprep.mubr.msk.bf16.mxu0 %vm414_vm0, %v1820_v3  ;;  %v1823_v6 = vld [vmem:[%s2001_s29 + $0x88] sm:$0xff]   ;;  %v1825_v8 = vld [vmem:[%s2001_s29 + $0x90] sm:$0xff]  }
  0x18   : > { %1691 = vmatprep.mubr.msk.bf16.mxu1 %vm414_vm0, %v1821_v4  ;;  %1660 = vmatmul.mubr.msk.bf16.vlgmr.msra.gmra.mrb[0].mxu0 %vm414_vm0, %v1822_v5  ;;  %v1826_v9 = vld [vmem:[%s2001_s29 + $0x18] sm:$0xff]   ;;  %v1828_v11 = vld [vmem:[%s2001_s29 + $0x20] sm:$0xff]   ;;  %v1830_v13 = vld [vmem:[%s2001_s29 + $0x28] sm:$0xff]  }
  0x19   : > { %1692 = vmatmul.mubr.msk.bf16.vlgmr.msra.gmra.mrb[0].mxu1 %vm414_vm0, %v1823_v6  ;;  %1663 = vmatprep.mubr.msk.bf16.mxu0 %vm414_vm0, %v1824_v7  ;;  %v1827_v10 = vld [vmem:[%s2001_s29 + $0x98] sm:$0xff]   ;;  %v1829_v12 = vld [vmem:[%s2001_s29 + $0xa0] sm:$0xff]   ;;  %v1831_v14 = vld [vmem:[%s2001_s29 + $0xa8] sm:$0xff]  }
  0x1a   : > { %1695 = vmatprep.mubr.msk.bf16.mxu1 %vm414_vm0, %v1825_v8  ;;  %v1832_v15 = vld [vmem:[%s2001_s29 + $0x30] sm:$0xff]   ;;  %v1834_v17 = vld [vmem:[%s2001_s29 + $0x38] sm:$0xff]   ;;  %v1836_v19 = vld [vmem:[%s2001_s29 + $0x40] sm:$0xff]  }
  0x1b   : > { %v1833_v16 = vld [vmem:[%s2001_s29 + $0xb0] sm:$0xff]   ;;  %v1835_v18 = vld [vmem:[%s2001_s29 + $0xb8] sm:$0xff]   ;;  %v1837_v20 = vld [vmem:[%s2001_s29 + $0xc0] sm:$0xff]  }
  0x1c   : > { %v1838_v21 = vld [vmem:[%s2001_s29 + $0x48] sm:$0xff]   ;;  %v1840_v23 = vld [vmem:[%s2001_s29 + $0x50] sm:$0xff]   ;;  %v1842_v25 = vld [vmem:[%s2001_s29 + $0x58] sm:$0xff]  }
  0x1d   : > { %v1839_v22 = vld [vmem:[%s2001_s29 + $0xc8] sm:$0xff]   ;;  %v1841_v24 = vld [vmem:[%s2001_s29 + $0xd0] sm:$0xff]   ;;  %v1843_v26 = vld [vmem:[%s2001_s29 + $0xd8] sm:$0xff]  }
  0x1e   : > { %v1844_v27 = vld [vmem:[%s2001_s29 + $0x60] sm:$0xff]   ;;  %v1846_v29 = vld [vmem:[%s2001_s29 + $0x68] sm:$0xff]   ;;  %v1848_v31 = vld [vmem:[%s2001_s29 + $0x70] sm:$0xff]  }
  0x1f   : > { %v1845_v28 = vld [vmem:[%s2001_s29 + $0xe0] sm:$0xff]   ;;  %v1847_v30 = vld [vmem:[%s2001_s29 + $0xe8] sm:$0xff]   ;;  %v1849_v32 = vld [vmem:[%s2001_s29 + $0xf0] sm:$0xff]  }
  0x20   : > { %1664 = vmatmul.mubr.msk.bf16.gmra.mrb[4].mxu0 %vm414_vm0, %v1826_v9  ;;  %v1850_v33 = vld [vmem:[%s2001_s29 + $0x78] sm:$0xff]  }
  0x21   : > { %1696 = vmatmul.mubr.msk.bf16.gmra.mrb[4].mxu1 %vm414_vm0, %v1827_v10  ;;  %1667 = vmatprep.mubr.msk.bf16.mxu0 %vm414_vm0, %v1828_v11  ;;  %v1851_v34 = vld [vmem:[%s2001_s29 + $0xf8] sm:$0xff]  }
  0x22   : > { %1699 = vmatprep.mubr.msk.bf16.mxu1 %vm414_vm0, %v1829_v12 }
  0x28   : > { %1668 = vmatmul.mubr.msk.bf16.gmra.mrb[8].mxu0 %vm414_vm0, %v1830_v13 }
  0x29   : > { %1700 = vmatmul.mubr.msk.bf16.gmra.mrb[8].mxu1 %vm414_vm0, %v1831_v14  ;;  %1671 = vmatprep.mubr.msk.bf16.mxu0 %vm414_vm0, %v1832_v15 }
  0x2a   : > { %1703 = vmatprep.mubr.msk.bf16.mxu1 %vm414_vm0, %v1833_v16 }
  0x30   : > { %1672 = vmatmul.mubr.msk.bf16.gmra.mrb[12].mxu0 %vm414_vm0, %v1834_v17 }
  0x31   : > { %1704 = vmatmul.mubr.msk.bf16.gmra.mrb[12].mxu1 %vm414_vm0, %v1835_v18  ;;  %1675 = vmatprep.mubr.msk.bf16.mxu0 %vm414_vm0, %v1836_v19 }
  0x32   : > { %1707 = vmatprep.mubr.msk.bf16.mxu1 %vm414_vm0, %v1837_v20 }
  0x38   : > { %1676 = vmatmul.mubr.msk.bf16.gmra.mrb[16].mxu0 %vm414_vm0, %v1838_v21 }
  0x39   : > { %1708 = vmatmul.mubr.msk.bf16.gmra.mrb[16].mxu1 %vm414_vm0, %v1839_v22  ;;  %1679 = vmatprep.mubr.msk.bf16.mxu0 %vm414_vm0, %v1840_v23 }
  0x3a   : > { %1711 = vmatprep.mubr.msk.bf16.mxu1 %vm414_vm0, %v1841_v24 }
  0x40   : > { %1680 = vmatmul.mubr.msk.bf16.gmra.mrb[20].mxu0 %vm414_vm0, %v1842_v25 }
  0x41   : > { %1712 = vmatmul.mubr.msk.bf16.gmra.mrb[20].mxu1 %vm414_vm0, %v1843_v26  ;;  %1683 = vmatprep.mubr.msk.bf16.mxu0 %vm414_vm0, %v1844_v27 }
  0x42   : > { %1715 = vmatprep.mubr.msk.bf16.mxu1 %vm414_vm0, %v1845_v28 }
  0x48   : > { %1684 = vmatmul.mubr.msk.bf16.gmra.mrb[24].mxu0 %vm414_vm0, %v1846_v29 }
  0x49   : > { %1716 = vmatmul.mubr.msk.bf16.gmra.mrb[24].mxu1 %vm414_vm0, %v1847_v30  ;;  %1687 = vmatprep.mubr.msk.bf16.mxu0 %vm414_vm0, %v1848_v31 }
  0x4a   : > { %1719 = vmatprep.mubr.msk.bf16.mxu1 %vm414_vm0, %v1849_v32 }
  0x50   : > { %1688 = vmatmul.mubr.msk.bf16.gmra.mrb[28].mxu0 %vm414_vm0, %v1850_v33 }
  0x51   : > { %1720 = vmatmul.mubr.msk.bf16.gmra.mrb[28].mxu1 %vm414_vm0, %v1851_v34 }
  0xeb   : > { %v1661_v35 = vpop.f32.mrb[0].mxu0 }
  0xec   : > { %v1693_v36 = vpop.f32.mrb[0].mxu1  ;;  %vm802_vm2 = vcmp.ge.f32.partialorder %v1661_v35, 0.0  ;;  %v866_v37 = vmul.f32 0.2, %v1661_v35  ;;  %v545_v39 = vpop.f32.mrb[1].mxu0 }
  0xed   : > { %vm834_vm3 = vcmp.ge.f32.partialorder %v1693_v36, 0.0  ;;  %v898_v38 = vmul.f32 0.2, %v1693_v36  ;;  %v673_v40 = vpop.f32.mrb[1].mxu1  ;;  %vm800_vm4 = vcmp.ge.f32.partialorder %v545_v39, 0.0  ;;  %v1662_v44 = vpop.f32.mrb[2].mxu0 }
  0xee   : > { %v930_v41 = vsel %vm802_vm2, %v1661_v35, %v866_v37  ;;  %v864_v43 = vmul.f32 0.2, %v545_v39  ;;  %v1694_v45 = vpop.f32.mrb[2].mxu1  ;;  %vm832_vm5 = vcmp.ge.f32.partialorder %v673_v40, 0.0  ;;  %v896_v46 = vmul.f32 0.2, %v673_v40 }
  0xef   : > { %v962_v42 = vsel %vm834_vm3, %v1693_v36, %v898_v38  ;;  %995 = vst.msk [vmem:[%s2068_s4 + $0x10] sm:$0xff] %vm992_vm1, %v930_v41  ;;  %vm803_vm6 = vcmp.ge.f32.partialorder %v1662_v44, 0.0  ;;  %v867_v47 = vmul.f32 0.2, %v1662_v44  ;;  %vm835_vm7 = vcmp.ge.f32.partialorder %v1694_v45, 0.0  ;;  %v548_v50 = vpop.f32.mrb[3].mxu0 }
  0xf0   : > { %1027 = vst.msk [vmem:[%s2068_s4 + $0x110] sm:$0xff] %vm992_vm1, %v962_v42  ;;  %v928_v48 = vsel %vm800_vm4, %v545_v39, %v864_v43  ;;  %v899_v49 = vmul.f32 0.2, %v1694_v45  ;;  %v676_v51 = vpop.f32.mrb[3].mxu1  ;;  %v960_v52 = vsel %vm832_vm5, %v673_v40, %v896_v46  ;;  %vm801_vm8 = vcmp.ge.f32.partialorder %v548_v50, 0.0 }
  0xf1   : > { %993 = vst.msk [vmem:[%s2068_s4] sm:$0xff] %vm992_vm1, %v928_v48  ;;  %v931_v53 = vsel %vm803_vm6, %v1662_v44, %v867_v47  ;;  %v865_v54 = vmul.f32 0.2, %v548_v50  ;;  %1025 = vst.msk [vmem:[%s2068_s4 + $0x100] sm:$0xff] %vm992_vm1, %v960_v52  ;;  %vm833_vm9 = vcmp.ge.f32.partialorder %v676_v51, 0.0 }
  0xf2   : > { %996 = vst.msk [vmem:[%s2068_s4 + $0x18] sm:$0xff] %vm992_vm1, %v931_v53  ;;  %v963_v55 = vsel %vm835_vm7, %v1694_v45, %v899_v49  ;;  %v897_v56 = vmul.f32 0.2, %v676_v51 }
  0xf3   : > { %1028 = vst.msk [vmem:[%s2068_s4 + $0x118] sm:$0xff] %vm992_vm1, %v963_v55  ;;  %v929_v57 = vsel %vm801_vm8, %v548_v50, %v865_v54  ;;  %v1665_v58 = vpop.f32.mrb[4].mxu0 }
  0xf4   : > { %v1697_v59 = vpop.f32.mrb[4].mxu1  ;;  %994 = vst.msk [vmem:[%s2068_s4 + $0x8] sm:$0xff] %vm992_vm1, %v929_v57  ;;  %v961_v60 = vsel %vm833_vm9, %v676_v51, %v897_v56  ;;  %vm806_vm10 = vcmp.ge.f32.partialorder %v1665_v58, 0.0  ;;  %v870_v61 = vmul.f32 0.2, %v1665_v58  ;;  %v561_v62 = vpop.f32.mrb[5].mxu0 }
  0xf5   : > { %vm838_vm11 = vcmp.ge.f32.partialorder %v1697_v59, 0.0  ;;  %v689_v63 = vpop.f32.mrb[5].mxu1  ;;  %1026 = vst.msk [vmem:[%s2068_s4 + $0x108] sm:$0xff] %vm992_vm1, %v961_v60  ;;  %v902_v0 = vmul.f32 0.2, %v1697_v59  ;;  %vm804_vm12 = vcmp.ge.f32.partialorder %v561_v62, 0.0 }
  0xf6   : > { %v868_v1 = vmul.f32 0.2, %v561_v62  ;;  %vm836_vm13 = vcmp.ge.f32.partialorder %v689_v63, 0.0  ;;  %v934_v2 = vsel %vm806_vm10, %v1665_v58, %v870_v61  ;;  %v900_v3 = vmul.f32 0.2, %v689_v63  ;;  %v1666_v4 = vpop.f32.mrb[6].mxu0 }
  0xf7   : > { %v1698_v5 = vpop.f32.mrb[6].mxu1  ;;  %999 = vst.msk [vmem:[%s2068_s4 + $0x30] sm:$0xff] %vm992_vm1, %v934_v2  ;;  %v966_v6 = vsel %vm838_vm11, %v1697_v59, %v902_v0  ;;  %vm807_vm14 = vcmp.ge.f32.partialorder %v1666_v4, 0.0  ;;  %v871_v8 = vmul.f32 0.2, %v1666_v4  ;;  %v564_v9 = vpop.f32.mrb[7].mxu0 }
  0xf8   : > { %v932_v7 = vsel %vm804_vm12, %v561_v62, %v868_v1  ;;  %v692_v10 = vpop.f32.mrb[7].mxu1  ;;  %1031 = vst.msk [vmem:[%s2068_s4 + $0x130] sm:$0xff] %vm992_vm1, %v966_v6  ;;  %v964_v11 = vsel %vm836_vm13, %v689_v63, %v900_v3  ;;  %vm839_vm15 = vcmp.ge.f32.partialorder %v1698_v5, 0.0  ;;  %v903_v12 = vmul.f32 0.2, %v1698_v5 }
  0xf9   : > { %997 = vst.msk [vmem:[%s2068_s4 + $0x20] sm:$0xff] %vm992_vm1, %v932_v7  ;;  %vm805_vm0 = vcmp.ge.f32.partialorder %v564_v9, 0.0  ;;  %1029 = vst.msk [vmem:[%s2068_s4 + $0x120] sm:$0xff] %vm992_vm1, %v964_v11  ;;  %v935_v13 = vsel %vm807_vm14, %v1666_v4, %v871_v8  ;;  %v869_v14 = vmul.f32 0.2, %v564_v9  ;;  %vm837_vm2 = vcmp.ge.f32.partialorder %v692_v10, 0.0 }
  0xfa   : > { %v901_v15 = vmul.f32 0.2, %v692_v10  ;;  %1000 = vst.msk [vmem:[%s2068_s4 + $0x38] sm:$0xff] %vm992_vm1, %v935_v13  ;;  %v967_v16 = vsel %vm839_vm15, %v1698_v5, %v903_v12 }
  0xfb   : > { %1032 = vst.msk [vmem:[%s2068_s4 + $0x138] sm:$0xff] %vm992_vm1, %v967_v16  ;;  %v933_v17 = vsel %vm805_vm0, %v564_v9, %v869_v14  ;;  %v1669_v19 = vpop.f32.mrb[8].mxu0 }
  0xfc   : > { %v965_v18 = vsel %vm837_vm2, %v692_v10, %v901_v15  ;;  %v1701_v20 = vpop.f32.mrb[8].mxu1  ;;  %998 = vst.msk [vmem:[%s2068_s4 + $0x28] sm:$0xff] %vm992_vm1, %v933_v17  ;;  %vm810_vm3 = vcmp.ge.f32.partialorder %v1669_v19, 0.0  ;;  %v874_v21 = vmul.f32 0.2, %v1669_v19  ;;  %v577_v23 = vpop.f32.mrb[9].mxu0 }
  0xfd   : > { %1030 = vst.msk [vmem:[%s2068_s4 + $0x128] sm:$0xff] %vm992_vm1, %v965_v18  ;;  %vm842_vm4 = vcmp.ge.f32.partialorder %v1701_v20, 0.0  ;;  %v906_v22 = vmul.f32 0.2, %v1701_v20  ;;  %v705_v24 = vpop.f32.mrb[9].mxu1  ;;  %vm808_vm5 = vcmp.ge.f32.partialorder %v577_v23, 0.0 }
  0xfe   : > { %v938_v25 = vsel %vm810_vm3, %v1669_v19, %v874_v21  ;;  %v872_v27 = vmul.f32 0.2, %v577_v23  ;;  %v1670_v28 = vpop.f32.mrb[10].mxu0  ;;  %v1702_v29 = vpop.f32.mrb[10].mxu1  ;;  %vm840_vm6 = vcmp.ge.f32.partialorder %v705_v24, 0.0 }
  0xff   : > { %v970_v26 = vsel %vm842_vm4, %v1701_v20, %v906_v22  ;;  %1003 = vst.msk [vmem:[%s2068_s4 + $0x50] sm:$0xff] %vm992_vm1, %v938_v25  ;;  %v904_v30 = vmul.f32 0.2, %v705_v24  ;;  %vm811_vm7 = vcmp.ge.f32.partialorder %v1670_v28, 0.0  ;;  %v875_v31 = vmul.f32 0.2, %v1670_v28 }
 0x100   : > { %1035 = vst.msk [vmem:[%s2068_s4 + $0x150] sm:$0xff] %vm992_vm1, %v970_v26  ;;  %v936_v32 = vsel %vm808_vm5, %v577_v23, %v872_v27  ;;  %vm843_vm8 = vcmp.ge.f32.partialorder %v1702_v29, 0.0  ;;  %v907_v33 = vmul.f32 0.2, %v1702_v29  ;;  %v580_v34 = vpop.f32.mrb[11].mxu0  ;;  %v708_v35 = vpop.f32.mrb[11].mxu1 }
 0x101   : > { %1001 = vst.msk [vmem:[%s2068_s4 + $0x40] sm:$0xff] %vm992_vm1, %v936_v32  ;;  %v968_v36 = vsel %vm840_vm6, %v705_v24, %v904_v30  ;;  %v939_v37 = vsel %vm811_vm7, %v1670_v28, %v875_v31  ;;  %vm809_vm9 = vcmp.ge.f32.partialorder %v580_v34, 0.0  ;;  %v873_v38 = vmul.f32 0.2, %v580_v34 }
 0x102   : > { %1033 = vst.msk [vmem:[%s2068_s4 + $0x140] sm:$0xff] %vm992_vm1, %v968_v36  ;;  %1004 = vst.msk [vmem:[%s2068_s4 + $0x58] sm:$0xff] %vm992_vm1, %v939_v37  ;;  %v971_v39 = vsel %vm843_vm8, %v1702_v29, %v907_v33  ;;  %vm841_vm10 = vcmp.ge.f32.partialorder %v708_v35, 0.0  ;;  %v905_v40 = vmul.f32 0.2, %v708_v35 }
 0x103   : > { %1036 = vst.msk [vmem:[%s2068_s4 + $0x158] sm:$0xff] %vm992_vm1, %v971_v39  ;;  %v937_v41 = vsel %vm809_vm9, %v580_v34, %v873_v38  ;;  %v1673_v42 = vpop.f32.mrb[12].mxu0 }
 0x104   : > { %v1705_v43 = vpop.f32.mrb[12].mxu1  ;;  %1002 = vst.msk [vmem:[%s2068_s4 + $0x48] sm:$0xff] %vm992_vm1, %v937_v41  ;;  %v969_v44 = vsel %vm841_vm10, %v708_v35, %v905_v40  ;;  %vm814_vm11 = vcmp.ge.f32.partialorder %v1673_v42, 0.0  ;;  %v878_v45 = vmul.f32 0.2, %v1673_v42  ;;  %v593_v46 = vpop.f32.mrb[13].mxu0 }
 0x105   : > { %vm846_vm12 = vcmp.ge.f32.partialorder %v1705_v43, 0.0  ;;  %v721_v47 = vpop.f32.mrb[13].mxu1  ;;  %1034 = vst.msk [vmem:[%s2068_s4 + $0x148] sm:$0xff] %vm992_vm1, %v969_v44  ;;  %v910_v48 = vmul.f32 0.2, %v1705_v43  ;;  %vm812_vm13 = vcmp.ge.f32.partialorder %v593_v46, 0.0 }
 0x106   : > { %v876_v49 = vmul.f32 0.2, %v593_v46  ;;  %vm844_vm14 = vcmp.ge.f32.partialorder %v721_v47, 0.0  ;;  %v942_v50 = vsel %vm814_vm11, %v1673_v42, %v878_v45  ;;  %v908_v51 = vmul.f32 0.2, %v721_v47  ;;  %v1674_v52 = vpop.f32.mrb[14].mxu0 }
 0x107   : > { %v1706_v53 = vpop.f32.mrb[14].mxu1  ;;  %1007 = vst.msk [vmem:[%s2068_s4 + $0x70] sm:$0xff] %vm992_vm1, %v942_v50  ;;  %v974_v54 = vsel %vm846_vm12, %v1705_v43, %v910_v48  ;;  %vm815_vm15 = vcmp.ge.f32.partialorder %v1674_v52, 0.0  ;;  %v879_v56 = vmul.f32 0.2, %v1674_v52  ;;  %v596_v57 = vpop.f32.mrb[15].mxu0 }
 0x108   : > { %v940_v55 = vsel %vm812_vm13, %v593_v46, %v876_v49  ;;  %v724_v58 = vpop.f32.mrb[15].mxu1  ;;  %1039 = vst.msk [vmem:[%s2068_s4 + $0x170] sm:$0xff] %vm992_vm1, %v974_v54  ;;  %v972_v59 = vsel %vm844_vm14, %v721_v47, %v908_v51  ;;  %vm847_vm0 = vcmp.ge.f32.partialorder %v1706_v53, 0.0  ;;  %v911_v60 = vmul.f32 0.2, %v1706_v53 }
 0x109   : > { %1005 = vst.msk [vmem:[%s2068_s4 + $0x60] sm:$0xff] %vm992_vm1, %v940_v55  ;;  %vm813_vm2 = vcmp.ge.f32.partialorder %v596_v57, 0.0  ;;  %1037 = vst.msk [vmem:[%s2068_s4 + $0x160] sm:$0xff] %vm992_vm1, %v972_v59  ;;  %v943_v61 = vsel %vm815_vm15, %v1674_v52, %v879_v56  ;;  %v877_v62 = vmul.f32 0.2, %v596_v57  ;;  %vm845_vm3 = vcmp.ge.f32.partialorder %v724_v58, 0.0 }
 0x10a   : > { %v909_v63 = vmul.f32 0.2, %v724_v58  ;;  %1008 = vst.msk [vmem:[%s2068_s4 + $0x78] sm:$0xff] %vm992_vm1, %v943_v61  ;;  %v975_v0 = vsel %vm847_vm0, %v1706_v53, %v911_v60 }
 0x10b   : > { %1040 = vst.msk [vmem:[%s2068_s4 + $0x178] sm:$0xff] %vm992_vm1, %v975_v0  ;;  %v941_v1 = vsel %vm813_vm2, %v596_v57, %v877_v62  ;;  %v1677_v3 = vpop.f32.mrb[16].mxu0 }
 0x10c   : > { %v973_v2 = vsel %vm845_vm3, %v724_v58, %v909_v63  ;;  %v1709_v4 = vpop.f32.mrb[16].mxu1  ;;  %1006 = vst.msk [vmem:[%s2068_s4 + $0x68] sm:$0xff] %vm992_vm1, %v941_v1  ;;  %vm818_vm4 = vcmp.ge.f32.partialorder %v1677_v3, 0.0  ;;  %v882_v5 = vmul.f32 0.2, %v1677_v3  ;;  %v609_v7 = vpop.f32.mrb[17].mxu0 }
 0x10d   : > { %1038 = vst.msk [vmem:[%s2068_s4 + $0x168] sm:$0xff] %vm992_vm1, %v973_v2  ;;  %vm850_vm5 = vcmp.ge.f32.partialorder %v1709_v4, 0.0  ;;  %v914_v6 = vmul.f32 0.2, %v1709_v4  ;;  %v737_v8 = vpop.f32.mrb[17].mxu1  ;;  %vm816_vm6 = vcmp.ge.f32.partialorder %v609_v7, 0.0 }
 0x10e   : > { %v946_v9 = vsel %vm818_vm4, %v1677_v3, %v882_v5  ;;  %v880_v11 = vmul.f32 0.2, %v609_v7  ;;  %v1678_v12 = vpop.f32.mrb[18].mxu0  ;;  %v1710_v13 = vpop.f32.mrb[18].mxu1  ;;  %vm848_vm7 = vcmp.ge.f32.partialorder %v737_v8, 0.0 }
 0x10f   : > { %v978_v10 = vsel %vm850_vm5, %v1709_v4, %v914_v6  ;;  %1011 = vst.msk [vmem:[%s2068_s4 + $0x90] sm:$0xff] %vm992_vm1, %v946_v9  ;;  %v912_v14 = vmul.f32 0.2, %v737_v8  ;;  %vm819_vm8 = vcmp.ge.f32.partialorder %v1678_v12, 0.0  ;;  %v883_v15 = vmul.f32 0.2, %v1678_v12 }
 0x110   : > { %1043 = vst.msk [vmem:[%s2068_s4 + $0x190] sm:$0xff] %vm992_vm1, %v978_v10  ;;  %v944_v16 = vsel %vm816_vm6, %v609_v7, %v880_v11  ;;  %vm851_vm9 = vcmp.ge.f32.partialorder %v1710_v13, 0.0  ;;  %v915_v17 = vmul.f32 0.2, %v1710_v13  ;;  %v612_v18 = vpop.f32.mrb[19].mxu0  ;;  %v740_v19 = vpop.f32.mrb[19].mxu1 }
 0x111   : > { %1009 = vst.msk [vmem:[%s2068_s4 + $0x80] sm:$0xff] %vm992_vm1, %v944_v16  ;;  %v976_v20 = vsel %vm848_vm7, %v737_v8, %v912_v14  ;;  %v947_v21 = vsel %vm819_vm8, %v1678_v12, %v883_v15  ;;  %vm817_vm10 = vcmp.ge.f32.partialorder %v612_v18, 0.0  ;;  %v881_v22 = vmul.f32 0.2, %v612_v18 }
 0x112   : > { %1041 = vst.msk [vmem:[%s2068_s4 + $0x180] sm:$0xff] %vm992_vm1, %v976_v20  ;;  %1012 = vst.msk [vmem:[%s2068_s4 + $0x98] sm:$0xff] %vm992_vm1, %v947_v21  ;;  %v979_v23 = vsel %vm851_vm9, %v1710_v13, %v915_v17  ;;  %vm849_vm11 = vcmp.ge.f32.partialorder %v740_v19, 0.0  ;;  %v913_v24 = vmul.f32 0.2, %v740_v19 }
 0x113   : > { %1044 = vst.msk [vmem:[%s2068_s4 + $0x198] sm:$0xff] %vm992_vm1, %v979_v23  ;;  %v945_v25 = vsel %vm817_vm10, %v612_v18, %v881_v22  ;;  %v1681_v26 = vpop.f32.mrb[20].mxu0 }
 0x114   : > { %v1713_v27 = vpop.f32.mrb[20].mxu1  ;;  %1010 = vst.msk [vmem:[%s2068_s4 + $0x88] sm:$0xff] %vm992_vm1, %v945_v25  ;;  %v977_v28 = vsel %vm849_vm11, %v740_v19, %v913_v24  ;;  %vm822_vm12 = vcmp.ge.f32.partialorder %v1681_v26, 0.0  ;;  %v886_v29 = vmul.f32 0.2, %v1681_v26  ;;  %v625_v30 = vpop.f32.mrb[21].mxu0 }
 0x115   : > { %vm854_vm13 = vcmp.ge.f32.partialorder %v1713_v27, 0.0  ;;  %v753_v31 = vpop.f32.mrb[21].mxu1  ;;  %1042 = vst.msk [vmem:[%s2068_s4 + $0x188] sm:$0xff] %vm992_vm1, %v977_v28  ;;  %v918_v32 = vmul.f32 0.2, %v1713_v27  ;;  %vm820_vm14 = vcmp.ge.f32.partialorder %v625_v30, 0.0 }
 0x116   : > { %v884_v33 = vmul.f32 0.2, %v625_v30  ;;  %vm852_vm15 = vcmp.ge.f32.partialorder %v753_v31, 0.0  ;;  %v950_v34 = vsel %vm822_vm12, %v1681_v26, %v886_v29  ;;  %v916_v35 = vmul.f32 0.2, %v753_v31  ;;  %v1682_v36 = vpop.f32.mrb[22].mxu0 }
 0x117   : > { %v1714_v37 = vpop.f32.mrb[22].mxu1  ;;  %1015 = vst.msk [vmem:[%s2068_s4 + $0xb0] sm:$0xff] %vm992_vm1, %v950_v34  ;;  %v982_v38 = vsel %vm854_vm13, %v1713_v27, %v918_v32  ;;  %vm823_vm0 = vcmp.ge.f32.partialorder %v1682_v36, 0.0  ;;  %v887_v40 = vmul.f32 0.2, %v1682_v36  ;;  %v628_v41 = vpop.f32.mrb[23].mxu0 }
 0x118   : > { %v948_v39 = vsel %vm820_vm14, %v625_v30, %v884_v33  ;;  %v756_v42 = vpop.f32.mrb[23].mxu1  ;;  %1047 = vst.msk [vmem:[%s2068_s4 + $0x1b0] sm:$0xff] %vm992_vm1, %v982_v38  ;;  %v980_v43 = vsel %vm852_vm15, %v753_v31, %v916_v35  ;;  %vm855_vm2 = vcmp.ge.f32.partialorder %v1714_v37, 0.0  ;;  %v919_v44 = vmul.f32 0.2, %v1714_v37 }
 0x119   : > { %1013 = vst.msk [vmem:[%s2068_s4 + $0xa0] sm:$0xff] %vm992_vm1, %v948_v39  ;;  %vm821_vm3 = vcmp.ge.f32.partialorder %v628_v41, 0.0  ;;  %1045 = vst.msk [vmem:[%s2068_s4 + $0x1a0] sm:$0xff] %vm992_vm1, %v980_v43  ;;  %v951_v45 = vsel %vm823_vm0, %v1682_v36, %v887_v40  ;;  %v885_v46 = vmul.f32 0.2, %v628_v41  ;;  %vm853_vm4 = vcmp.ge.f32.partialorder %v756_v42, 0.0 }
 0x11a   : > { %v917_v47 = vmul.f32 0.2, %v756_v42  ;;  %1016 = vst.msk [vmem:[%s2068_s4 + $0xb8] sm:$0xff] %vm992_vm1, %v951_v45  ;;  %v983_v48 = vsel %vm855_vm2, %v1714_v37, %v919_v44 }
 0x11b   : > { %1048 = vst.msk [vmem:[%s2068_s4 + $0x1b8] sm:$0xff] %vm992_vm1, %v983_v48  ;;  %v949_v49 = vsel %vm821_vm3, %v628_v41, %v885_v46  ;;  %v1685_v51 = vpop.f32.mrb[24].mxu0 }
 0x11c   : > { %v981_v50 = vsel %vm853_vm4, %v756_v42, %v917_v47  ;;  %v1717_v52 = vpop.f32.mrb[24].mxu1  ;;  %1014 = vst.msk [vmem:[%s2068_s4 + $0xa8] sm:$0xff] %vm992_vm1, %v949_v49  ;;  %vm826_vm5 = vcmp.ge.f32.partialorder %v1685_v51, 0.0  ;;  %v890_v53 = vmul.f32 0.2, %v1685_v51  ;;  %v641_v55 = vpop.f32.mrb[25].mxu0 }
 0x11d   : > { %1046 = vst.msk [vmem:[%s2068_s4 + $0x1a8] sm:$0xff] %vm992_vm1, %v981_v50  ;;  %vm858_vm6 = vcmp.ge.f32.partialorder %v1717_v52, 0.0  ;;  %v922_v54 = vmul.f32 0.2, %v1717_v52  ;;  %v769_v56 = vpop.f32.mrb[25].mxu1  ;;  %vm824_vm7 = vcmp.ge.f32.partialorder %v641_v55, 0.0 }
 0x11e   : > { %v954_v57 = vsel %vm826_vm5, %v1685_v51, %v890_v53  ;;  %v888_v59 = vmul.f32 0.2, %v641_v55  ;;  %v1686_v60 = vpop.f32.mrb[26].mxu0  ;;  %v1718_v61 = vpop.f32.mrb[26].mxu1  ;;  %vm856_vm8 = vcmp.ge.f32.partialorder %v769_v56, 0.0 }
 0x11f   : > { %v986_v58 = vsel %vm858_vm6, %v1717_v52, %v922_v54  ;;  %1019 = vst.msk [vmem:[%s2068_s4 + $0xd0] sm:$0xff] %vm992_vm1, %v954_v57  ;;  %v920_v62 = vmul.f32 0.2, %v769_v56  ;;  %vm827_vm9 = vcmp.ge.f32.partialorder %v1686_v60, 0.0  ;;  %v891_v63 = vmul.f32 0.2, %v1686_v60 }
 0x120   : > { %1051 = vst.msk [vmem:[%s2068_s4 + $0x1d0] sm:$0xff] %vm992_vm1, %v986_v58  ;;  %v952_v0 = vsel %vm824_vm7, %v641_v55, %v888_v59  ;;  %vm859_vm10 = vcmp.ge.f32.partialorder %v1718_v61, 0.0  ;;  %v923_v1 = vmul.f32 0.2, %v1718_v61  ;;  %v644_v2 = vpop.f32.mrb[27].mxu0  ;;  %v772_v3 = vpop.f32.mrb[27].mxu1 }
 0x121   : > { %1017 = vst.msk [vmem:[%s2068_s4 + $0xc0] sm:$0xff] %vm992_vm1, %v952_v0  ;;  %v984_v4 = vsel %vm856_vm8, %v769_v56, %v920_v62  ;;  %v955_v5 = vsel %vm827_vm9, %v1686_v60, %v891_v63  ;;  %vm825_vm11 = vcmp.ge.f32.partialorder %v644_v2, 0.0  ;;  %v889_v6 = vmul.f32 0.2, %v644_v2 }
 0x122   : > { %1049 = vst.msk [vmem:[%s2068_s4 + $0x1c0] sm:$0xff] %vm992_vm1, %v984_v4  ;;  %1020 = vst.msk [vmem:[%s2068_s4 + $0xd8] sm:$0xff] %vm992_vm1, %v955_v5  ;;  %v987_v7 = vsel %vm859_vm10, %v1718_v61, %v923_v1  ;;  %vm857_vm12 = vcmp.ge.f32.partialorder %v772_v3, 0.0  ;;  %v921_v8 = vmul.f32 0.2, %v772_v3 }
 0x123   : > { %1052 = vst.msk [vmem:[%s2068_s4 + $0x1d8] sm:$0xff] %vm992_vm1, %v987_v7  ;;  %v953_v9 = vsel %vm825_vm11, %v644_v2, %v889_v6  ;;  %v1689_v10 = vpop.f32.mrb[28].mxu0 }
 0x124   : > { %v1721_v11 = vpop.f32.mrb[28].mxu1  ;;  %1018 = vst.msk [vmem:[%s2068_s4 + $0xc8] sm:$0xff] %vm992_vm1, %v953_v9  ;;  %v985_v12 = vsel %vm857_vm12, %v772_v3, %v921_v8  ;;  %vm830_vm13 = vcmp.ge.f32.partialorder %v1689_v10, 0.0  ;;  %v894_v13 = vmul.f32 0.2, %v1689_v10  ;;  %v657_v14 = vpop.f32.mrb[29].mxu0 }
 0x125   : > { %vm862_vm14 = vcmp.ge.f32.partialorder %v1721_v11, 0.0  ;;  %v785_v15 = vpop.f32.mrb[29].mxu1  ;;  %1050 = vst.msk [vmem:[%s2068_s4 + $0x1c8] sm:$0xff] %vm992_vm1, %v985_v12  ;;  %v926_v16 = vmul.f32 0.2, %v1721_v11  ;;  %vm828_vm15 = vcmp.ge.f32.partialorder %v657_v14, 0.0 }
 0x126   : > { %v892_v17 = vmul.f32 0.2, %v657_v14  ;;  %vm860_vm0 = vcmp.ge.f32.partialorder %v785_v15, 0.0  ;;  %v958_v18 = vsel %vm830_vm13, %v1689_v10, %v894_v13  ;;  %v924_v19 = vmul.f32 0.2, %v785_v15  ;;  %v1690_v20 = vpop.f32.mrb[30].mxu0 }
 0x127   : > { %v1722_v21 = vpop.f32.mrb[30].mxu1  ;;  %1023 = vst.msk [vmem:[%s2068_s4 + $0xf0] sm:$0xff] %vm992_vm1, %v958_v18  ;;  %v990_v22 = vsel %vm862_vm14, %v1721_v11, %v926_v16  ;;  %vm831_vm2 = vcmp.ge.f32.partialorder %v1690_v20, 0.0  ;;  %v895_v24 = vmul.f32 0.2, %v1690_v20  ;;  %v660_v25 = vpop.f32.mrb[31].mxu0 }
 0x128   : > { %v956_v23 = vsel %vm828_vm15, %v657_v14, %v892_v17  ;;  %v788_v26 = vpop.f32.mrb[31].mxu1  ;;  %1055 = vst.msk [vmem:[%s2068_s4 + $0x1f0] sm:$0xff] %vm992_vm1, %v990_v22  ;;  %v988_v27 = vsel %vm860_vm0, %v785_v15, %v924_v19  ;;  %vm863_vm3 = vcmp.ge.f32.partialorder %v1722_v21, 0.0  ;;  %v927_v28 = vmul.f32 0.2, %v1722_v21  ;;  %1063 = sbr.rel (!%p1980_p4) target bundleno = 375 (0x177), region = 32 }
 0x129   : > { %1021 = vst.msk [vmem:[%s2068_s4 + $0xe0] sm:$0xff] %vm992_vm1, %v956_v23  ;;  %vm829_vm4 = vcmp.ge.f32.partialorder %v660_v25, 0.0  ;;  %1053 = vst.msk [vmem:[%s2068_s4 + $0x1e0] sm:$0xff] %vm992_vm1, %v988_v27  ;;  %v959_v29 = vsel %vm831_vm2, %v1690_v20, %v895_v24  ;;  %v893_v30 = vmul.f32 0.2, %v660_v25  ;;  %vm861_vm5 = vcmp.ge.f32.partialorder %v788_v26, 0.0 }
 0x12a   : > { %v925_v31 = vmul.f32 0.2, %v788_v26  ;;  %1024 = vst.msk [vmem:[%s2068_s4 + $0xf8] sm:$0xff] %vm992_vm1, %v959_v29  ;;  %v991_v32 = vsel %vm863_vm3, %v1722_v21, %v927_v28 }
 0x12b   : > { %1056 = vst.msk [vmem:[%s2068_s4 + $0x1f8] sm:$0xff] %vm992_vm1, %v991_v32  ;;  %v957_v33 = vsel %vm829_vm4, %v660_v25, %v893_v30 }
 0x12c   : > { %v989_v34 = vsel %vm861_vm5, %v788_v26, %v925_v31  ;;  %1022 = vst.msk [vmem:[%s2068_s4 + $0xe8] sm:$0xff] %vm992_vm1, %v957_v33 }
 0x12d   : > { %1054 = vst.msk [vmem:[%s2068_s4 + $0x1e8] sm:$0xff] %vm992_vm1, %v989_v34 }
 0x12f   : > { %s2417_s5 = smov (!%p1066_p8, %s1065_s5), 64 }
 0x130   : > { %s1600_s11 = sshll.u32 %s2417_s5, 7 }
 0x131   : > { %p1603_p9 = scmp.eq.s32.totalorder %s1600_s11, 0 }
 0x132   : > { %s2211_s14 = sshrl.u32 (!%p1603_p9), %s2417_s5, 6 }
 0x133   : > { %1074 = sbr.rel (%p1603_p9) target bundleno = 375 (0x177), region = 36  ;;  %p1604_p10 = scmp.le.s32.totalorder (!%p1603_p9), %s2211_s14, 0 }
 0x13a   : > { %1480 = sbr.rel (%p1604_p10) target bundleno = 354 (0x162), region = 112  ;;  %s2408_s12 = smov (!%p1604_p10), %s2205_s9 }
 0x13b   : > { %s2409_s15 = smov (!%p1604_p10), %s2068_s4  ;;  %s2220_s17 = smov (!%p1604_p10), 0  }
 0x13c   : > { %s2222_s18 = smov (!%p1604_p10), 0  }
 0x141 LB: >> { %v1262_v35 = vld [vmem:[%s1914_s15] sm:$0xff]  ;;  %v1264_v36 = vld [vmem:[%s1914_s15 + $0x8] sm:$0xff]  ;;  %v1266_v37 = vld [vmem:[%s1914_s15 + $0x10] sm:$0xff]  ;;  %s1390_s19 = sadd.s32 1, %s1918_s17  ;;  %s1256_s18 = sadd.s32 1, %s1922_s18   ;;  %s1922_s18 = sphi %s2222_s18, %s1256_s18   ;;  %s1918_s17 = sphi %s2220_s17, %s2412_s17   ;;  %s1914_s15 = sphi %s2409_s15, %s2411_s15   ;;  %s1910_s12 = sphi %s2408_s12, %s2410_s12  }
 0x142   : >> { %1263 = vst [vmem:[%s1910_s12] sm:$0xff] %v1262_v35  ;;  %1265 = vst [vmem:[%s1910_s12 + $0x8] sm:$0xff] %v1264_v36  ;;  %v1268_v38 = vld [vmem:[%s1914_s15 + $0x18] sm:$0xff]  ;;  %v1270_v39 = vld [vmem:[%s1914_s15 + $0x20] sm:$0xff]  ;;  %p1391_p11 = scmp.ge.s32.totalorder %s1390_s19, %s2211_s14  ;;  %p1255_p12 = scmp.ge.s32.totalorder %s1256_s18, %s2211_s14 }
 0x143   : >> { %1267 = vst [vmem:[%s1910_s12 + $0x10] sm:$0xff] %v1266_v37  ;;  %v1272_v40 = vld [vmem:[%s1914_s15 + $0x28] sm:$0xff]  ;;  %1269 = vst [vmem:[%s1910_s12 + $0x18] sm:$0xff] %v1268_v38  ;;  %v1274_v41 = vld [vmem:[%s1914_s15 + $0x30] sm:$0xff] }
 0x144   : >> { %1271 = vst [vmem:[%s1910_s12 + $0x20] sm:$0xff] %v1270_v39  ;;  %1273 = vst [vmem:[%s1910_s12 + $0x28] sm:$0xff] %v1272_v40  ;;  %v1276_v42 = vld [vmem:[%s1914_s15 + $0x38] sm:$0xff]  ;;  %v1278_v43 = vld [vmem:[%s1914_s15 + $0x40] sm:$0xff]  ;;  %s2419_s19 = smov (%p1391_p11, %s1390_s19), 0 }
 0x145   : >> { %1275 = vst [vmem:[%s1910_s12 + $0x30] sm:$0xff] %v1274_v41  ;;  %1277 = vst [vmem:[%s1910_s12 + $0x38] sm:$0xff] %v1276_v42  ;;  %v1280_v44 = vld [vmem:[%s1914_s15 + $0x48] sm:$0xff]  ;;  %v1282_v45 = vld [vmem:[%s1914_s15 + $0x50] sm:$0xff]  ;;  %s1605_s20 = sshll.u32 %s2419_s19, 9  ;;  %s2412_s17 = smov %s2419_s19 }
 0x146   : >> { %1279 = vst [vmem:[%s1910_s12 + $0x40] sm:$0xff] %v1278_v43  ;;  %v1284_v46 = vld [vmem:[%s1914_s15 + $0x58] sm:$0xff]  ;;  %1281 = vst [vmem:[%s1910_s12 + $0x48] sm:$0xff] %v1280_v44  ;;  %v1286_v47 = vld [vmem:[%s1914_s15 + $0x60] sm:$0xff]  ;;  %s2278_s21 = scalar_lea.vmem %s2068_s4, %s1605_s20 [#allocation2]   ;;  %s2281_s22 = scalar_lea.vmem %s2205_s9, %s1605_s20  }
 0x147   : >> { %1283 = vst [vmem:[%s1910_s12 + $0x50] sm:$0xff] %v1282_v45  ;;  %1285 = vst [vmem:[%s1910_s12 + $0x58] sm:$0xff] %v1284_v46  ;;  %v1288_v48 = vld [vmem:[%s1914_s15 + $0x68] sm:$0xff]  ;;  %v1290_v49 = vld [vmem:[%s1914_s15 + $0x70] sm:$0xff] }
 0x148   : >> { %1287 = vst [vmem:[%s1910_s12 + $0x60] sm:$0xff] %v1286_v47  ;;  %1289 = vst [vmem:[%s1910_s12 + $0x68] sm:$0xff] %v1288_v48  ;;  %v1292_v50 = vld [vmem:[%s1914_s15 + $0x78] sm:$0xff]  ;;  %v1294_v51 = vld [vmem:[%s1914_s15 + $0x80] sm:$0xff] }
 0x149   : >> { %1291 = vst [vmem:[%s1910_s12 + $0x70] sm:$0xff] %v1290_v49  ;;  %v1296_v52 = vld [vmem:[%s1914_s15 + $0x88] sm:$0xff]  ;;  %1293 = vst [vmem:[%s1910_s12 + $0x78] sm:$0xff] %v1292_v50  ;;  %v1298_v53 = vld [vmem:[%s1914_s15 + $0x90] sm:$0xff] }
 0x14a   : >> { %1295 = vst [vmem:[%s1910_s12 + $0x80] sm:$0xff] %v1294_v51  ;;  %1297 = vst [vmem:[%s1910_s12 + $0x88] sm:$0xff] %v1296_v52  ;;  %v1300_v54 = vld [vmem:[%s1914_s15 + $0x98] sm:$0xff]  ;;  %v1302_v55 = vld [vmem:[%s1914_s15 + $0xa0] sm:$0xff] }
 0x14b   : >> { %1299 = vst [vmem:[%s1910_s12 + $0x90] sm:$0xff] %v1298_v53  ;;  %1301 = vst [vmem:[%s1910_s12 + $0x98] sm:$0xff] %v1300_v54  ;;  %v1304_v56 = vld [vmem:[%s1914_s15 + $0xa8] sm:$0xff]  ;;  %v1306_v57 = vld [vmem:[%s1914_s15 + $0xb0] sm:$0xff] }
 0x14c   : >> { %1303 = vst [vmem:[%s1910_s12 + $0xa0] sm:$0xff] %v1302_v55  ;;  %v1308_v58 = vld [vmem:[%s1914_s15 + $0xb8] sm:$0xff]  ;;  %1305 = vst [vmem:[%s1910_s12 + $0xa8] sm:$0xff] %v1304_v56  ;;  %v1310_v59 = vld [vmem:[%s1914_s15 + $0xc0] sm:$0xff] }
 0x14d   : >> { %1307 = vst [vmem:[%s1910_s12 + $0xb0] sm:$0xff] %v1306_v57  ;;  %1309 = vst [vmem:[%s1910_s12 + $0xb8] sm:$0xff] %v1308_v58  ;;  %v1312_v60 = vld [vmem:[%s1914_s15 + $0xc8] sm:$0xff]  ;;  %v1314_v61 = vld [vmem:[%s1914_s15 + $0xd0] sm:$0xff] }
 0x14e   : >> { %1311 = vst [vmem:[%s1910_s12 + $0xc0] sm:$0xff] %v1310_v59  ;;  %1313 = vst [vmem:[%s1910_s12 + $0xc8] sm:$0xff] %v1312_v60  ;;  %v1316_v62 = vld [vmem:[%s1914_s15 + $0xd8] sm:$0xff]  ;;  %v1318_v63 = vld [vmem:[%s1914_s15 + $0xe0] sm:$0xff] }
 0x14f   : >> { %1315 = vst [vmem:[%s1910_s12 + $0xd0] sm:$0xff] %v1314_v61  ;;  %v1320_v0 = vld [vmem:[%s1914_s15 + $0xe8] sm:$0xff]  ;;  %1317 = vst [vmem:[%s1910_s12 + $0xd8] sm:$0xff] %v1316_v62  ;;  %v1322_v1 = vld [vmem:[%s1914_s15 + $0xf0] sm:$0xff] }
 0x150   : >> { %1319 = vst [vmem:[%s1910_s12 + $0xe0] sm:$0xff] %v1318_v63  ;;  %1321 = vst [vmem:[%s1910_s12 + $0xe8] sm:$0xff] %v1320_v0  ;;  %v1324_v2 = vld [vmem:[%s1914_s15 + $0xf8] sm:$0xff]  ;;  %v1326_v3 = vld [vmem:[%s1914_s15 + $0x100] sm:$0xff] }
 0x151   : >> { %1323 = vst [vmem:[%s1910_s12 + $0xf0] sm:$0xff] %v1322_v1  ;;  %1325 = vst [vmem:[%s1910_s12 + $0xf8] sm:$0xff] %v1324_v2  ;;  %v1328_v4 = vld [vmem:[%s1914_s15 + $0x108] sm:$0xff]  ;;  %v1330_v5 = vld [vmem:[%s1914_s15 + $0x110] sm:$0xff] }
 0x152   : >> { %1327 = vst [vmem:[%s1910_s12 + $0x100] sm:$0xff] %v1326_v3  ;;  %v1332_v6 = vld [vmem:[%s1914_s15 + $0x118] sm:$0xff]  ;;  %1329 = vst [vmem:[%s1910_s12 + $0x108] sm:$0xff] %v1328_v4  ;;  %v1334_v7 = vld [vmem:[%s1914_s15 + $0x120] sm:$0xff] }
 0x153   : >> { %1331 = vst [vmem:[%s1910_s12 + $0x110] sm:$0xff] %v1330_v5  ;;  %1333 = vst [vmem:[%s1910_s12 + $0x118] sm:$0xff] %v1332_v6  ;;  %v1336_v8 = vld [vmem:[%s1914_s15 + $0x128] sm:$0xff]  ;;  %v1338_v9 = vld [vmem:[%s1914_s15 + $0x130] sm:$0xff] }
 0x154   : >> { %1335 = vst [vmem:[%s1910_s12 + $0x120] sm:$0xff] %v1334_v7  ;;  %1337 = vst [vmem:[%s1910_s12 + $0x128] sm:$0xff] %v1336_v8  ;;  %v1340_v10 = vld [vmem:[%s1914_s15 + $0x138] sm:$0xff]  ;;  %v1342_v11 = vld [vmem:[%s1914_s15 + $0x140] sm:$0xff] }
 0x155   : >> { %1339 = vst [vmem:[%s1910_s12 + $0x130] sm:$0xff] %v1338_v9  ;;  %v1344_v12 = vld [vmem:[%s1914_s15 + $0x148] sm:$0xff]  ;;  %1341 = vst [vmem:[%s1910_s12 + $0x138] sm:$0xff] %v1340_v10  ;;  %v1346_v13 = vld [vmem:[%s1914_s15 + $0x150] sm:$0xff] }
 0x156   : >> { %1343 = vst [vmem:[%s1910_s12 + $0x140] sm:$0xff] %v1342_v11  ;;  %1345 = vst [vmem:[%s1910_s12 + $0x148] sm:$0xff] %v1344_v12  ;;  %v1348_v14 = vld [vmem:[%s1914_s15 + $0x158] sm:$0xff]  ;;  %v1350_v15 = vld [vmem:[%s1914_s15 + $0x160] sm:$0xff] }
 0x157   : >> { %1347 = vst [vmem:[%s1910_s12 + $0x150] sm:$0xff] %v1346_v13  ;;  %1349 = vst [vmem:[%s1910_s12 + $0x158] sm:$0xff] %v1348_v14  ;;  %v1352_v16 = vld [vmem:[%s1914_s15 + $0x168] sm:$0xff]  ;;  %v1354_v17 = vld [vmem:[%s1914_s15 + $0x170] sm:$0xff] }
 0x158   : >> { %1351 = vst [vmem:[%s1910_s12 + $0x160] sm:$0xff] %v1350_v15  ;;  %v1356_v18 = vld [vmem:[%s1914_s15 + $0x178] sm:$0xff]  ;;  %1353 = vst [vmem:[%s1910_s12 + $0x168] sm:$0xff] %v1352_v16  ;;  %v1358_v19 = vld [vmem:[%s1914_s15 + $0x180] sm:$0xff] }
 0x159   : >> { %1355 = vst [vmem:[%s1910_s12 + $0x170] sm:$0xff] %v1354_v17  ;;  %1357 = vst [vmem:[%s1910_s12 + $0x178] sm:$0xff] %v1356_v18  ;;  %v1360_v20 = vld [vmem:[%s1914_s15 + $0x188] sm:$0xff]  ;;  %v1362_v21 = vld [vmem:[%s1914_s15 + $0x190] sm:$0xff] }
 0x15a   : >> { %1359 = vst [vmem:[%s1910_s12 + $0x180] sm:$0xff] %v1358_v19  ;;  %1361 = vst [vmem:[%s1910_s12 + $0x188] sm:$0xff] %v1360_v20  ;;  %v1364_v22 = vld [vmem:[%s1914_s15 + $0x198] sm:$0xff]  ;;  %v1366_v23 = vld [vmem:[%s1914_s15 + $0x1a0] sm:$0xff] }
 0x15b   : >> { %1363 = vst [vmem:[%s1910_s12 + $0x190] sm:$0xff] %v1362_v21  ;;  %v1368_v24 = vld [vmem:[%s1914_s15 + $0x1a8] sm:$0xff]  ;;  %1365 = vst [vmem:[%s1910_s12 + $0x198] sm:$0xff] %v1364_v22  ;;  %v1370_v25 = vld [vmem:[%s1914_s15 + $0x1b0] sm:$0xff]  ;;  %1258 = sbr.rel (!%p1255_p12) target bundleno = 321 (0x141), region = 118 }
 0x15c   : >> { %1367 = vst [vmem:[%s1910_s12 + $0x1a0] sm:$0xff] %v1366_v23  ;;  %1369 = vst [vmem:[%s1910_s12 + $0x1a8] sm:$0xff] %v1368_v24  ;;  %v1372_v26 = vld [vmem:[%s1914_s15 + $0x1b8] sm:$0xff]  ;;  %v1374_v27 = vld [vmem:[%s1914_s15 + $0x1c0] sm:$0xff] }
 0x15d   : >> { %1371 = vst [vmem:[%s1910_s12 + $0x1b0] sm:$0xff] %v1370_v25  ;;  %1373 = vst [vmem:[%s1910_s12 + $0x1b8] sm:$0xff] %v1372_v26  ;;  %v1376_v28 = vld [vmem:[%s1914_s15 + $0x1c8] sm:$0xff]  ;;  %v1378_v29 = vld [vmem:[%s1914_s15 + $0x1d0] sm:$0xff] }
 0x15e   : >> { %1375 = vst [vmem:[%s1910_s12 + $0x1c0] sm:$0xff] %v1374_v27  ;;  %v1380_v30 = vld [vmem:[%s1914_s15 + $0x1d8] sm:$0xff]  ;;  %1377 = vst [vmem:[%s1910_s12 + $0x1c8] sm:$0xff] %v1376_v28  ;;  %v1382_v31 = vld [vmem:[%s1914_s15 + $0x1e0] sm:$0xff] }
 0x15f   : >> { %1379 = vst [vmem:[%s1910_s12 + $0x1d0] sm:$0xff] %v1378_v29  ;;  %1381 = vst [vmem:[%s1910_s12 + $0x1d8] sm:$0xff] %v1380_v30  ;;  %v1384_v32 = vld [vmem:[%s1914_s15 + $0x1e8] sm:$0xff]  ;;  %v1386_v33 = vld [vmem:[%s1914_s15 + $0x1f0] sm:$0xff] }
 0x160   : >> { %1383 = vst [vmem:[%s1910_s12 + $0x1e0] sm:$0xff] %v1382_v31  ;;  %1385 = vst [vmem:[%s1910_s12 + $0x1e8] sm:$0xff] %v1384_v32  ;;  %v1388_v34 = vld [vmem:[%s1914_s15 + $0x1f8] sm:$0xff]  ;;  %s2411_s15 = smov %s2278_s21 }
 0x161   : >> { %1387 = vst [vmem:[%s1910_s12 + $0x1f0] sm:$0xff] %v1386_v33  ;;  %1389 = vst [vmem:[%s1910_s12 + $0x1f8] sm:$0xff] %v1388_v34  ;;  %s2410_s12 = smov %s2281_s22 }
 0x162 PF: > { %s2386_s23 = sand.u32 63, %s2417_s5   ;;  %s1616_s24 = sshll.u32 %s2211_s14, 9 }
 0x163   : > { %s1401_s25 = scalar_lea.vmem %s2068_s4, %s1616_s24 [#allocation2]   ;;  %s1403_s26 = scalar_lea.vmem %s2205_s9, %s1616_s24  }
 0x164   : > { %p1610_p13 = scmp.le.s32.totalorder %s2386_s23, 0 }
 0x165   : > { %s1924_s27 = smov (!%p1610_p13), %s1403_s26   ;;  %s1928_s28 = smov (!%p1610_p13), %s1401_s25  }
 0x166   : > { %1494 = sbr.rel (%p1610_p13) target bundleno = 375 (0x177), region = 123  ;;  %s1932_s29 = smov (!%p1610_p13), 0  }
 0x167   : > { %s1936_s30 = smov (!%p1610_p13), 0  }
 0x16d LB: >> { %v1413_v35 = vld [vmem:[%s1930_s28] sm:$0xff]  ;;  %s1415_s3 = sadd.s32 1, %s1934_s29  ;;  %s1407_s30 = sadd.s32 1, %s1938_s30   ;;  %s1938_s30 = sphi %s1936_s30, %s1407_s30   ;;  %s1934_s29 = sphi %s1932_s29, %s1933_s29   ;;  %s1930_s28 = sphi %s1928_s28, %s1420_s28   ;;  %s1926_s27 = sphi %s1924_s27, %s1421_s27  }
 0x16e   : >> { %1414 = vst [vmem:[%s1926_s27] sm:$0xff] %v1413_v35  ;;  %p1416_p0 = scmp.ge.s32.totalorder %s1415_s3, %s2386_s23  ;;  %p1406_p1 = scmp.ge.s32.totalorder %s1407_s30, %s2386_s23 }
 0x170   : >> { %s2421_s3 = smov (%p1416_p0, %s1415_s3), 0  ;;  %1409 = sbr.rel (!%p1406_p1) target bundleno = 365 (0x16d), region = 129 }
 0x171   : >> { %s1611_s4 = sshll.u32 %s2421_s3, 3  ;;  %s1933_s29 = smov %s2421_s3  }
 0x172   : >> { %s1420_s28 = scalar_lea.vmem %s1401_s25, %s1611_s4 [#allocation2]   ;;  %s1421_s27 = scalar_lea.vmem %s1403_s26, %s1611_s4  }
 0x177 PF: > { %p9_p2 = scmp.ge.s32.totalorder %s1970_s13, 4   ;;  %s2413_s9 = smov %s1902_s10 }
 0x178   : > { %s2414_s10 = smov %s1978_s16  ;;  %s2415_s11 = smov %s1970_s13 }
 0x179   :  { %11 = sbr.rel (!%p9_p2) target bundleno = 2 (0x2), region = 140 }

// kernel: generator_forward.24
= control target key start
LH: loop header
LB: loop body
LE: loop exit
PB: predicated region body
PF: predicated region fallthrough
CT: control target
= control target key end

     0   :  { %v714_v0 = vmov 0.0   ;;  %vm715_vm0 = vmmov 0   ;;  %vm287_vm1 = vcmask 130048   ;;  %vm1231_vm2 = vcmask 123904   ;;  %s1226_s1 = inlined_call_operand.vmem [shape: bf16[128,16], index: 1, kind: input, shape index: {}]   ;;  %s1227_s0 = inlined_call_operand.vmem [shape: bf16[162,128], index: 0, kind: input, shape index: {}]   ;;  %s1228_s2 = inlined_call_operand.vmem [shape: f32[1,16], index: 2, kind: input, shape index: {}]   ;;  %s1229_s3 = inlined_call_operand.vmem [shape: f32[1,16], index: 3, kind: input, shape index: {}]   ;;  %s1230_s4 = inlined_call_operand.vmem [shape: f32[162,16], index: 4, kind: output, shape index: {}]  }
   0x1   :  { %615 = vmatprep.subr.bf16.mxu0 %v714_v0  ;;  %v693_v1 = vld [vmem:[%s1226_s1] sm:$0xff]   ;;  %675 = vmatprep.subr.bf16.mxu1 %v714_v0  ;;  %v694_v2 = vld [vmem:[%s1226_s1 + $0x8] sm:$0xff]   ;;  %v695_v3 = vld [vmem:[%s1226_s1 + $0x10] sm:$0xff]  }
   0x2   :  { %631 = vmatprep.mubr.msk.bf16.mxu0 %vm715_vm0, %v714_v0  ;;  %655 = vmatprep.mubr.msk.bf16.mxu1 %vm715_vm0, %v714_v0  ;;  %v696_v4 = vld [vmem:[%s1226_s1 + $0x18] sm:$0xff]   ;;  %v697_v5 = vld [vmem:[%s1226_s1 + $0x20] sm:$0xff]   ;;  %v698_v6 = vld [vmem:[%s1226_s1 + $0x28] sm:$0xff]  }
   0x3   :  { %616 = vmatpush3.bf16.msra.mxu0 %v693_v1  ;;  %683 = vmatpush3.bf16.msra.mxu1 %v693_v1  ;;  %v699_v7 = vld [vmem:[%s1226_s1 + $0x30] sm:$0xff]   ;;  %v700_v8 = vld [vmem:[%s1226_s1 + $0x38] sm:$0xff]   ;;  %v701_v9 = vld [vmem:[%s1227_s0] sm:$0xff]  }
   0x4   :  { %617 = vmatprep.subr.bf16.mxu0 %v714_v0  ;;  %676 = vmatprep.subr.bf16.mxu1 %v714_v0  ;;  %v705_v10 = vld [vmem:[%s1227_s0 + $0x30] sm:$0xff]   ;;  %v702_v11 = vld [vmem:[%s1227_s0 + $0x8] sm:$0xff]   ;;  %v707_v12 = vld [vmem:[%s1227_s0 + $0x38] sm:$0xff]  }
   0x5   :  { %v703_v13 = vld [vmem:[%s1227_s0 + $0x10] sm:$0xff]   ;;  %v709_v14 = vld [vmem:[%s1227_s0 + $0x40] sm:$0xff]   ;;  %v704_v15 = vld [vmem:[%s1227_s0 + $0x18] sm:$0xff]  }
   0x6   :  { %v710_v16 = vld [vmem:[%s1227_s0 + $0x48] sm:$0xff]   ;;  %v706_v17 = vld [vmem:[%s1227_s0 + $0x20] sm:$0xff]   ;;  %v711_v18 = vld [vmem:[%s1227_s0 + $0x50] ss:$0 sps:$4 sm:$0x11]  }
   0x7   :  { %618 = vmatpush3.bf16.msra.mxu0 %v694_v2  ;;  %684 = vmatpush3.bf16.msra.mxu1 %v694_v2  ;;  %v708_v19 = vld [vmem:[%s1227_s0 + $0x28] sm:$0xff]  }
   0x8   :  { %619 = vmatprep.subr.bf16.mxu0 %v714_v0  ;;  %677 = vmatprep.subr.bf16.mxu1 %v714_v0 }
   0xb   :  { %620 = vmatpush3.bf16.msra.mxu0 %v695_v3  ;;  %685 = vmatpush3.bf16.msra.mxu1 %v695_v3 }
   0xc   :  { %621 = vmatprep.subr.bf16.mxu0 %v714_v0  ;;  %678 = vmatprep.subr.bf16.mxu1 %v714_v0 }
   0xf   :  { %622 = vmatpush3.bf16.msra.mxu0 %v696_v4  ;;  %686 = vmatpush3.bf16.msra.mxu1 %v696_v4 }
  0x10   :  { %623 = vmatprep.subr.bf16.mxu0 %v714_v0  ;;  %679 = vmatprep.subr.bf16.mxu1 %v714_v0 }
  0x13   :  { %624 = vmatpush3.bf16.msra.mxu0 %v697_v5  ;;  %687 = vmatpush3.bf16.msra.mxu1 %v697_v5 }
  0x14   :  { %625 = vmatprep.subr.bf16.mxu0 %v714_v0  ;;  %680 = vmatprep.subr.bf16.mxu1 %v714_v0 }
  0x17   :  { %626 = vmatpush3.bf16.msra.mxu0 %v698_v6  ;;  %688 = vmatpush3.bf16.msra.mxu1 %v698_v6 }
  0x18   :  { %627 = vmatprep.subr.bf16.mxu0 %v714_v0  ;;  %681 = vmatprep.subr.bf16.mxu1 %v714_v0 }
  0x1b   :  { %628 = vmatpush3.bf16.msra.mxu0 %v699_v7  ;;  %689 = vmatpush3.bf16.msra.mxu1 %v699_v7 }
  0x1c   :  { %629 = vmatprep.subr.bf16.mxu0 %v714_v0  ;;  %682 = vmatprep.subr.bf16.mxu1 %v714_v0 }
  0x1f   :  { %630 = vmatpush3.bf16.msra.mxu0 %v700_v8  ;;  %690 = vmatpush3.bf16.msra.mxu1 %v700_v8 }
  0x22   :  { %632 = vmatmul.mubr.bf16.vlgmr.msra.gmra.mrb[0].mxu0 %v701_v9  ;;  %656 = vmatmul.mubr.bf16.vlgmr.msra.gmra.mrb[0].mxu1 %v705_v10 }
  0x23   :  { %635 = vmatprep.mubr.msk.bf16.mxu0 %vm715_vm0, %v714_v0  ;;  %659 = vmatprep.mubr.msk.bf16.mxu1 %vm715_vm0, %v714_v0 }
  0x2a   :  { %636 = vmatmul.mubr.bf16.gmra.mrb[4].mxu0 %v702_v11  ;;  %660 = vmatmul.mubr.bf16.gmra.mrb[4].mxu1 %v707_v12 }
  0x2b   :  { %639 = vmatprep.mubr.msk.bf16.mxu0 %vm715_vm0, %v714_v0  ;;  %663 = vmatprep.mubr.msk.bf16.mxu1 %vm715_vm0, %v714_v0 }
  0x32   :  { %640 = vmatmul.mubr.bf16.gmra.mrb[8].mxu0 %v703_v13  ;;  %664 = vmatmul.mubr.bf16.gmra.mrb[8].mxu1 %v709_v14 }
  0x33   :  { %643 = vmatprep.mubr.msk.bf16.mxu0 %vm715_vm0, %v714_v0  ;;  %667 = vmatprep.mubr.msk.bf16.mxu1 %vm715_vm0, %v714_v0 }
  0x3a   :  { %644 = vmatmul.mubr.bf16.gmra.mrb[12].mxu0 %v704_v15  ;;  %668 = vmatmul.mubr.bf16.gmra.mrb[12].mxu1 %v710_v16 }
  0x3b   :  { %647 = vmatprep.mubr.msk.bf16.mxu0 %vm715_vm0, %v714_v0  ;;  %671 = vmatprep.mubr.msk.bf16.mxu1 %vm715_vm0, %v714_v0 }
  0x42   :  { %648 = vmatmul.mubr.bf16.gmra.mrb[16].mxu0 %v706_v17  ;;  %672 = vmatmul.mubr.bf16.gmra.mrb[16].mxu1 %v711_v18 }
  0x43   :  { %651 = vmatprep.mubr.msk.bf16.mxu0 %vm715_vm0, %v714_v0 }
  0x4a   :  { %652 = vmatmul.mubr.bf16.gmra.mrb[20].mxu0 %v708_v19 }
  0xf5   :  { %v836_v20 = vpop.f32.mrb[0].mxu0  ;;  %v838_v21 = vpop.f32.mrb[0].mxu1 }
  0xf6   :  { %v633_v22 = vpop.f32.mrb[1].mxu0  ;;  %v657_v23 = vpop.f32.mrb[1].mxu1  ;;  %v288_v26 = vsel %vm287_vm1, %v836_v20, 0.0 }
  0xf7   :  { %v840_v24 = vpop.f32.mrb[2].mxu0  ;;  %v842_v25 = vpop.f32.mrb[2].mxu1 }
  0xf8   :  { %v289_v27 = vsel %vm287_vm1, %v840_v24, 0.0  ;;  %v634_v28 = vpop.f32.mrb[3].mxu0  ;;  %v658_v29 = vpop.f32.mrb[3].mxu1 }
  0xf9   :  { %v290_v30 = vadd.f32 %v289_v27, %v288_v26  ;;  %v311_v27 = vsel %vm287_vm1, %v838_v21, 0.0  ;;  %v313_v29 = vsel %vm287_vm1, %v842_v25, 0.0 }
  0xfd   :  { %v848_v31 = vpop.f32.mrb[4].mxu0  ;;  %v850_v32 = vpop.f32.mrb[4].mxu1 }
  0xfe   :  { %v291_v33 = vsel %vm287_vm1, %v848_v31, 0.0  ;;  %v637_v34 = vpop.f32.mrb[5].mxu0  ;;  %v661_v35 = vpop.f32.mrb[5].mxu1 }
  0xff   :  { %v292_v36 = vadd.f32 %v291_v33, %v290_v30  ;;  %v854_v37 = vpop.f32.mrb[6].mxu0  ;;  %v856_v38 = vpop.f32.mrb[6].mxu1  ;;  %v315_v33 = vsel %vm287_vm1, %v850_v32, 0.0 }
 0x100   :  { %v293_v39 = vsel %vm287_vm1, %v854_v37, 0.0  ;;  %v638_v40 = vpop.f32.mrb[7].mxu0  ;;  %v662_v41 = vpop.f32.mrb[7].mxu1  ;;  %v317_v35 = vsel %vm287_vm1, %v856_v38, 0.0 }
 0x101   :  { %v294_v42 = vadd.f32 %v293_v39, %v292_v36 }
 0x105   :  { %v860_v43 = vpop.f32.mrb[8].mxu0  ;;  %v862_v44 = vpop.f32.mrb[8].mxu1 }
 0x106   :  { %v295_v45 = vsel %vm287_vm1, %v860_v43, 0.0  ;;  %v641_v46 = vpop.f32.mrb[9].mxu0  ;;  %v665_v47 = vpop.f32.mrb[9].mxu1  ;;  %v319_v39 = vsel %vm287_vm1, %v862_v44, 0.0 }
 0x107   :  { %v296_v48 = vadd.f32 %v295_v45, %v294_v42  ;;  %v866_v49 = vpop.f32.mrb[10].mxu0  ;;  %v868_v50 = vpop.f32.mrb[10].mxu1 }
 0x108   :  { %v297_v51 = vsel %vm287_vm1, %v866_v49, 0.0  ;;  %v642_v52 = vpop.f32.mrb[11].mxu0  ;;  %v666_v53 = vpop.f32.mrb[11].mxu1  ;;  %v321_v41 = vsel %vm287_vm1, %v868_v50, 0.0 }
 0x109   :  { %v298_v54 = vadd.f32 %v297_v51, %v296_v48 }
 0x10d   :  { %v872_v55 = vpop.f32.mrb[12].mxu0  ;;  %v874_v56 = vpop.f32.mrb[12].mxu1 }
 0x10e   :  { %v299_v57 = vsel %vm287_vm1, %v872_v55, 0.0  ;;  %v645_v58 = vpop.f32.mrb[13].mxu0  ;;  %v669_v59 = vpop.f32.mrb[13].mxu1  ;;  %v323_v45 = vsel %vm287_vm1, %v874_v56, 0.0 }
 0x10f   :  { %v300_v60 = vadd.f32 %v299_v57, %v298_v54  ;;  %v878_v61 = vpop.f32.mrb[14].mxu0  ;;  %v880_v62 = vpop.f32.mrb[14].mxu1 }
 0x110   :  { %v301_v63 = vsel %vm287_vm1, %v878_v61, 0.0  ;;  %v646_v0 = vpop.f32.mrb[15].mxu0  ;;  %v670_v1 = vpop.f32.mrb[15].mxu1  ;;  %v325_v47 = vsel %vm287_vm1, %v880_v62, 0.0 }
 0x111   :  { %v302_v2 = vadd.f32 %v301_v63, %v300_v60 }
 0x115   :  { %v884_v3 = vpop.f32.mrb[16].mxu0  ;;  %v886_v4 = vpop.f32.mrb[16].mxu1 }
 0x116   :  { %v303_v5 = vsel %vm287_vm1, %v884_v3, 0.0  ;;  %v649_v6 = vpop.f32.mrb[17].mxu0  ;;  %v673_v7 = vpop.f32.mrb[17].mxu1  ;;  %v328_v48 = vsel %vm1231_vm2, %v886_v4, 0.0 }
 0x117   :  { %v304_v8 = vadd.f32 %v303_v5, %v302_v2  ;;  %v890_v9 = vpop.f32.mrb[18].mxu0  ;;  %v284_v10 = vpop.f32.mrb[18].mxu1 }
 0x118   :  { %v305_v11 = vsel %vm287_vm1, %v890_v9, 0.0  ;;  %v650_v12 = vpop.f32.mrb[19].mxu0  ;;  %v674_v13 = vpop.f32.mrb[19].mxu1 }
 0x119   :  { %v306_v14 = vadd.f32 %v305_v11, %v304_v8 }
 0x11d   :  { %v894_v15 = vpop.f32.mrb[20].mxu0 }
 0x11e   :  { %v307_v16 = vsel %vm287_vm1, %v894_v15, 0.0  ;;  %v653_v17 = vpop.f32.mrb[21].mxu0 }
 0x11f   :  { %v308_v18 = vadd.f32 %v307_v16, %v306_v14  ;;  %v898_v19 = vpop.f32.mrb[22].mxu0 }
 0x120   :  { %v309_v22 = vsel %vm287_vm1, %v898_v19, 0.0  ;;  %v654_v23 = vpop.f32.mrb[23].mxu0 }
 0x121   :  { %v310_v26 = vadd.f32 %v309_v22, %v308_v18 }
 0x123   :  { %v312_v28 = vadd.f32 %v311_v27, %v310_v26 }
 0x125   :  { %v314_v30 = vadd.f32 %v313_v29, %v312_v28 }
 0x127   :  { %v316_v34 = vadd.f32 %v315_v33, %v314_v30 }
 0x129   :  { %v318_v36 = vadd.f32 %v317_v35, %v316_v34 }
 0x12b   :  { %v320_v40 = vadd.f32 %v319_v39, %v318_v36 }
 0x12d   :  { %v322_v42 = vadd.f32 %v321_v41, %v320_v40 }
 0x12f   :  { %v324_v46 = vadd.f32 %v323_v45, %v322_v42 }
 0x131   :  { %v326_v51 = vadd.f32 %v325_v47, %v324_v46 }
 0x133   :  { %v329_v52 = vadd.f32 %v328_v48, %v326_v51 }
 0x135   :  { %v330_v53 = vrot.slane %v329_v52, 4 }
 0x137   :  { %v331_v54 = vadd.f32 %v330_v53, %v329_v52 }
 0x139   :  { %v332_v57 = vrot.slane %v331_v54, 2 }
 0x13b   :  { %v333_v58 = vadd.f32 %v332_v57, %v331_v54 }
 0x13d   :  { %v334_v59 = vrot.slane %v333_v58, 1 }
 0x13f   :  { %v335_v60 = vadd.f32 %v334_v59, %v333_v58 }
 0x141   :  { %v920_v63 = vmul.f32 0.0061728396, %v335_v60 }
 0x143   :  { %v338_v0 = vsub.f32 %v836_v20, %v920_v63  ;;  %v339_v1 = vsub.f32 %v840_v24, %v920_v63  ;;  %v340_v2 = vsub.f32 %v848_v31, %v920_v63  ;;  %v341_v5 = vsub.f32 %v854_v37, %v920_v63 }
 0x144   :  { %v342_v8 = vsub.f32 %v860_v43, %v920_v63  ;;  %v343_v11 = vsub.f32 %v866_v49, %v920_v63  ;;  %v344_v17 = vsub.f32 %v872_v55, %v920_v63  ;;  %v345_v26 = vsub.f32 %v878_v61, %v920_v63 }
 0x145   :  { %v359_v6 = vmul.f32 %v338_v0, %v338_v0  ;;  %v360_v7 = vmul.f32 %v339_v1, %v339_v1  ;;  %v361_v10 = vmul.f32 %v340_v2, %v340_v2  ;;  %v362_v12 = vmul.f32 %v341_v5, %v341_v5 }
 0x146   :  { %v363_v18 = vmul.f32 %v342_v8, %v342_v8  ;;  %v364_v27 = vmul.f32 %v343_v11, %v343_v11  ;;  %v346_v30 = vsub.f32 %v884_v3, %v920_v63  ;;  %v365_v33 = vmul.f32 %v344_v17, %v344_v17 }
 0x147   :  { %v380_v13 = vsel %vm287_vm1, %v359_v6, 0.0  ;;  %v381_v14 = vsel %vm287_vm1, %v360_v7, 0.0  ;;  %v383_v22 = vsel %vm287_vm1, %v361_v10, 0.0  ;;  %v385_v28 = vsel %vm287_vm1, %v362_v12, 0.0 }
 0x148   :  { %v382_v16 = vadd.f32 %v381_v14, %v380_v13  ;;  %v387_v34 = vsel %vm287_vm1, %v363_v18, 0.0  ;;  %v347_v36 = vsub.f32 %v890_v9, %v920_v63  ;;  %v366_v39 = vmul.f32 %v345_v26, %v345_v26 }
 0x149   :  { %v389_v40 = vsel %vm287_vm1, %v364_v27, 0.0  ;;  %v348_v42 = vsub.f32 %v894_v15, %v920_v63  ;;  %v367_v45 = vmul.f32 %v346_v30, %v346_v30  ;;  %v391_v46 = vsel %vm287_vm1, %v365_v33, 0.0 }
 0x14a   :  { %v384_v23 = vadd.f32 %v383_v22, %v382_v16  ;;  %v349_v48 = vsub.f32 %v898_v19, %v920_v63  ;;  %v368_v51 = vmul.f32 %v347_v36, %v347_v36  ;;  %v393_v52 = vsel %vm287_vm1, %v366_v39, 0.0 }
 0x14b   :  { %v350_v54 = vsub.f32 %v838_v21, %v920_v63  ;;  %v369_v57 = vmul.f32 %v348_v42, %v348_v42  ;;  %v395_v58 = vsel %vm287_vm1, %v367_v45, 0.0  ;;  %v351_v60 = vsub.f32 %v842_v25, %v920_v63 }
 0x14c   :  { %v386_v29 = vadd.f32 %v385_v28, %v384_v23  ;;  %v370_v0 = vmul.f32 %v349_v48, %v349_v48  ;;  %v397_v1 = vsel %vm287_vm1, %v368_v51, 0.0  ;;  %v352_v5 = vsub.f32 %v850_v32, %v920_v63 }
 0x14d   :  { %v371_v6 = vmul.f32 %v350_v54, %v350_v54  ;;  %v399_v7 = vsel %vm287_vm1, %v369_v57, 0.0  ;;  %v353_v10 = vsub.f32 %v856_v38, %v920_v63  ;;  %v372_v11 = vmul.f32 %v351_v60, %v351_v60 }
 0x14e   :  { %v388_v35 = vadd.f32 %v387_v34, %v386_v29  ;;  %v401_v12 = vsel %vm287_vm1, %v370_v0, 0.0  ;;  %v354_v14 = vsub.f32 %v862_v44, %v920_v63  ;;  %v373_v16 = vmul.f32 %v352_v5, %v352_v5 }
 0x14f   :  { %v403_v17 = vsel %vm287_vm1, %v371_v6, 0.0  ;;  %v355_v22 = vsub.f32 %v868_v50, %v920_v63  ;;  %v374_v23 = vmul.f32 %v353_v10, %v353_v10  ;;  %v405_v26 = vsel %vm287_vm1, %v372_v11, 0.0 }
 0x150   :  { %v390_v41 = vadd.f32 %v389_v40, %v388_v35  ;;  %v356_v28 = vsub.f32 %v874_v56, %v920_v63  ;;  %v375_v29 = vmul.f32 %v354_v14, %v354_v14  ;;  %v407_v30 = vsel %vm287_vm1, %v373_v16, 0.0 }
 0x151   :  { %v357_v34 = vsub.f32 %v880_v62, %v920_v63  ;;  %v376_v35 = vmul.f32 %v355_v22, %v355_v22  ;;  %v409_v36 = vsel %vm287_vm1, %v374_v23, 0.0  ;;  %v358_v40 = vsub.f32 %v886_v4, %v920_v63 }
 0x152   :  { %v392_v47 = vadd.f32 %v391_v46, %v390_v41  ;;  %v377_v41 = vmul.f32 %v356_v28, %v356_v28  ;;  %v411_v42 = vsel %vm287_vm1, %v375_v29, 0.0  ;;  %v436_v10 = vlaneseq }
 0x153   :  { %v378_v46 = vmul.f32 %v357_v34, %v357_v34  ;;  %v379_v51 = vmul.f32 %v358_v40, %v358_v40 }
 0x154   :  { %v394_v53 = vadd.f32 %v393_v52, %v392_v47  ;;  %v413_v47 = vsel %vm287_vm1, %v376_v35, 0.0  ;;  %v415_v52 = vsel %vm287_vm1, %v377_v41, 0.0  ;;  %v437_v11 = vshrl.u32 %v436_v10, 7 }
 0x155   :  { %v417_v54 = vsel %vm287_vm1, %v378_v46, 0.0 }
 0x156   :  { %v396_v59 = vadd.f32 %v395_v58, %v394_v53  ;;  %v419_v58 = vsel %vm1231_vm2, %v379_v51, 0.0 }
 0x158   :  { %v398_v2 = vadd.f32 %v397_v1, %v396_v59 }
 0x15a   :  { %v400_v8 = vadd.f32 %v399_v7, %v398_v2 }
 0x15c   :  { %v402_v13 = vadd.f32 %v401_v12, %v400_v8  ;;  %v428_v12 = vld [vmem:[%s1228_s2] sm:$0x1] }
 0x15e   :  { %v404_v18 = vadd.f32 %v403_v17, %v402_v13  ;;  %v438_v13 = vsub.s32 0, %v437_v11  ;;  %v432_v17 = vld [vmem:[%s1229_s3] sm:$0x1] }
 0x160   :  { %v406_v27 = vadd.f32 %v405_v26, %v404_v18 }
 0x162   :  { %v408_v33 = vadd.f32 %v407_v30, %v406_v27 }
 0x164   :  { %v410_v39 = vadd.f32 %v409_v36, %v408_v33 }
 0x166   :  { %v412_v45 = vadd.f32 %v411_v42, %v410_v39 }
 0x168   :  { %v414_v48 = vadd.f32 %v413_v47, %v412_v45 }
 0x16a   :  { %v416_v53 = vadd.f32 %v415_v52, %v414_v48 }
 0x16c   :  { %v418_v57 = vadd.f32 %v417_v54, %v416_v53 }
 0x16e   :  { %v420_v59 = vadd.f32 %v419_v58, %v418_v57 }
 0x170   :  { %v421_v60 = vrot.slane %v420_v59, 4 }
 0x172   :  { %v422_v0 = vadd.f32 %v421_v60, %v420_v59 }
 0x174   :  { %v423_v1 = vrot.slane %v422_v0, 2 }
 0x176   :  { %v424_v2 = vadd.f32 %v423_v1, %v422_v0 }
 0x178   :  { %v425_v5 = vrot.slane %v424_v2, 1 }
 0x17a   :  { %v426_v6 = vadd.f32 %v425_v5, %v424_v2 }
 0x17c   :  { %v427_v7 = vmul.f32 0.0061728396, %v426_v6 }
 0x17e   :  { %v429_v8 = vadd.f32 1e-05, %v427_v7 }
 0x180   :  { %712 = vrsqrt.f32 %v429_v8 }
 0x18a   :  { %v713_v14 = vpop.eup %712 }
 0x18b   :  { %v431_v16 = vmul.f32 %v713_v14, %v428_v12 }
 0x18d   :  { %v433_v18 = vmul.f32 %v431_v16, %v920_v63  ;;  %v439_v22 = vrot.slane %v431_v16, %v438_v13 }
 0x18f   :  { %v434_v23 = vsub.f32 %v432_v17, %v433_v18  ;;  %v441_v26 = vmul.f32 %v439_v22, %v836_v20  ;;  %v442_v27 = vmul.f32 %v439_v22, %v840_v24  ;;  %v443_v28 = vmul.f32 %v439_v22, %v848_v31 }
 0x190   :  { %v444_v29 = vmul.f32 %v439_v22, %v854_v37  ;;  %v445_v30 = vmul.f32 %v439_v22, %v860_v43  ;;  %v446_v33 = vmul.f32 %v439_v22, %v866_v49  ;;  %v447_v34 = vmul.f32 %v439_v22, %v872_v55 }
 0x191   :  { %v448_v35 = vmul.f32 %v439_v22, %v878_v61  ;;  %v449_v63 = vmul.f32 %v439_v22, %v884_v3  ;;  %v450_v36 = vmul.f32 %v439_v22, %v890_v9  ;;  %v451_v20 = vmul.f32 %v439_v22, %v894_v15 }
 0x192   :  { %v452_v24 = vmul.f32 %v439_v22, %v898_v19  ;;  %v453_v31 = vmul.f32 %v439_v22, %v838_v21  ;;  %v454_v37 = vmul.f32 %v439_v22, %v842_v25  ;;  %v455_v43 = vmul.f32 %v439_v22, %v850_v32 }
 0x193   :  { %v456_v49 = vmul.f32 %v439_v22, %v856_v38  ;;  %v457_v55 = vmul.f32 %v439_v22, %v862_v44  ;;  %v458_v61 = vmul.f32 %v439_v22, %v868_v50  ;;  %v459_v3 = vmul.f32 %v439_v22, %v874_v56 }
 0x194   :  { %v460_v9 = vmul.f32 %v439_v22, %v880_v62  ;;  %v461_v15 = vmul.f32 %v439_v22, %v886_v4  ;;  %v466_v39 = vrot.slane %v434_v23, %v438_v13 }
 0x196   :  { %v468_v19 = vadd.f32 %v466_v39, %v441_v26  ;;  %v469_v40 = vadd.f32 %v466_v39, %v442_v27  ;;  %v470_v21 = vadd.f32 %v466_v39, %v443_v28  ;;  %v1013_v41 = vadd.f32 %v466_v39, %v444_v29 }
 0x197   :  { %v1015_v25 = vadd.f32 %v466_v39, %v445_v30  ;;  %v1017_v32 = vadd.f32 %v466_v39, %v446_v33  ;;  %v1019_v38 = vadd.f32 %v466_v39, %v447_v34  ;;  %v1021_v44 = vadd.f32 %v466_v39, %v448_v35 }
 0x198   :  { %v1023_v50 = vadd.f32 %v466_v39, %v449_v63  ;;  %v1025_v56 = vadd.f32 %v466_v39, %v450_v36  ;;  %v1027_v62 = vadd.f32 %v466_v39, %v451_v20  ;;  %v1029_v4 = vadd.f32 %v466_v39, %v452_v24 }
 0x199   :  { %v1031_v42 = vadd.f32 %v466_v39, %v453_v31  ;;  %v1033_v45 = vadd.f32 %v466_v39, %v454_v37  ;;  %v1035_v46 = vadd.f32 %v466_v39, %v455_v43  ;;  %v1037_v47 = vadd.f32 %v466_v39, %v456_v49 }
 0x19a   :  { %v1039_v48 = vadd.f32 %v466_v39, %v457_v55  ;;  %v1041_v51 = vadd.f32 %v466_v39, %v458_v61  ;;  %v1043_v52 = vadd.f32 %v466_v39, %v459_v3  ;;  %v1045_v53 = vadd.f32 %v466_v39, %v460_v9 }
 0x19b   :  { %v1047_v54 = vadd.f32 %v466_v39, %v461_v15  ;;  %vm489_vm3 = vcmp.ge.f32.partialorder %v468_v19, 0.0  ;;  %vm490_vm4 = vcmp.ge.f32.partialorder %v469_v40, 0.0  ;;  %vm491_vm5 = vcmp.ge.f32.partialorder %v470_v21, 0.0 }
 0x19c   :  { %vm492_vm6 = vcmp.ge.f32.partialorder %v1013_v41, 0.0  ;;  %vm493_vm7 = vcmp.ge.f32.partialorder %v1015_v25, 0.0  ;;  %vm500_vm14 = vcmp.ge.f32.partialorder %v1029_v4, 0.0  ;;  %vm501_vm15 = vcmp.ge.f32.partialorder %v1031_v42, 0.0 }
 0x19d   :  { %vm502_vm0 = vcmp.ge.f32.partialorder %v1033_v45, 0.0  ;;  %vm503_vm2 = vcmp.ge.f32.partialorder %v1035_v46, 0.0  ;;  %vm504_vm8 = vcmp.ge.f32.partialorder %v1037_v47, 0.0  ;;  %vm505_vm9 = vcmp.ge.f32.partialorder %v1039_v48, 0.0 }
 0x19e   :  { %vm506_vm10 = vcmp.ge.f32.partialorder %v1041_v51, 0.0  ;;  %vm507_vm11 = vcmp.ge.f32.partialorder %v1043_v52, 0.0  ;;  %vm508_vm12 = vcmp.ge.f32.partialorder %v1045_v53, 0.0  ;;  %vm509_vm13 = vcmp.ge.f32.partialorder %v1047_v54, 0.0 }
 0x19f   :  { %v510_v57 = vmul.f32 0.2, %v468_v19  ;;  %v511_v58 = vmul.f32 0.2, %v469_v40  ;;  %v512_v59 = vmul.f32 0.2, %v470_v21 }
 0x1a0   :  { %v513_v60 = vmul.f32 0.2, %v1013_v41  ;;  %v514_v0 = vmul.f32 0.2, %v1015_v25  ;;  %v515_v1 = vmul.f32 0.2, %v1017_v32 }
 0x1a1   :  { %v516_v2 = vmul.f32 0.2, %v1019_v38  ;;  %v517_v5 = vmul.f32 0.2, %v1021_v44  ;;  %v531_v6 = vsel %vm489_vm3, %v468_v19, %v510_v57  ;;  %v518_v7 = vmul.f32 0.2, %v1023_v50 }
 0x1a2   :  { %v519_v8 = vmul.f32 0.2, %v1025_v56  ;;  %v520_v10 = vmul.f32 0.2, %v1027_v62  ;;  %v532_v11 = vsel %vm490_vm4, %v469_v40, %v511_v58  ;;  %552 = vst.msk [vmem:[%s1230_s4] sm:$0xff] %vm287_vm1, %v531_v6  ;;  %v533_v16 = vsel %vm491_vm5, %v470_v21, %v512_v59 }
 0x1a3   :  { %v521_v12 = vmul.f32 0.2, %v1029_v4  ;;  %v522_v13 = vmul.f32 0.2, %v1031_v42  ;;  %v523_v14 = vmul.f32 0.2, %v1033_v45  ;;  %v534_v23 = vsel %vm492_vm6, %v1013_v41, %v513_v60 }
 0x1a4   :  { %553 = vst.msk [vmem:[%s1230_s4 + $0x8] sm:$0xff] %vm287_vm1, %v532_v11  ;;  %v524_v17 = vmul.f32 0.2, %v1035_v46  ;;  %v525_v18 = vmul.f32 0.2, %v1037_v47  ;;  %554 = vst.msk [vmem:[%s1230_s4 + $0x10] sm:$0xff] %vm287_vm1, %v533_v16  ;;  %v535_v29 = vsel %vm493_vm7, %v1015_v25, %v514_v0 }
 0x1a5   :  { %v526_v22 = vmul.f32 0.2, %v1039_v48  ;;  %v527_v26 = vmul.f32 0.2, %v1041_v51  ;;  %v528_v27 = vmul.f32 0.2, %v1043_v52  ;;  %v542_v24 = vsel %vm500_vm14, %v1029_v4, %v521_v12 }
 0x1a6   :  { %v529_v28 = vmul.f32 0.2, %v1045_v53  ;;  %555 = vst.msk [vmem:[%s1230_s4 + $0x18] sm:$0xff] %vm287_vm1, %v534_v23  ;;  %v530_v30 = vmul.f32 0.2, %v1047_v54  ;;  %vm1232_vm3 = vcmp.ge.f32.partialorder %v1017_v32, 0.0  ;;  %v543_v31 = vsel %vm501_vm15, %v1031_v42, %v522_v13 }
 0x1a7   :  { %v536_v33 = vsel %vm1232_vm3, %v1017_v32, %v515_v1  ;;  %vm1233_vm4 = vcmp.ge.f32.partialorder %v1019_v38, 0.0  ;;  %vm1234_vm5 = vcmp.ge.f32.partialorder %v1021_v44, 0.0  ;;  %556 = vst.msk [vmem:[%s1230_s4 + $0x20] sm:$0xff] %vm287_vm1, %v535_v29  ;;  %vm1235_vm6 = vcmp.ge.f32.partialorder %v1023_v50, 0.0  ;;  %563 = vst.msk [vmem:[%s1230_s4 + $0x58] sm:$0xff] %vm287_vm1, %v542_v24 }
 0x1a8   :  { %v537_v34 = vsel %vm1233_vm4, %v1019_v38, %v516_v2  ;;  %v538_v35 = vsel %vm1234_vm5, %v1021_v44, %v517_v5  ;;  %v539_v63 = vsel %vm1235_vm6, %v1023_v50, %v518_v7  ;;  %vm1236_vm7 = vcmp.ge.f32.partialorder %v1025_v56, 0.0  ;;  %557 = vst.msk [vmem:[%s1230_s4 + $0x28] sm:$0xff] %vm287_vm1, %v536_v33  ;;  %564 = vst.msk [vmem:[%s1230_s4 + $0x60] sm:$0xff] %vm287_vm1, %v543_v31 }
 0x1a9   :  { %v540_v36 = vsel %vm1236_vm7, %v1025_v56, %v519_v8  ;;  %vm1237_vm3 = vcmp.ge.f32.partialorder %v1027_v62, 0.0  ;;  %558 = vst.msk [vmem:[%s1230_s4 + $0x30] sm:$0xff] %vm287_vm1, %v537_v34  ;;  %559 = vst.msk [vmem:[%s1230_s4 + $0x38] sm:$0xff] %vm287_vm1, %v538_v35  ;;  %v544_v37 = vsel %vm502_vm0, %v1033_v45, %v523_v14  ;;  %v545_v43 = vsel %vm503_vm2, %v1035_v46, %v524_v17 }
 0x1aa   :  { %v541_v20 = vsel %vm1237_vm3, %v1027_v62, %v520_v10  ;;  %v546_v49 = vsel %vm504_vm8, %v1037_v47, %v525_v18  ;;  %560 = vst.msk [vmem:[%s1230_s4 + $0x40] sm:$0xff] %vm287_vm1, %v539_v63  ;;  %561 = vst.msk [vmem:[%s1230_s4 + $0x48] sm:$0xff] %vm287_vm1, %v540_v36  ;;  %v547_v55 = vsel %vm505_vm9, %v1039_v48, %v526_v22  ;;  %vm1238_vm2 = vcmask 123904  }
 0x1ab   :  { %562 = vst.msk [vmem:[%s1230_s4 + $0x50] sm:$0xff] %vm287_vm1, %v541_v20  ;;  %v548_v61 = vsel %vm506_vm10, %v1041_v51, %v527_v26  ;;  %v549_v3 = vsel %vm507_vm11, %v1043_v52, %v528_v27  ;;  %v550_v9 = vsel %vm508_vm12, %v1045_v53, %v529_v28  ;;  %565 = vst.msk [vmem:[%s1230_s4 + $0x68] sm:$0xff] %vm287_vm1, %v544_v37 }
 0x1ac   :  { %566 = vst.msk [vmem:[%s1230_s4 + $0x70] sm:$0xff] %vm287_vm1, %v545_v43  ;;  %567 = vst.msk [vmem:[%s1230_s4 + $0x78] sm:$0xff] %vm287_vm1, %v546_v49  ;;  %v551_v15 = vsel %vm509_vm13, %v1047_v54, %v530_v30 }
 0x1ad   :  { %568 = vst.msk [vmem:[%s1230_s4 + $0x80] sm:$0xff] %vm287_vm1, %v547_v55  ;;  %569 = vst.msk [vmem:[%s1230_s4 + $0x88] sm:$0xff] %vm287_vm1, %v548_v61 }
 0x1ae   :  { %570 = vst.msk [vmem:[%s1230_s4 + $0x90] sm:$0xff] %vm287_vm1, %v549_v3  ;;  %571 = vst.msk [vmem:[%s1230_s4 + $0x98] sm:$0xff] %vm287_vm1, %v550_v9 }
 0x1af   :  { %572 = vst.msk [vmem:[%s1230_s4 + $0xa0] sm:$0x3] %vm1238_vm2, %v551_v15 }

// kernel: generator_forward.25
= control target key start
LH: loop header
LB: loop body
LE: loop exit
PB: predicated region body
PF: predicated region fallthrough
CT: control target
= control target key end

     0   :  { %vm219_vm0 = vcmask 261120   ;;  %s507_s1 = inlined_call_operand.vmem [shape: bf16[256,32], index: 1, kind: input, shape index: {}]   ;;  %s508_s0 = inlined_call_operand.vmem [shape: bf16[32,256], index: 0, kind: input, shape index: {}]   ;;  %s509_s2 = inlined_call_operand.vmem [shape: f32[1,32], index: 2, kind: input, shape index: {}]   ;;  %s510_s3 = inlined_call_operand.vmem [shape: f32[1,32], index: 3, kind: input, shape index: {}]   ;;  %s511_s4 = inlined_call_operand.vmem [shape: f32[32,32], index: 4, kind: output, shape index: {}]  }
   0x1   :  { %v368_v0 = vld [vmem:[%s507_s1 + $0x40] sm:$0xff]   ;;  %v370_v2 = vld [vmem:[%s507_s1 + $0x48] sm:$0xff]   ;;  %v372_v4 = vld [vmem:[%s507_s1 + $0x50] sm:$0xff]  }
   0x2   :  { %v369_v1 = vld [vmem:[%s507_s1] sm:$0xff]   ;;  %324 = vmatprep.subr.bf16.mxu0 %v368_v0  ;;  %352 = vmatprep.subr.bf16.mxu1 %v368_v0  ;;  %v371_v3 = vld [vmem:[%s507_s1 + $0x8] sm:$0xff]   ;;  %v373_v5 = vld [vmem:[%s507_s1 + $0x10] sm:$0xff]  }
   0x3   :  { %325 = vmatpush3.bf16.msra.mxu0 %v369_v1  ;;  %360 = vmatpush3.bf16.msra.mxu1 %v369_v1  ;;  %v374_v6 = vld [vmem:[%s507_s1 + $0x58] sm:$0xff]   ;;  %v376_v8 = vld [vmem:[%s507_s1 + $0x60] sm:$0xff]   ;;  %v378_v10 = vld [vmem:[%s507_s1 + $0x68] sm:$0xff]  }
   0x4   :  { %326 = vmatprep.subr.bf16.mxu0 %v370_v2  ;;  %353 = vmatprep.subr.bf16.mxu1 %v370_v2  ;;  %v375_v7 = vld [vmem:[%s507_s1 + $0x18] sm:$0xff]   ;;  %v377_v9 = vld [vmem:[%s507_s1 + $0x20] sm:$0xff]   ;;  %v379_v13 = vld [vmem:[%s507_s1 + $0x28] sm:$0xff]  }
   0x5   :  { %v386_v11 = vld [vmem:[%s508_s0 + $0x4] ss:$8 sps:$4 sm:$0xff]   ;;  %v389_v12 = vld [vmem:[%s508_s0 + $0x14] ss:$8 sps:$4 sm:$0xff]   ;;  %v384_v18 = vld [vmem:[%s508_s0] ss:$8 sps:$4 sm:$0xff]  }
   0x6   :  { %v380_v14 = vld [vmem:[%s507_s1 + $0x70] sm:$0xff]   ;;  %202 = vmatprep.mubr.bf16.mxu0 %v386_v11  ;;  %210 = vmatprep.mubr.bf16.mxu1 %v389_v12  ;;  %v382_v16 = vld [vmem:[%s507_s1 + $0x78] sm:$0xff]   ;;  %v261_v11 = vld [vmem:[%s510_s3] sm:$0x1] }
   0x7   :  { %327 = vmatpush3.bf16.msra.mxu0 %v371_v3  ;;  %361 = vmatpush3.bf16.msra.mxu1 %v371_v3  ;;  %v381_v15 = vld [vmem:[%s507_s1 + $0x30] sm:$0xff]   ;;  %v383_v17 = vld [vmem:[%s507_s1 + $0x38] sm:$0xff]  }
   0x8   :  { %328 = vmatprep.subr.bf16.mxu0 %v372_v4  ;;  %354 = vmatprep.subr.bf16.mxu1 %v372_v4  ;;  %v387_v19 = vld [vmem:[%s508_s0 + $0x10] ss:$8 sps:$4 sm:$0xff]  }
   0xb   :  { %329 = vmatpush3.bf16.msra.mxu0 %v373_v5  ;;  %362 = vmatpush3.bf16.msra.mxu1 %v373_v5  ;;  %v265_v5 = vlaneseq }
   0xc   :  { %330 = vmatprep.subr.bf16.mxu0 %v374_v6  ;;  %355 = vmatprep.subr.bf16.mxu1 %v374_v6 }
   0xd   :  { %v266_v6 = vshrl.u32 %v265_v5, 7 }
   0xf   :  { %331 = vmatpush3.bf16.msra.mxu0 %v375_v7  ;;  %363 = vmatpush3.bf16.msra.mxu1 %v375_v7  ;;  %v257_v7 = vld [vmem:[%s509_s2] sm:$0x1] }
  0x10   :  { %332 = vmatprep.subr.bf16.mxu0 %v376_v8  ;;  %356 = vmatprep.subr.bf16.mxu1 %v376_v8  ;;  %v267_v8 = vsub.s32 0, %v266_v6 }
  0x13   :  { %333 = vmatpush3.bf16.msra.mxu0 %v377_v9  ;;  %364 = vmatpush3.bf16.msra.mxu1 %v377_v9 }
  0x14   :  { %334 = vmatprep.subr.bf16.mxu0 %v378_v10  ;;  %357 = vmatprep.subr.bf16.mxu1 %v378_v10 }
  0x17   :  { %335 = vmatpush3.bf16.msra.mxu0 %v379_v13  ;;  %365 = vmatpush3.bf16.msra.mxu1 %v379_v13 }
  0x18   :  { %336 = vmatprep.subr.bf16.mxu0 %v380_v14  ;;  %358 = vmatprep.subr.bf16.mxu1 %v380_v14 }
  0x1b   :  { %337 = vmatpush3.bf16.msra.mxu0 %v381_v15  ;;  %366 = vmatpush3.bf16.msra.mxu1 %v381_v15 }
  0x1c   :  { %338 = vmatprep.subr.bf16.mxu0 %v382_v16  ;;  %359 = vmatprep.subr.bf16.mxu1 %v382_v16 }
  0x1f   :  { %339 = vmatpush3.bf16.msra.mxu0 %v383_v17  ;;  %367 = vmatpush3.bf16.msra.mxu1 %v383_v17 }
  0x22   :  { %203 = vmatmul.mubr.bf16.vlgmr.msra.gmra.mrb[0].mxu0 %v384_v18  ;;  %211 = vmatmul.mubr.bf16.vlgmr.msra.gmra.mrb[0].mxu1 %v387_v19 }
  0xf5   :  { %v340_v20 = vpop.f32.mrb[0].mxu0  ;;  %v346_v21 = vpop.f32.mrb[0].mxu1 }
  0xf6   :  { %v341_v22 = vpop.f32.mrb[1].mxu0  ;;  %v347_v23 = vpop.f32.mrb[1].mxu1 }
  0xf7   :  { %v342_v24 = vadd.f32 %v341_v22, %v340_v20  ;;  %v343_v25 = vpop.f32.mrb[2].mxu0  ;;  %v348_v26 = vadd.f32 %v347_v23, %v346_v21  ;;  %v349_v27 = vpop.f32.mrb[2].mxu1 }
  0xf8   :  { %v344_v28 = vpop.f32.mrb[3].mxu0  ;;  %v350_v29 = vpop.f32.mrb[3].mxu1 }
  0xf9   :  { %v345_v30 = vadd.f32 %v344_v28, %v343_v25  ;;  %v351_v31 = vadd.f32 %v350_v29, %v349_v27  ;;  %v220_v32 = vsel %vm219_vm0, %v342_v24, 0.0  ;;  %v223_v33 = vsel %vm219_vm0, %v348_v26, 0.0 }
  0xfb   :  { %v221_v34 = vsel %vm219_vm0, %v345_v30, 0.0  ;;  %v225_v37 = vsel %vm219_vm0, %v351_v31, 0.0 }
  0xfc   :  { %v222_v35 = vadd.f32 %v221_v34, %v220_v32 }
  0xfe   :  { %v224_v36 = vadd.f32 %v223_v33, %v222_v35 }
 0x100   :  { %v226_v38 = vadd.f32 %v225_v37, %v224_v36 }
 0x102   :  { %v227_v39 = vrot.slane %v226_v38, 4 }
 0x104   :  { %v228_v40 = vadd.f32 %v227_v39, %v226_v38 }
 0x106   :  { %v229_v41 = vrot.slane %v228_v40, 2 }
 0x108   :  { %v230_v42 = vadd.f32 %v229_v41, %v228_v40 }
 0x10a   :  { %v231_v43 = vrot.slane %v230_v42, 1 }
 0x10c   :  { %v232_v44 = vadd.f32 %v231_v43, %v230_v42 }
 0x10e   :  { %v234_v45 = vmul.f32 0.03125, %v232_v44 }
 0x110   :  { %v235_v46 = vsub.f32 %v342_v24, %v234_v45  ;;  %v236_v47 = vsub.f32 %v345_v30, %v234_v45  ;;  %v237_v48 = vsub.f32 %v348_v26, %v234_v45  ;;  %v238_v49 = vsub.f32 %v351_v31, %v234_v45 }
 0x112   :  { %v239_v50 = vmul.f32 %v235_v46, %v235_v46  ;;  %v240_v51 = vmul.f32 %v236_v47, %v236_v47  ;;  %v241_v52 = vmul.f32 %v237_v48, %v237_v48  ;;  %v242_v53 = vmul.f32 %v238_v49, %v238_v49 }
 0x114   :  { %v243_v54 = vsel %vm219_vm0, %v239_v50, 0.0  ;;  %v244_v55 = vsel %vm219_vm0, %v240_v51, 0.0  ;;  %v246_v57 = vsel %vm219_vm0, %v241_v52, 0.0  ;;  %v248_v59 = vsel %vm219_vm0, %v242_v53, 0.0 }
 0x115   :  { %v245_v56 = vadd.f32 %v244_v55, %v243_v54 }
 0x117   :  { %v247_v58 = vadd.f32 %v246_v57, %v245_v56 }
 0x119   :  { %v249_v60 = vadd.f32 %v248_v59, %v247_v58 }
 0x11b   :  { %v250_v61 = vrot.slane %v249_v60, 4 }
 0x11d   :  { %v251_v62 = vadd.f32 %v250_v61, %v249_v60 }
 0x11f   :  { %v252_v63 = vrot.slane %v251_v62, 2 }
 0x121   :  { %v253_v0 = vadd.f32 %v252_v63, %v251_v62 }
 0x123   :  { %v254_v1 = vrot.slane %v253_v0, 1 }
 0x125   :  { %v255_v2 = vadd.f32 %v254_v1, %v253_v0 }
 0x127   :  { %v256_v3 = vmul.f32 0.03125, %v255_v2 }
 0x129   :  { %v258_v4 = vadd.f32 1e-05, %v256_v3 }
 0x12b   :  { %390 = vrsqrt.f32 %v258_v4 }
 0x135   :  { %v391_v9 = vpop.eup %390 }
 0x136   :  { %v260_v10 = vmul.f32 %v391_v9, %v257_v7 }
 0x138   :  { %v262_v12 = vmul.f32 %v260_v10, %v234_v45  ;;  %v268_v13 = vrot.slane %v260_v10, %v267_v8 }
 0x13a   :  { %v263_v14 = vsub.f32 %v261_v11, %v262_v12  ;;  %v271_v15 = vmul.f32 %v345_v30, %v268_v13  ;;  %v272_v16 = vmul.f32 %v348_v26, %v268_v13  ;;  %v273_v17 = vmul.f32 %v351_v31, %v268_v13 }
 0x13b   :  { %v270_v18 = vmul.f32 %v342_v24, %v268_v13 }
 0x13c   :  { %v278_v19 = vrot.slane %v263_v14, %v267_v8 }
 0x13e   :  { %v280_v20 = vadd.f32 %v278_v19, %v270_v18  ;;  %v281_v21 = vadd.f32 %v278_v19, %v271_v15  ;;  %v282_v22 = vadd.f32 %v278_v19, %v272_v16  ;;  %v283_v23 = vadd.f32 %v278_v19, %v273_v17 }
 0x140   :  { %vm284_vm1 = vcmp.ge.f32.partialorder %v280_v20, 0.0  ;;  %vm285_vm2 = vcmp.ge.f32.partialorder %v281_v21, 0.0  ;;  %vm286_vm3 = vcmp.ge.f32.partialorder %v282_v22, 0.0  ;;  %vm287_vm4 = vcmp.ge.f32.partialorder %v283_v23, 0.0 }
 0x141   :  { %v288_v25 = vmul.f32 0.2, %v280_v20  ;;  %v289_v27 = vmul.f32 0.2, %v281_v21  ;;  %v290_v28 = vmul.f32 0.2, %v282_v22 }
 0x142   :  { %v291_v29 = vmul.f32 0.2, %v283_v23 }
 0x143   :  { %v292_v32 = vsel %vm284_vm1, %v280_v20, %v288_v25  ;;  %v293_v33 = vsel %vm285_vm2, %v281_v21, %v289_v27  ;;  %v294_v34 = vsel %vm286_vm3, %v282_v22, %v290_v28 }
 0x144   :  { %v295_v30 = vsel %vm287_vm4, %v283_v23, %v291_v29  ;;  %296 = vst.msk [vmem:[%s511_s4] sm:$0xff] %vm219_vm0, %v292_v32  ;;  %297 = vst.msk [vmem:[%s511_s4 + $0x8] sm:$0xff] %vm219_vm0, %v293_v33 }
 0x145   :  { %298 = vst.msk [vmem:[%s511_s4 + $0x10] sm:$0xff] %vm219_vm0, %v294_v34  ;;  %299 = vst.msk [vmem:[%s511_s4 + $0x18] sm:$0xff] %vm219_vm0, %v295_v30 }

// kernel: generator_forward.26
= control target key start
LH: loop header
LB: loop body
LE: loop exit
PB: predicated region body
PF: predicated region fallthrough
CT: control target
= control target key end

     0   :  { %v494_v22 = vmov 1966171168   ;;  %v89_v24 = vlaneseq  ;;  %vm378_vm0 = vcmask 123904   ;;  %s612_s1 = inlined_call_operand.vmem [shape: bf16[512,16], index: 1, kind: input, shape index: {}]   ;;  %s613_s0 = inlined_call_operand.vmem [shape: bf16[2,512], index: 0, kind: input, shape index: {}]   ;;  %s614_s2 = inlined_call_operand.vmem [shape: f32[2,16], index: 2, kind: output, shape index: {}]  }
   0x1   :  { %v462_v0 = vld [vmem:[%s612_s1 + $0x40] sm:$0xff]   ;;  %v466_v4 = vld [vmem:[%s612_s1 + $0x48] sm:$0xff]   ;;  %v470_v8 = vld [vmem:[%s612_s1 + $0x50] sm:$0xff]   ;;  %v87_v23 = vunpack.c.l.s4 %v494_v22 }
   0x2   :  { %v463_v1 = vld [vmem:[%s612_s1 + $0xc0] sm:$0xff]   ;;  %417 = vmatprep.subr.bf16.mxu0 %v462_v0  ;;  %v467_v5 = vld [vmem:[%s612_s1 + $0xc8] sm:$0xff]   ;;  %v471_v9 = vld [vmem:[%s612_s1 + $0xd0] sm:$0xff]   ;;  %v90_v30 = vshrl.u32 %v89_v24, 7 }
   0x3   :  { %v464_v2 = vld [vmem:[%s612_s1] sm:$0xff]   ;;  %439 = vmatprep.subr.bf16.mxu1 %v463_v1  ;;  %v468_v6 = vld [vmem:[%s612_s1 + $0x8] sm:$0xff]   ;;  %v472_v10 = vld [vmem:[%s612_s1 + $0x10] sm:$0xff]   ;;  %v88_v29 = vunpack.c.0.s8 %v87_v23 }
   0x4   :  { %v465_v3 = vld [vmem:[%s612_s1 + $0x80] sm:$0xff]   ;;  %418 = vmatpush3.bf16.msra.mxu0 %v464_v2  ;;  %v469_v7 = vld [vmem:[%s612_s1 + $0x88] sm:$0xff]   ;;  %v473_v11 = vld [vmem:[%s612_s1 + $0x90] sm:$0xff]  }
   0x5   :  { %440 = vmatpush3.bf16.msra.mxu1 %v465_v3  ;;  %419 = vmatprep.subr.bf16.mxu0 %v466_v4  ;;  %v474_v12 = vld [vmem:[%s612_s1 + $0x58] sm:$0xff]   ;;  %v478_v16 = vld [vmem:[%s612_s1 + $0x60] sm:$0xff]   ;;  %v482_v20 = vld [vmem:[%s612_s1 + $0x68] sm:$0xff]   ;;  %v91_v35 = vsub.s32 %v88_v29, %v90_v30 }
   0x6   :  { %441 = vmatprep.subr.bf16.mxu1 %v467_v5  ;;  %v475_v13 = vld [vmem:[%s612_s1 + $0xd8] sm:$0xff]   ;;  %v479_v17 = vld [vmem:[%s612_s1 + $0xe0] sm:$0xff]   ;;  %v483_v21 = vld [vmem:[%s612_s1 + $0xe8] sm:$0xff]  }
   0x7   :  { %v476_v14 = vld [vmem:[%s612_s1 + $0x18] sm:$0xff]   ;;  %v480_v18 = vld [vmem:[%s612_s1 + $0x20] sm:$0xff]   ;;  %v484_v25 = vld [vmem:[%s612_s1 + $0x28] sm:$0xff]  }
   0x8   :  { %420 = vmatpush3.bf16.msra.mxu0 %v468_v6  ;;  %v477_v15 = vld [vmem:[%s612_s1 + $0x98] sm:$0xff]   ;;  %v481_v19 = vld [vmem:[%s612_s1 + $0xa0] sm:$0xff]   ;;  %v485_v26 = vld [vmem:[%s612_s1 + $0xa8] sm:$0xff]  }
   0x9   :  { %442 = vmatpush3.bf16.msra.mxu1 %v469_v7  ;;  %421 = vmatprep.subr.bf16.mxu0 %v470_v8  ;;  %v486_v27 = vld [vmem:[%s612_s1 + $0x70] sm:$0xff]   ;;  %v490_v33 = vld [vmem:[%s612_s1 + $0x78] sm:$0xff]   ;;  %v384_v38 = vld.sshfl [vmem:[%s613_s0] sm:$0x33 pattern:$0x75316420] }
   0xa   :  { %443 = vmatprep.subr.bf16.mxu1 %v471_v9  ;;  %v487_v28 = vld [vmem:[%s612_s1 + $0xf0] sm:$0xff]   ;;  %v491_v34 = vld [vmem:[%s612_s1 + $0xf8] sm:$0xff]   ;;  %v85_v39 = vcombine.high %v384_v38, %v384_v38  ;;  %v92_v40 = vrot.slane %v384_v38, %v91_v35 }
   0xb   :  { %v488_v31 = vld [vmem:[%s612_s1 + $0x30] sm:$0xff]   ;;  %v492_v36 = vld [vmem:[%s612_s1 + $0x38] sm:$0xff]  }
   0xc   :  { %422 = vmatpush3.bf16.msra.mxu0 %v472_v10  ;;  %v489_v32 = vld [vmem:[%s612_s1 + $0xb0] sm:$0xff]   ;;  %v493_v37 = vld [vmem:[%s612_s1 + $0xb8] sm:$0xff]   ;;  %v99_v41 = vrot.slane %v85_v39, %v91_v35  ;;  %v100_v42 = vcombine.high %v92_v40, %v92_v40 }
   0xd   :  { %444 = vmatpush3.bf16.msra.mxu1 %v473_v11  ;;  %423 = vmatprep.subr.bf16.mxu0 %v474_v12 }
   0xe   :  { %445 = vmatprep.subr.bf16.mxu1 %v475_v13  ;;  %330 = vmatprep.mubr.bf16.mxu0 %v99_v41  ;;  %v101_v43 = vcombine.high %v99_v41, %v99_v41 }
  0x10   :  { %424 = vmatpush3.bf16.msra.mxu0 %v476_v14  ;;  %370 = vmatprep.mubr.bf16.mxu1 %v101_v43 }
  0x11   :  { %446 = vmatpush3.bf16.msra.mxu1 %v477_v15  ;;  %425 = vmatprep.subr.bf16.mxu0 %v478_v16 }
  0x12   :  { %447 = vmatprep.subr.bf16.mxu1 %v479_v17 }
  0x14   :  { %426 = vmatpush3.bf16.msra.mxu0 %v480_v18 }
  0x15   :  { %448 = vmatpush3.bf16.msra.mxu1 %v481_v19  ;;  %427 = vmatprep.subr.bf16.mxu0 %v482_v20 }
  0x16   :  { %449 = vmatprep.subr.bf16.mxu1 %v483_v21 }
  0x18   :  { %428 = vmatpush3.bf16.msra.mxu0 %v484_v25 }
  0x19   :  { %450 = vmatpush3.bf16.msra.mxu1 %v485_v26  ;;  %429 = vmatprep.subr.bf16.mxu0 %v486_v27 }
  0x1a   :  { %451 = vmatprep.subr.bf16.mxu1 %v487_v28 }
  0x1c   :  { %430 = vmatpush3.bf16.msra.mxu0 %v488_v31 }
  0x1d   :  { %452 = vmatpush3.bf16.msra.mxu1 %v489_v32  ;;  %431 = vmatprep.subr.bf16.mxu0 %v490_v33 }
  0x1e   :  { %453 = vmatprep.subr.bf16.mxu1 %v491_v34 }
  0x20   :  { %432 = vmatpush3.bf16.msra.mxu0 %v492_v36 }
  0x21   :  { %454 = vmatpush3.bf16.msra.mxu1 %v493_v37 }
  0x23   :  { %331 = vmatmul.mubr.bf16.vlgmr.msra.gmra.mrb[0].mxu0 %v92_v40 }
  0x24   :  { %371 = vmatmul.mubr.bf16.vlgmr.msra.gmra.mrb[0].mxu1 %v100_v42 }
  0xf6   :  { %v433_v44 = vpop.f32.mrb[0].mxu0 }
  0xf7   :  { %v434_v45 = vpop.f32.mrb[1].mxu0  ;;  %v455_v46 = vpop.f32.mrb[0].mxu1 }
  0xf8   :  { %v435_v47 = vadd.f32 %v434_v45, %v433_v44  ;;  %v436_v48 = vpop.f32.mrb[2].mxu0  ;;  %v456_v49 = vpop.f32.mrb[1].mxu1 }
  0xf9   :  { %v437_v50 = vpop.f32.mrb[3].mxu0  ;;  %v457_v51 = vadd.f32 %v456_v49, %v455_v46  ;;  %v458_v52 = vpop.f32.mrb[2].mxu1 }
  0xfa   :  { %v459_v53 = vpop.f32.mrb[3].mxu1 }
  0xfb   :  { %v373_v54 = vadd.f32 %v457_v51, %v435_v47 }
  0xfd   :  { %379 = vst.msk [vmem:[%s614_s2] sm:$0x3] %vm378_vm0, %v373_v54 }

// kernel: generator_forward.28
= control target key start
LH: loop header
LB: loop body
LE: loop exit
PB: predicated region body
PF: predicated region fallthrough
CT: control target
= control target key end

     0   :  { %vm141_vm0 = vcmask 130048   ;;  %s257_s1 = inlined_call_operand.vmem [shape: bf16[128,16], index: 1, kind: input, shape index: {}]   ;;  %s258_s0 = inlined_call_operand.vmem [shape: bf16[32,128], index: 0, kind: input, shape index: {}]   ;;  %s259_s2 = inlined_call_operand.vmem [shape: f32[32,16], index: 2, kind: output, shape index: {}]  }
   0x1   :  { %v190_v0 = vld [vmem:[%s257_s1] sm:$0xff]   ;;  %v191_v1 = vld [vmem:[%s257_s1 + $0x8] sm:$0xff]   ;;  %v192_v2 = vld [vmem:[%s257_s1 + $0x10] sm:$0xff]  }
   0x2   :  { %170 = vmatprep.subr.bf16.mxu0 %v190_v0  ;;  %v193_v3 = vld [vmem:[%s257_s1 + $0x18] sm:$0xff]   ;;  %v198_v4 = vld [vmem:[%s258_s0] sm:$0xff]   ;;  %v195_v6 = vld [vmem:[%s257_s1 + $0x28] sm:$0xff]  }
   0x3   :  { %171 = vmatpush3.bf16.msra.mxu0 %v190_v0  ;;  %186 = vmatprep.mubr.bf16.mxu0 %v198_v4  ;;  %v194_v5 = vld [vmem:[%s257_s1 + $0x20] sm:$0xff]   ;;  %v196_v7 = vld [vmem:[%s257_s1 + $0x30] sm:$0xff]   ;;  %v197_v8 = vld [vmem:[%s257_s1 + $0x38] sm:$0xff]  }
   0x4   :  { %172 = vmatprep.subr.bf16.mxu0 %v191_v1  ;;  %v199_v9 = vld [vmem:[%s258_s0 + $0x8] sm:$0xff]  }
   0x7   :  { %173 = vmatpush3.bf16.msra.mxu0 %v191_v1 }
   0x8   :  { %174 = vmatprep.subr.bf16.mxu0 %v192_v2 }
   0xb   :  { %175 = vmatpush3.bf16.msra.mxu0 %v192_v2 }
   0xc   :  { %176 = vmatprep.subr.bf16.mxu0 %v193_v3 }
   0xf   :  { %177 = vmatpush3.bf16.msra.mxu0 %v193_v3 }
  0x10   :  { %178 = vmatprep.subr.bf16.mxu0 %v194_v5 }
  0x13   :  { %179 = vmatpush3.bf16.msra.mxu0 %v194_v5 }
  0x14   :  { %180 = vmatprep.subr.bf16.mxu0 %v195_v6 }
  0x17   :  { %181 = vmatpush3.bf16.msra.mxu0 %v195_v6 }
  0x18   :  { %182 = vmatprep.subr.bf16.mxu0 %v196_v7 }
  0x1b   :  { %183 = vmatpush3.bf16.msra.mxu0 %v196_v7 }
  0x1c   :  { %184 = vmatprep.subr.bf16.mxu0 %v197_v8 }
  0x1f   :  { %185 = vmatpush3.bf16.msra.mxu0 %v197_v8 }
  0x22   :  { %187 = vmatmul.mubr.bf16.vlgmr.msra.gmra.mrb[0].mxu0 %v199_v9 }
  0xf5   :  { %v188_v10 = vpop.f32.mrb[0].mxu0 }
  0xf6   :  { %144 = vst.msk [vmem:[%s259_s2 + $0x10] sm:$0xff] %vm141_vm0, %v188_v10  ;;  %v126_v11 = vpop.f32.mrb[1].mxu0 }
  0xf7   :  { %142 = vst.msk [vmem:[%s259_s2] sm:$0xff] %vm141_vm0, %v126_v11  ;;  %v189_v12 = vpop.f32.mrb[2].mxu0 }
  0xf8   :  { %145 = vst.msk [vmem:[%s259_s2 + $0x18] sm:$0xff] %vm141_vm0, %v189_v12  ;;  %v129_v13 = vpop.f32.mrb[3].mxu0 }
  0xf9   :  { %143 = vst.msk [vmem:[%s259_s2 + $0x8] sm:$0xff] %vm141_vm0, %v129_v13 }

// kernel: generator_forward.32
= control target key start
LH: loop header
LB: loop body
LE: loop exit
PB: predicated region body
PF: predicated region fallthrough
CT: control target
= control target key end

     0   :  { %vm30_vm0 = vcmask 130048   ;;  %s566_s0 = inlined_call_operand.vmem [shape: f32[128,16], index: 0, kind: input, shape index: {}]   ;;  %s567_s1 = inlined_call_operand.vmem [shape: f32[1,16], index: 1, kind: input, shape index: {}]   ;;  %s568_s2 = inlined_call_operand.vmem [shape: f32[1,16], index: 2, kind: input, shape index: {}]   ;;  %s569_s3 = inlined_call_operand.vmem [shape: f32[128,16], index: 3, kind: output, shape index: {}]  }
   0x1   :  { %v284_v0 = vld [vmem:[%s566_s0] sm:$0xff]  ;;  %v289_v1 = vld [vmem:[%s566_s0 + $0x8] sm:$0xff]  ;;  %v294_v2 = vld [vmem:[%s566_s0 + $0x10] sm:$0xff] }
   0x2   :  { %v299_v3 = vld [vmem:[%s566_s0 + $0x18] sm:$0xff]  ;;  %v31_v4 = vsel %vm30_vm0, %v284_v0, 0.0  ;;  %v32_v5 = vsel %vm30_vm0, %v289_v1, 0.0  ;;  %v34_v6 = vsel %vm30_vm0, %v294_v2, 0.0  ;;  %v310_v7 = vld [vmem:[%s566_s0 + $0x20] sm:$0xff]  ;;  %v317_v10 = vld [vmem:[%s566_s0 + $0x28] sm:$0xff] }
   0x3   :  { %v33_v8 = vadd.f32 %v32_v5, %v31_v4  ;;  %v36_v9 = vsel %vm30_vm0, %v299_v3, 0.0  ;;  %v38_v12 = vsel %vm30_vm0, %v310_v7, 0.0  ;;  %v324_v13 = vld [vmem:[%s566_s0 + $0x30] sm:$0xff]  ;;  %v40_v15 = vsel %vm30_vm0, %v317_v10, 0.0  ;;  %v331_v16 = vld [vmem:[%s566_s0 + $0x38] sm:$0xff]  ;;  %v338_v19 = vld [vmem:[%s566_s0 + $0x40] sm:$0xff] }
   0x4   :  { %v42_v18 = vsel %vm30_vm0, %v324_v13, 0.0  ;;  %v44_v21 = vsel %vm30_vm0, %v331_v16, 0.0  ;;  %v345_v22 = vld [vmem:[%s566_s0 + $0x48] sm:$0xff]  ;;  %v46_v24 = vsel %vm30_vm0, %v338_v19, 0.0  ;;  %v352_v25 = vld [vmem:[%s566_s0 + $0x50] sm:$0xff]  ;;  %v359_v28 = vld [vmem:[%s566_s0 + $0x58] sm:$0xff] }
   0x5   :  { %v35_v11 = vadd.f32 %v34_v6, %v33_v8  ;;  %v48_v27 = vsel %vm30_vm0, %v345_v22, 0.0  ;;  %v50_v30 = vsel %vm30_vm0, %v352_v25, 0.0  ;;  %v366_v31 = vld [vmem:[%s566_s0 + $0x60] sm:$0xff]  ;;  %v52_v33 = vsel %vm30_vm0, %v359_v28, 0.0  ;;  %v373_v34 = vld [vmem:[%s566_s0 + $0x68] sm:$0xff]  ;;  %v380_v37 = vld [vmem:[%s566_s0 + $0x70] sm:$0xff] }
   0x6   :  { %v54_v36 = vsel %vm30_vm0, %v366_v31, 0.0  ;;  %v56_v39 = vsel %vm30_vm0, %v373_v34, 0.0  ;;  %v387_v40 = vld [vmem:[%s566_s0 + $0x78] sm:$0xff]  ;;  %v58_v42 = vsel %vm30_vm0, %v380_v37, 0.0 }
   0x7   :  { %v37_v14 = vadd.f32 %v36_v9, %v35_v11  ;;  %v60_v44 = vsel %vm30_vm0, %v387_v40, 0.0 }
   0x9   :  { %v39_v17 = vadd.f32 %v38_v12, %v37_v14 }
   0xb   :  { %v41_v20 = vadd.f32 %v40_v15, %v39_v17 }
   0xd   :  { %v43_v23 = vadd.f32 %v42_v18, %v41_v20 }
   0xf   :  { %v45_v26 = vadd.f32 %v44_v21, %v43_v23 }
  0x11   :  { %v47_v29 = vadd.f32 %v46_v24, %v45_v26 }
  0x13   :  { %v49_v32 = vadd.f32 %v48_v27, %v47_v29 }
  0x15   :  { %v51_v35 = vadd.f32 %v50_v30, %v49_v32 }
  0x17   :  { %v53_v38 = vadd.f32 %v52_v33, %v51_v35 }
  0x19   :  { %v55_v41 = vadd.f32 %v54_v36, %v53_v38 }
  0x1b   :  { %v57_v43 = vadd.f32 %v56_v39, %v55_v41 }
  0x1d   :  { %v59_v45 = vadd.f32 %v58_v42, %v57_v43 }
  0x1f   :  { %v61_v46 = vadd.f32 %v60_v44, %v59_v45 }
  0x21   :  { %v62_v47 = vrot.slane %v61_v46, 4 }
  0x23   :  { %v63_v48 = vadd.f32 %v62_v47, %v61_v46 }
  0x25   :  { %v64_v49 = vrot.slane %v63_v48, 2 }
  0x27   :  { %v65_v50 = vadd.f32 %v64_v49, %v63_v48 }
  0x29   :  { %v66_v51 = vrot.slane %v65_v50, 1 }
  0x2b   :  { %v67_v52 = vadd.f32 %v66_v51, %v65_v50 }
  0x2d   :  { %v393_v53 = vmul.f32 0.0078125, %v67_v52 }
  0x2f   :  { %v70_v54 = vsub.f32 %v284_v0, %v393_v53  ;;  %v71_v55 = vsub.f32 %v289_v1, %v393_v53  ;;  %v72_v56 = vsub.f32 %v294_v2, %v393_v53  ;;  %v73_v57 = vsub.f32 %v299_v3, %v393_v53 }
  0x30   :  { %v74_v58 = vsub.f32 %v310_v7, %v393_v53  ;;  %v75_v62 = vsub.f32 %v317_v10, %v393_v53  ;;  %v76_v4 = vsub.f32 %v324_v13, %v393_v53  ;;  %v77_v12 = vsub.f32 %v331_v16, %v393_v53 }
  0x31   :  { %v86_v59 = vmul.f32 %v70_v54, %v70_v54  ;;  %v87_v60 = vmul.f32 %v71_v55, %v71_v55  ;;  %v88_v61 = vmul.f32 %v72_v56, %v72_v56  ;;  %v89_v63 = vmul.f32 %v73_v57, %v73_v57 }
  0x32   :  { %v90_v5 = vmul.f32 %v74_v58, %v74_v58  ;;  %v91_v14 = vmul.f32 %v75_v62, %v75_v62  ;;  %v78_v18 = vsub.f32 %v338_v19, %v393_v53  ;;  %v92_v20 = vmul.f32 %v76_v4, %v76_v4 }
  0x33   :  { %v102_v6 = vsel %vm30_vm0, %v86_v59, 0.0  ;;  %v103_v8 = vsel %vm30_vm0, %v87_v60, 0.0  ;;  %v105_v9 = vsel %vm30_vm0, %v88_v61, 0.0  ;;  %v107_v15 = vsel %vm30_vm0, %v89_v63, 0.0 }
  0x34   :  { %v104_v11 = vadd.f32 %v103_v8, %v102_v6  ;;  %v109_v21 = vsel %vm30_vm0, %v90_v5, 0.0  ;;  %v79_v24 = vsub.f32 %v345_v22, %v393_v53  ;;  %v93_v26 = vmul.f32 %v77_v12, %v77_v12 }
  0x35   :  { %v111_v27 = vsel %vm30_vm0, %v91_v14, 0.0  ;;  %v80_v30 = vsub.f32 %v352_v25, %v393_v53  ;;  %v94_v32 = vmul.f32 %v78_v18, %v78_v18  ;;  %v113_v33 = vsel %vm30_vm0, %v92_v20, 0.0 }
  0x36   :  { %v106_v17 = vadd.f32 %v105_v9, %v104_v11  ;;  %v81_v36 = vsub.f32 %v359_v28, %v393_v53  ;;  %v95_v38 = vmul.f32 %v79_v24, %v79_v24  ;;  %v115_v39 = vsel %vm30_vm0, %v93_v26, 0.0 }
  0x37   :  { %v82_v42 = vsub.f32 %v366_v31, %v393_v53  ;;  %v96_v43 = vmul.f32 %v80_v30, %v80_v30  ;;  %v117_v44 = vsel %vm30_vm0, %v94_v32, 0.0  ;;  %v83_v46 = vsub.f32 %v373_v34, %v393_v53 }
  0x38   :  { %v108_v23 = vadd.f32 %v107_v15, %v106_v17  ;;  %v97_v47 = vmul.f32 %v81_v36, %v81_v36  ;;  %v119_v48 = vsel %vm30_vm0, %v95_v38, 0.0  ;;  %v84_v50 = vsub.f32 %v380_v37, %v393_v53 }
  0x39   :  { %v98_v51 = vmul.f32 %v82_v42, %v82_v42  ;;  %v121_v52 = vsel %vm30_vm0, %v96_v43, 0.0  ;;  %v85_v55 = vsub.f32 %v387_v40, %v393_v53  ;;  %v99_v56 = vmul.f32 %v83_v46, %v83_v46 }
  0x3a   :  { %v110_v29 = vadd.f32 %v109_v21, %v108_v23  ;;  %v123_v57 = vsel %vm30_vm0, %v97_v47, 0.0  ;;  %v100_v59 = vmul.f32 %v84_v50, %v84_v50  ;;  %v148_v24 = vlaneseq }
  0x3b   :  { %v125_v60 = vsel %vm30_vm0, %v98_v51, 0.0  ;;  %v101_v62 = vmul.f32 %v85_v55, %v85_v55  ;;  %v127_v63 = vsel %vm30_vm0, %v99_v56, 0.0 }
  0x3c   :  { %v112_v35 = vadd.f32 %v111_v27, %v110_v29  ;;  %v129_v5 = vsel %vm30_vm0, %v100_v59, 0.0  ;;  %v149_v26 = vshrl.u32 %v148_v24, 7  ;;  %v140_v27 = vld [vmem:[%s567_s1] sm:$0x1] }
  0x3d   :  { %v131_v8 = vsel %vm30_vm0, %v101_v62, 0.0 }
  0x3e   :  { %v114_v41 = vadd.f32 %v113_v33, %v112_v35  ;;  %v150_v29 = vsub.s32 0, %v149_v26  ;;  %v144_v33 = vld [vmem:[%s568_s2] sm:$0x1] }
  0x40   :  { %v116_v45 = vadd.f32 %v115_v39, %v114_v41 }
  0x42   :  { %v118_v49 = vadd.f32 %v117_v44, %v116_v45 }
  0x44   :  { %v120_v54 = vadd.f32 %v119_v48, %v118_v49 }
  0x46   :  { %v122_v58 = vadd.f32 %v121_v52, %v120_v54 }
  0x48   :  { %v124_v61 = vadd.f32 %v123_v57, %v122_v58 }
  0x4a   :  { %v126_v4 = vadd.f32 %v125_v60, %v124_v61 }
  0x4c   :  { %v128_v6 = vadd.f32 %v127_v63, %v126_v4 }
  0x4e   :  { %v130_v9 = vadd.f32 %v129_v5, %v128_v6 }
  0x50   :  { %v132_v11 = vadd.f32 %v131_v8, %v130_v9 }
  0x52   :  { %v133_v12 = vrot.slane %v132_v11, 4 }
  0x54   :  { %v134_v14 = vadd.f32 %v133_v12, %v132_v11 }
  0x56   :  { %v135_v15 = vrot.slane %v134_v14, 2 }
  0x58   :  { %v136_v17 = vadd.f32 %v135_v15, %v134_v14 }
  0x5a   :  { %v137_v18 = vrot.slane %v136_v17, 1 }
  0x5c   :  { %v138_v20 = vadd.f32 %v137_v18, %v136_v17 }
  0x5e   :  { %v139_v21 = vmul.f32 0.0078125, %v138_v20 }
  0x60   :  { %v141_v23 = vadd.f32 1e-05, %v139_v21 }
  0x62   :  { %259 = vrsqrt.f32 %v141_v23 }
  0x6c   :  { %v260_v30 = vpop.eup %259 }
  0x6d   :  { %v143_v32 = vmul.f32 %v260_v30, %v140_v27 }
  0x6f   :  { %v145_v35 = vmul.f32 %v143_v32, %v393_v53  ;;  %v450_v36 = vrot.slane %v143_v32, %v150_v29 }
  0x71   :  { %v146_v38 = vsub.f32 %v144_v33, %v145_v35  ;;  %v153_v39 = vmul.f32 %v450_v36, %v284_v0  ;;  %v154_v41 = vmul.f32 %v450_v36, %v289_v1  ;;  %v155_v42 = vmul.f32 %v450_v36, %v294_v2 }
  0x72   :  { %v156_v43 = vmul.f32 %v450_v36, %v299_v3  ;;  %v157_v44 = vmul.f32 %v450_v36, %v310_v7  ;;  %v158_v53 = vmul.f32 %v450_v36, %v317_v10  ;;  %v159_v45 = vmul.f32 %v450_v36, %v324_v13 }
  0x73   :  { %v466_v46 = vrot.slane %v146_v38, %v150_v29  ;;  %v160_v0 = vmul.f32 %v450_v36, %v331_v16  ;;  %v161_v1 = vmul.f32 %v450_v36, %v338_v19  ;;  %v162_v2 = vmul.f32 %v450_v36, %v345_v22 }
  0x74   :  { %v163_v3 = vmul.f32 %v450_v36, %v352_v25  ;;  %v164_v7 = vmul.f32 %v450_v36, %v359_v28  ;;  %v165_v10 = vmul.f32 %v450_v36, %v366_v31  ;;  %v166_v13 = vmul.f32 %v450_v36, %v373_v34 }
  0x75   :  { %v175_v16 = vadd.f32 %v466_v46, %v153_v39  ;;  %v176_v47 = vadd.f32 %v466_v46, %v154_v41  ;;  %v177_v19 = vadd.f32 %v466_v46, %v155_v42  ;;  %v178_v22 = vadd.f32 %v466_v46, %v156_v43 }
  0x76   :  { %v179_v48 = vadd.f32 %v466_v46, %v157_v44  ;;  %v180_v25 = vadd.f32 %v466_v46, %v158_v53  ;;  %v181_v28 = vadd.f32 %v466_v46, %v159_v45  ;;  %v182_v49 = vadd.f32 %v466_v46, %v160_v0 }
  0x77   :  { %vm191_vm1 = vcmp.ge.f32.partialorder %v175_v16, 0.0  ;;  %v207_v31 = vmul.f32 0.2, %v175_v16  ;;  %vm192_vm2 = vcmp.ge.f32.partialorder %v176_v47, 0.0  ;;  %v208_v34 = vmul.f32 0.2, %v176_v47 }
  0x78   :  { %vm193_vm3 = vcmp.ge.f32.partialorder %v177_v19, 0.0  ;;  %v209_v50 = vmul.f32 0.2, %v177_v19  ;;  %vm194_vm4 = vcmp.ge.f32.partialorder %v178_v22, 0.0  ;;  %v210_v51 = vmul.f32 0.2, %v178_v22 }
  0x79   :  { %v223_v52 = vsel %vm191_vm1, %v175_v16, %v207_v31  ;;  %v224_v54 = vsel %vm192_vm2, %v176_v47, %v208_v34  ;;  %vm195_vm5 = vcmp.ge.f32.partialorder %v179_v48, 0.0  ;;  %v211_v55 = vmul.f32 0.2, %v179_v48 }
  0x7a   :  { %239 = vst.msk [vmem:[%s569_s3] sm:$0xff] %vm30_vm0, %v223_v52  ;;  %240 = vst.msk [vmem:[%s569_s3 + $0x8] sm:$0xff] %vm30_vm0, %v224_v54  ;;  %v225_v56 = vsel %vm193_vm3, %v177_v19, %v209_v50  ;;  %v226_v57 = vsel %vm194_vm4, %v178_v22, %v210_v51  ;;  %vm196_vm6 = vcmp.ge.f32.partialorder %v180_v25, 0.0  ;;  %v212_v58 = vmul.f32 0.2, %v180_v25 }
  0x7b   :  { %241 = vst.msk [vmem:[%s569_s3 + $0x10] sm:$0xff] %vm30_vm0, %v225_v56  ;;  %242 = vst.msk [vmem:[%s569_s3 + $0x18] sm:$0xff] %vm30_vm0, %v226_v57  ;;  %v227_v59 = vsel %vm195_vm5, %v179_v48, %v211_v55  ;;  %vm197_vm7 = vcmp.ge.f32.partialorder %v181_v28, 0.0  ;;  %v213_v60 = vmul.f32 0.2, %v181_v28  ;;  %vm198_vm8 = vcmp.ge.f32.partialorder %v182_v49, 0.0 }
  0x7c   :  { %243 = vst.msk [vmem:[%s569_s3 + $0x20] sm:$0xff] %vm30_vm0, %v227_v59  ;;  %v228_v61 = vsel %vm196_vm6, %v180_v25, %v212_v58  ;;  %v214_v62 = vmul.f32 0.2, %v182_v49  ;;  %v183_v63 = vadd.f32 %v466_v46, %v161_v1  ;;  %v184_v4 = vadd.f32 %v466_v46, %v162_v2 }
  0x7d   :  { %244 = vst.msk [vmem:[%s569_s3 + $0x28] sm:$0xff] %vm30_vm0, %v228_v61  ;;  %v229_v5 = vsel %vm197_vm7, %v181_v28, %v213_v60  ;;  %v185_v6 = vadd.f32 %v466_v46, %v163_v3  ;;  %v186_v8 = vadd.f32 %v466_v46, %v164_v7  ;;  %v187_v9 = vadd.f32 %v466_v46, %v165_v10 }
  0x7e   :  { %245 = vst.msk [vmem:[%s569_s3 + $0x30] sm:$0xff] %vm30_vm0, %v229_v5  ;;  %v230_v11 = vsel %vm198_vm8, %v182_v49, %v214_v62  ;;  %vm199_vm9 = vcmp.ge.f32.partialorder %v183_v63, 0.0  ;;  %v215_v12 = vmul.f32 0.2, %v183_v63  ;;  %vm200_vm10 = vcmp.ge.f32.partialorder %v184_v4, 0.0 }
  0x7f   :  { %246 = vst.msk [vmem:[%s569_s3 + $0x38] sm:$0xff] %vm30_vm0, %v230_v11  ;;  %v216_v14 = vmul.f32 0.2, %v184_v4  ;;  %vm201_vm11 = vcmp.ge.f32.partialorder %v185_v6, 0.0  ;;  %v217_v15 = vmul.f32 0.2, %v185_v6  ;;  %v188_v24 = vadd.f32 %v466_v46, %v166_v13 }
  0x80   :  { %vm202_vm12 = vcmp.ge.f32.partialorder %v186_v8, 0.0  ;;  %v231_v17 = vsel %vm199_vm9, %v183_v63, %v215_v12  ;;  %v218_v18 = vmul.f32 0.2, %v186_v8  ;;  %vm203_vm13 = vcmp.ge.f32.partialorder %v187_v9, 0.0 }
  0x81   :  { %v219_v20 = vmul.f32 0.2, %v187_v9  ;;  %247 = vst.msk [vmem:[%s569_s3 + $0x40] sm:$0xff] %vm30_vm0, %v231_v17  ;;  %v232_v21 = vsel %vm200_vm10, %v184_v4, %v216_v14  ;;  %v233_v23 = vsel %vm201_vm11, %v185_v6, %v217_v15  ;;  %v167_v26 = vmul.f32 %v450_v36, %v380_v37 }
  0x82   :  { %248 = vst.msk [vmem:[%s569_s3 + $0x48] sm:$0xff] %vm30_vm0, %v232_v21  ;;  %249 = vst.msk [vmem:[%s569_s3 + $0x50] sm:$0xff] %vm30_vm0, %v233_v23  ;;  %v234_v27 = vsel %vm202_vm12, %v186_v8, %v218_v18  ;;  %v168_v30 = vmul.f32 %v450_v36, %v387_v40  ;;  %vm204_vm14 = vcmp.ge.f32.partialorder %v188_v24, 0.0  ;;  %v220_v37 = vmul.f32 0.2, %v188_v24 }
  0x83   :  { %v235_v29 = vsel %vm203_vm13, %v187_v9, %v219_v20  ;;  %250 = vst.msk [vmem:[%s569_s3 + $0x58] sm:$0xff] %vm30_vm0, %v234_v27  ;;  %v189_v32 = vadd.f32 %v466_v46, %v167_v26 }
  0x84   :  { %251 = vst.msk [vmem:[%s569_s3 + $0x60] sm:$0xff] %vm30_vm0, %v235_v29  ;;  %v190_v33 = vadd.f32 %v466_v46, %v168_v30  ;;  %v236_v35 = vsel %vm204_vm14, %v188_v24, %v220_v37 }
  0x85   :  { %vm205_vm15 = vcmp.ge.f32.partialorder %v189_v32, 0.0  ;;  %v221_v38 = vmul.f32 0.2, %v189_v32  ;;  %252 = vst.msk [vmem:[%s569_s3 + $0x68] sm:$0xff] %vm30_vm0, %v236_v35 }
  0x86   :  { %vm206_vm1 = vcmp.ge.f32.partialorder %v190_v33, 0.0  ;;  %v222_v40 = vmul.f32 0.2, %v190_v33 }
  0x87   :  { %v237_v36 = vsel %vm205_vm15, %v189_v32, %v221_v38 }
  0x88   :  { %253 = vst.msk [vmem:[%s569_s3 + $0x70] sm:$0xff] %vm30_vm0, %v237_v36  ;;  %v238_v39 = vsel %vm206_vm1, %v190_v33, %v222_v40 }
  0x89   :  { %254 = vst.msk [vmem:[%s569_s3 + $0x78] sm:$0xff] %vm30_vm0, %v238_v39 }

// kernel: generator_forward.33
= control target key start
LH: loop header
LB: loop body
LE: loop exit
PB: predicated region body
PF: predicated region fallthrough
CT: control target
= control target key end

     0   :  { %vm100_vm0 = vcmask 523264   ;;  %vm222_vm1 = vcmask 64512   ;;  %s442_s1 = inlined_call_operand.vmem [shape: bf16[64,8], index: 1, kind: input, shape index: {}]   ;;  %s443_s0 = inlined_call_operand.vmem [shape: bf16[128,64], index: 0, kind: input, shape index: {}]   ;;  %s444_s2 = inlined_call_operand.vmem [shape: f32[128,8], index: 2, kind: output, shape index: {}]  }
   0x1   :  { %v307_v0 = vld [vmem:[%s442_s1] sm:$0xff]   ;;  %v308_v1 = vld [vmem:[%s442_s1 + $0x8] sm:$0xff]   ;;  %v309_v2 = vld [vmem:[%s442_s1 + $0x10] sm:$0xff]  }
   0x2   :  { %275 = vmatprep.subr.bf16.mxu0 %v307_v0  ;;  %299 = vmatprep.subr.bf16.mxu1 %v307_v0  ;;  %v311_v3 = vld [vmem:[%s443_s0] sm:$0xff]   ;;  %v310_v5 = vld [vmem:[%s442_s1 + $0x18] sm:$0xff]   ;;  %v313_v6 = vld [vmem:[%s443_s0 + $0x8] sm:$0xff]  }
   0x3   :  { %276 = vmatpush3.bf16.msra.mxu0 %v307_v0  ;;  %303 = vmatpush3.bf16.msra.mxu1 %v307_v0  ;;  %v312_v4 = vld [vmem:[%s443_s0 + $0x20] sm:$0xff]   ;;  %v314_v7 = vld [vmem:[%s443_s0 + $0x28] sm:$0xff]   ;;  %v315_v8 = vld [vmem:[%s443_s0 + $0x10] sm:$0xff]  }
   0x4   :  { %277 = vmatprep.subr.bf16.mxu0 %v308_v1  ;;  %300 = vmatprep.subr.bf16.mxu1 %v308_v1  ;;  %v316_v9 = vld [vmem:[%s443_s0 + $0x30] sm:$0xff]   ;;  %v317_v10 = vld [vmem:[%s443_s0 + $0x18] sm:$0xff]  }
   0x5   :  { %283 = vmatprep.mubr.msk.bf16.mxu0 %vm100_vm0, %v311_v3  ;;  %291 = vmatprep.mubr.msk.bf16.mxu1 %vm100_vm0, %v312_v4  ;;  %v318_v11 = vld [vmem:[%s443_s0 + $0x38] sm:$0xff]  }
   0x7   :  { %278 = vmatpush3.bf16.msra.mxu0 %v308_v1  ;;  %304 = vmatpush3.bf16.msra.mxu1 %v308_v1 }
   0x8   :  { %279 = vmatprep.subr.bf16.mxu0 %v309_v2  ;;  %301 = vmatprep.subr.bf16.mxu1 %v309_v2 }
   0xb   :  { %280 = vmatpush3.bf16.msra.mxu0 %v309_v2  ;;  %305 = vmatpush3.bf16.msra.mxu1 %v309_v2 }
   0xc   :  { %281 = vmatprep.subr.bf16.mxu0 %v310_v5  ;;  %302 = vmatprep.subr.bf16.mxu1 %v310_v5 }
   0xf   :  { %282 = vmatpush3.bf16.msra.mxu0 %v310_v5  ;;  %306 = vmatpush3.bf16.msra.mxu1 %v310_v5 }
  0x12   :  { %284 = vmatmul.mubr.msk.bf16.vlgmr.msra.gmra.mrb[0].mxu0 %vm100_vm0, %v313_v6  ;;  %292 = vmatmul.mubr.msk.bf16.vlgmr.msra.gmra.mrb[0].mxu1 %vm100_vm0, %v314_v7 }
  0x13   :  { %287 = vmatprep.mubr.msk.bf16.mxu0 %vm100_vm0, %v315_v8  ;;  %295 = vmatprep.mubr.msk.bf16.mxu1 %vm100_vm0, %v316_v9 }
  0x1a   :  { %288 = vmatmul.mubr.msk.bf16.gmra.mrb[4].mxu0 %vm100_vm0, %v317_v10  ;;  %296 = vmatmul.mubr.msk.bf16.gmra.mrb[4].mxu1 %vm100_vm0, %v318_v11 }
  0xe5   :  { %v285_v12 = vpop.f32.mrb[0].mxu0  ;;  %v293_v13 = vpop.f32.mrb[0].mxu1 }
  0xe6   :  { %225 = vst.msk [vmem:[%s444_s2 + $0x10] sm:$0xff] %vm222_vm1, %v285_v12  ;;  %233 = vst.msk [vmem:[%s444_s2 + $0x50] sm:$0xff] %vm222_vm1, %v293_v13  ;;  %v159_v14 = vpop.f32.mrb[1].mxu0  ;;  %v191_v15 = vpop.f32.mrb[1].mxu1 }
  0xe7   :  { %223 = vst.msk [vmem:[%s444_s2] sm:$0xff] %vm222_vm1, %v159_v14  ;;  %231 = vst.msk [vmem:[%s444_s2 + $0x40] sm:$0xff] %vm222_vm1, %v191_v15  ;;  %v286_v16 = vpop.f32.mrb[2].mxu0  ;;  %v294_v17 = vpop.f32.mrb[2].mxu1 }
  0xe8   :  { %226 = vst.msk [vmem:[%s444_s2 + $0x18] sm:$0xff] %vm222_vm1, %v286_v16  ;;  %234 = vst.msk [vmem:[%s444_s2 + $0x58] sm:$0xff] %vm222_vm1, %v294_v17  ;;  %v162_v18 = vpop.f32.mrb[3].mxu0  ;;  %v194_v19 = vpop.f32.mrb[3].mxu1 }
  0xe9   :  { %224 = vst.msk [vmem:[%s444_s2 + $0x8] sm:$0xff] %vm222_vm1, %v162_v18  ;;  %232 = vst.msk [vmem:[%s444_s2 + $0x48] sm:$0xff] %vm222_vm1, %v194_v19 }
  0xed   :  { %v289_v20 = vpop.f32.mrb[4].mxu0  ;;  %v297_v21 = vpop.f32.mrb[4].mxu1 }
  0xee   :  { %229 = vst.msk [vmem:[%s444_s2 + $0x30] sm:$0xff] %vm222_vm1, %v289_v20  ;;  %237 = vst.msk [vmem:[%s444_s2 + $0x70] sm:$0xff] %vm222_vm1, %v297_v21  ;;  %v175_v22 = vpop.f32.mrb[5].mxu0  ;;  %v207_v23 = vpop.f32.mrb[5].mxu1 }
  0xef   :  { %227 = vst.msk [vmem:[%s444_s2 + $0x20] sm:$0xff] %vm222_vm1, %v175_v22  ;;  %235 = vst.msk [vmem:[%s444_s2 + $0x60] sm:$0xff] %vm222_vm1, %v207_v23  ;;  %v290_v24 = vpop.f32.mrb[6].mxu0  ;;  %v298_v25 = vpop.f32.mrb[6].mxu1 }
  0xf0   :  { %230 = vst.msk [vmem:[%s444_s2 + $0x38] sm:$0xff] %vm222_vm1, %v290_v24  ;;  %238 = vst.msk [vmem:[%s444_s2 + $0x78] sm:$0xff] %vm222_vm1, %v298_v25  ;;  %v178_v26 = vpop.f32.mrb[7].mxu0  ;;  %v210_v27 = vpop.f32.mrb[7].mxu1 }
  0xf1   :  { %228 = vst.msk [vmem:[%s444_s2 + $0x28] sm:$0xff] %vm222_vm1, %v178_v26  ;;  %236 = vst.msk [vmem:[%s444_s2 + $0x68] sm:$0xff] %vm222_vm1, %v210_v27 }

// kernel: generator_forward.37
= control target key start
LH: loop header
LB: loop body
LE: loop exit
PB: predicated region body
PF: predicated region fallthrough
CT: control target
= control target key end

     0   :  { %vm78_vm0 = vcmask 64512   ;;  %s2159_s0 = inlined_call_operand.vmem [shape: f32[512,8], index: 0, kind: input, shape index: {}]   ;;  %s2160_s1 = inlined_call_operand.vmem [shape: f32[1,8], index: 1, kind: input, shape index: {}]   ;;  %s2161_s2 = inlined_call_operand.vmem [shape: f32[1,8], index: 2, kind: input, shape index: {}]   ;;  %s2162_s3 = inlined_call_operand.vmem [shape: f32[512,8], index: 3, kind: output, shape index: {}]  }
   0x1   :  { %v958_v0 = vld [vmem:[%s2159_s0] sm:$0xff]  ;;  %v963_v1 = vld [vmem:[%s2159_s0 + $0x8] sm:$0xff]  ;;  %v968_v2 = vld [vmem:[%s2159_s0 + $0x10] sm:$0xff] }
   0x2   :  { %2183 = vst [vmem:[#allocation2_spill] sm:$0xff] %v963_v1  ;;  %2184 = vst [vmem:[#allocation3_spill] sm:$0xff] %v968_v2  ;;  %v973_v3 = vld [vmem:[%s2159_s0 + $0x18] sm:$0xff]  ;;  %v79_v4 = vsel %vm78_vm0, %v958_v0, 0.0  ;;  %v80_v5 = vsel %vm78_vm0, %v963_v1, 0.0  ;;  %v82_v6 = vsel %vm78_vm0, %v968_v2, 0.0 }
   0x3   :  { %2185 = vst [vmem:[#allocation4_spill] sm:$0xff] %v973_v3  ;;  %v984_v7 = vld [vmem:[%s2159_s0 + $0x20] sm:$0xff]  ;;  %v81_v8 = vadd.f32 %v80_v5, %v79_v4  ;;  %v84_v9 = vsel %vm78_vm0, %v973_v3, 0.0  ;;  %v991_v10 = vld [vmem:[%s2159_s0 + $0x28] sm:$0xff]  ;;  %v998_v13 = vld [vmem:[%s2159_s0 + $0x30] sm:$0xff] }
   0x4   :  { %2186 = vst [vmem:[#allocation5_spill] sm:$0xff] %v984_v7  ;;  %2187 = vst [vmem:[#allocation6_spill] sm:$0xff] %v991_v10  ;;  %v86_v12 = vsel %vm78_vm0, %v984_v7, 0.0  ;;  %v88_v15 = vsel %vm78_vm0, %v991_v10, 0.0  ;;  %v1005_v16 = vld [vmem:[%s2159_s0 + $0x38] sm:$0xff]  ;;  %v90_v18 = vsel %vm78_vm0, %v998_v13, 0.0 }
   0x5   :  { %v83_v11 = vadd.f32 %v82_v6, %v81_v8  ;;  %2188 = vst [vmem:[#allocation7_spill] sm:$0xff] %v998_v13  ;;  %v1012_v19 = vld [vmem:[%s2159_s0 + $0x40] sm:$0xff]  ;;  %v92_v21 = vsel %vm78_vm0, %v1005_v16, 0.0  ;;  %v1019_v22 = vld [vmem:[%s2159_s0 + $0x48] sm:$0xff]  ;;  %v1026_v25 = vld [vmem:[%s2159_s0 + $0x50] sm:$0xff] }
   0x6   :  { %v94_v24 = vsel %vm78_vm0, %v1012_v19, 0.0  ;;  %v96_v27 = vsel %vm78_vm0, %v1019_v22, 0.0  ;;  %v1033_v28 = vld [vmem:[%s2159_s0 + $0x58] sm:$0xff]  ;;  %v98_v30 = vsel %vm78_vm0, %v1026_v25, 0.0  ;;  %v1040_v31 = vld [vmem:[%s2159_s0 + $0x60] sm:$0xff]  ;;  %v1047_v34 = vld [vmem:[%s2159_s0 + $0x68] sm:$0xff] }
   0x7   :  { %v85_v14 = vadd.f32 %v84_v9, %v83_v11  ;;  %v100_v33 = vsel %vm78_vm0, %v1033_v28, 0.0  ;;  %v102_v36 = vsel %vm78_vm0, %v1040_v31, 0.0  ;;  %v1054_v37 = vld [vmem:[%s2159_s0 + $0x70] sm:$0xff]  ;;  %v104_v39 = vsel %vm78_vm0, %v1047_v34, 0.0  ;;  %v1061_v40 = vld [vmem:[%s2159_s0 + $0x78] sm:$0xff]  ;;  %v1068_v43 = vld [vmem:[%s2159_s0 + $0x80] sm:$0xff] }
   0x8   :  { %v106_v42 = vsel %vm78_vm0, %v1054_v37, 0.0  ;;  %v108_v45 = vsel %vm78_vm0, %v1061_v40, 0.0  ;;  %v1075_v46 = vld [vmem:[%s2159_s0 + $0x88] sm:$0xff]  ;;  %v110_v48 = vsel %vm78_vm0, %v1068_v43, 0.0  ;;  %v1082_v49 = vld [vmem:[%s2159_s0 + $0x90] sm:$0xff]  ;;  %v1089_v52 = vld [vmem:[%s2159_s0 + $0x98] sm:$0xff] }
   0x9   :  { %v87_v17 = vadd.f32 %v86_v12, %v85_v14  ;;  %v112_v51 = vsel %vm78_vm0, %v1075_v46, 0.0  ;;  %v114_v54 = vsel %vm78_vm0, %v1082_v49, 0.0  ;;  %v1096_v55 = vld [vmem:[%s2159_s0 + $0xa0] sm:$0xff]  ;;  %v116_v57 = vsel %vm78_vm0, %v1089_v52, 0.0  ;;  %v1103_v58 = vld [vmem:[%s2159_s0 + $0xa8] sm:$0xff]  ;;  %v1110_v61 = vld [vmem:[%s2159_s0 + $0xb0] sm:$0xff] }
   0xa   :  { %v118_v60 = vsel %vm78_vm0, %v1096_v55, 0.0  ;;  %v120_v63 = vsel %vm78_vm0, %v1103_v58, 0.0  ;;  %v1117_v4 = vld [vmem:[%s2159_s0 + $0xb8] sm:$0xff]  ;;  %v122_v6 = vsel %vm78_vm0, %v1110_v61, 0.0  ;;  %v1124_v8 = vld [vmem:[%s2159_s0 + $0xc0] sm:$0xff]  ;;  %v1131_v12 = vld [vmem:[%s2159_s0 + $0xc8] sm:$0xff] }
   0xb   :  { %v89_v20 = vadd.f32 %v88_v15, %v87_v17  ;;  %v124_v11 = vsel %vm78_vm0, %v1117_v4, 0.0  ;;  %v126_v15 = vsel %vm78_vm0, %v1124_v8, 0.0  ;;  %v1138_v17 = vld [vmem:[%s2159_s0 + $0xd0] sm:$0xff] }
   0xd   :  { %v91_v23 = vadd.f32 %v90_v18, %v89_v20  ;;  %v128_v20 = vsel %vm78_vm0, %v1131_v12, 0.0 }
   0xf   :  { %v93_v26 = vadd.f32 %v92_v21, %v91_v23  ;;  %v1145_v21 = vld [vmem:[%s2159_s0 + $0xd8] sm:$0xff] }
  0x11   :  { %v95_v29 = vadd.f32 %v94_v24, %v93_v26  ;;  %v130_v24 = vsel %vm78_vm0, %v1138_v17, 0.0  ;;  %v1152_v26 = vld [vmem:[%s2159_s0 + $0xe0] sm:$0xff] }
  0x13   :  { %v97_v32 = vadd.f32 %v96_v27, %v95_v29  ;;  %v132_v29 = vsel %vm78_vm0, %v1145_v21, 0.0 }
  0x15   :  { %v99_v35 = vadd.f32 %v98_v30, %v97_v32  ;;  %v1159_v30 = vld [vmem:[%s2159_s0 + $0xe8] sm:$0xff] }
  0x17   :  { %v101_v38 = vadd.f32 %v100_v33, %v99_v35  ;;  %v134_v33 = vsel %vm78_vm0, %v1152_v26, 0.0  ;;  %v1166_v35 = vld [vmem:[%s2159_s0 + $0xf0] sm:$0xff] }
  0x19   :  { %v103_v41 = vadd.f32 %v102_v36, %v101_v38  ;;  %v136_v38 = vsel %vm78_vm0, %v1159_v30, 0.0 }
  0x1b   :  { %v105_v44 = vadd.f32 %v104_v39, %v103_v41  ;;  %v1173_v39 = vld [vmem:[%s2159_s0 + $0xf8] sm:$0xff] }
  0x1d   :  { %v107_v47 = vadd.f32 %v106_v42, %v105_v44  ;;  %v138_v42 = vsel %vm78_vm0, %v1166_v35, 0.0  ;;  %v1180_v44 = vld [vmem:[%s2159_s0 + $0x100] sm:$0xff] }
  0x1f   :  { %v109_v50 = vadd.f32 %v108_v45, %v107_v47  ;;  %v140_v47 = vsel %vm78_vm0, %v1173_v39, 0.0 }
  0x21   :  { %v111_v53 = vadd.f32 %v110_v48, %v109_v50  ;;  %v1187_v48 = vld [vmem:[%s2159_s0 + $0x108] sm:$0xff] }
  0x23   :  { %v113_v56 = vadd.f32 %v112_v51, %v111_v53  ;;  %v142_v51 = vsel %vm78_vm0, %v1180_v44, 0.0  ;;  %v1194_v53 = vld [vmem:[%s2159_s0 + $0x110] sm:$0xff] }
  0x25   :  { %v115_v59 = vadd.f32 %v114_v54, %v113_v56  ;;  %v144_v56 = vsel %vm78_vm0, %v1187_v48, 0.0 }
  0x27   :  { %v117_v62 = vadd.f32 %v116_v57, %v115_v59  ;;  %v1201_v57 = vld [vmem:[%s2159_s0 + $0x118] sm:$0xff] }
  0x29   :  { %v119_v5 = vadd.f32 %v118_v60, %v117_v62  ;;  %v146_v60 = vsel %vm78_vm0, %v1194_v53, 0.0  ;;  %v1208_v62 = vld [vmem:[%s2159_s0 + $0x120] sm:$0xff] }
  0x2b   :  { %v121_v9 = vadd.f32 %v120_v63, %v119_v5  ;;  %v148_v5 = vsel %vm78_vm0, %v1201_v57, 0.0 }
  0x2d   :  { %v123_v14 = vadd.f32 %v122_v6, %v121_v9  ;;  %v1215_v6 = vld [vmem:[%s2159_s0 + $0x128] sm:$0xff] }
  0x2f   :  { %v125_v18 = vadd.f32 %v124_v11, %v123_v14  ;;  %v150_v11 = vsel %vm78_vm0, %v1208_v62, 0.0  ;;  %v1222_v14 = vld [vmem:[%s2159_s0 + $0x130] sm:$0xff] }
  0x31   :  { %v127_v23 = vadd.f32 %v126_v15, %v125_v18  ;;  %v152_v18 = vsel %vm78_vm0, %v1215_v6, 0.0 }
  0x33   :  { %v129_v27 = vadd.f32 %v128_v20, %v127_v23  ;;  %v1229_v20 = vld [vmem:[%s2159_s0 + $0x138] sm:$0xff] }
  0x35   :  { %v131_v32 = vadd.f32 %v130_v24, %v129_v27  ;;  %v154_v24 = vsel %vm78_vm0, %v1222_v14, 0.0  ;;  %v1236_v27 = vld [vmem:[%s2159_s0 + $0x140] sm:$0xff] }
  0x37   :  { %v133_v36 = vadd.f32 %v132_v29, %v131_v32  ;;  %v156_v32 = vsel %vm78_vm0, %v1229_v20, 0.0 }
  0x39   :  { %v135_v41 = vadd.f32 %v134_v33, %v133_v36  ;;  %v1243_v33 = vld [vmem:[%s2159_s0 + $0x148] sm:$0xff] }
  0x3b   :  { %v137_v45 = vadd.f32 %v136_v38, %v135_v41  ;;  %v158_v38 = vsel %vm78_vm0, %v1236_v27, 0.0  ;;  %v1250_v41 = vld [vmem:[%s2159_s0 + $0x150] sm:$0xff] }
  0x3d   :  { %v139_v50 = vadd.f32 %v138_v42, %v137_v45  ;;  %v160_v45 = vsel %vm78_vm0, %v1243_v33, 0.0 }
  0x3f   :  { %v141_v54 = vadd.f32 %v140_v47, %v139_v50  ;;  %v1257_v47 = vld [vmem:[%s2159_s0 + $0x158] sm:$0xff] }
  0x41   :  { %v143_v59 = vadd.f32 %v142_v51, %v141_v54  ;;  %v162_v51 = vsel %vm78_vm0, %v1250_v41, 0.0  ;;  %v1264_v54 = vld [vmem:[%s2159_s0 + $0x160] sm:$0xff] }
  0x43   :  { %v145_v63 = vadd.f32 %v144_v56, %v143_v59  ;;  %v164_v59 = vsel %vm78_vm0, %v1257_v47, 0.0 }
  0x45   :  { %v147_v9 = vadd.f32 %v146_v60, %v145_v63  ;;  %v1271_v60 = vld [vmem:[%s2159_s0 + $0x168] sm:$0xff] }
  0x47   :  { %v149_v15 = vadd.f32 %v148_v5, %v147_v9  ;;  %v166_v5 = vsel %vm78_vm0, %v1264_v54, 0.0  ;;  %v1278_v9 = vld [vmem:[%s2159_s0 + $0x170] sm:$0xff] }
  0x49   :  { %v151_v23 = vadd.f32 %v150_v11, %v149_v15  ;;  %v168_v15 = vsel %vm78_vm0, %v1271_v60, 0.0 }
  0x4b   :  { %v153_v29 = vadd.f32 %v152_v18, %v151_v23  ;;  %v1285_v18 = vld [vmem:[%s2159_s0 + $0x178] sm:$0xff] }
  0x4d   :  { %v155_v36 = vadd.f32 %v154_v24, %v153_v29  ;;  %v170_v24 = vsel %vm78_vm0, %v1278_v9, 0.0  ;;  %v1292_v29 = vld [vmem:[%s2159_s0 + $0x180] sm:$0xff] }
  0x4f   :  { %v157_v42 = vadd.f32 %v156_v32, %v155_v36  ;;  %v172_v36 = vsel %vm78_vm0, %v1285_v18, 0.0 }
  0x51   :  { %v159_v50 = vadd.f32 %v158_v38, %v157_v42  ;;  %v1299_v38 = vld [vmem:[%s2159_s0 + $0x188] sm:$0xff] }
  0x52   :  { %2189 = vst [vmem:[#allocation8_spill] sm:$0xff] %v1299_v38 }
  0x53   :  { %v161_v56 = vadd.f32 %v160_v45, %v159_v50  ;;  %v174_v45 = vsel %vm78_vm0, %v1292_v29, 0.0  ;;  %v1306_v50 = vld [vmem:[%s2159_s0 + $0x190] sm:$0xff] }
  0x54   :  { %2190 = vst [vmem:[#allocation9_spill] sm:$0xff] %v1306_v50 }
  0x55   :  { %v163_v63 = vadd.f32 %v162_v51, %v161_v56  ;;  %v176_v56 = vsel %vm78_vm0, %v1299_v38, 0.0 }
  0x57   :  { %v165_v11 = vadd.f32 %v164_v59, %v163_v63  ;;  %v1313_v59 = vld [vmem:[%s2159_s0 + $0x198] sm:$0xff] }
  0x58   :  { %2191 = vst [vmem:[#allocation10_spill] sm:$0xff] %v1313_v59 }
  0x59   :  { %v167_v23 = vadd.f32 %v166_v5, %v165_v11  ;;  %v178_v5 = vsel %vm78_vm0, %v1306_v50, 0.0  ;;  %v1320_v11 = vld [vmem:[%s2159_s0 + $0x1a0] sm:$0xff] }
  0x5a   :  { %2192 = vst [vmem:[#allocation11_spill] sm:$0xff] %v1320_v11 }
  0x5b   :  { %v169_v32 = vadd.f32 %v168_v15, %v167_v23  ;;  %v180_v23 = vsel %vm78_vm0, %v1313_v59, 0.0 }
  0x5d   :  { %v171_v42 = vadd.f32 %v170_v24, %v169_v32  ;;  %v1327_v24 = vld [vmem:[%s2159_s0 + $0x1a8] sm:$0xff] }
  0x5e   :  { %2193 = vst [vmem:[#allocation12_spill] sm:$0xff] %v1327_v24 }
  0x5f   :  { %v173_v51 = vadd.f32 %v172_v36, %v171_v42  ;;  %v182_v36 = vsel %vm78_vm0, %v1320_v11, 0.0  ;;  %v1334_v42 = vld [vmem:[%s2159_s0 + $0x1b0] sm:$0xff] }
  0x60   :  { %2194 = vst [vmem:[#allocation13_spill] sm:$0xff] %v1334_v42 }
  0x61   :  { %v175_v63 = vadd.f32 %v174_v45, %v173_v51  ;;  %v184_v51 = vsel %vm78_vm0, %v1327_v24, 0.0 }
  0x63   :  { %v177_v15 = vadd.f32 %v176_v56, %v175_v63  ;;  %v1341_v56 = vld [vmem:[%s2159_s0 + $0x1b8] sm:$0xff] }
  0x64   :  { %2195 = vst [vmem:[#allocation14_spill] sm:$0xff] %v1341_v56 }
  0x65   :  { %v179_v32 = vadd.f32 %v178_v5, %v177_v15  ;;  %v186_v5 = vsel %vm78_vm0, %v1334_v42, 0.0  ;;  %v1348_v15 = vld [vmem:[%s2159_s0 + $0x1c0] sm:$0xff] }
  0x66   :  { %2196 = vst [vmem:[#allocation15_spill] sm:$0xff] %v1348_v15 }
  0x67   :  { %v181_v45 = vadd.f32 %v180_v23, %v179_v32  ;;  %v188_v23 = vsel %vm78_vm0, %v1341_v56, 0.0  ;;  %v1355_v32 = vld [vmem:[%s2159_s0 + $0x1c8] sm:$0xff] }
  0x68   :  { %2197 = vst [vmem:[#allocation16_spill] sm:$0xff] %v1355_v32 }
  0x69   :  { %v183_v63 = vadd.f32 %v182_v36, %v181_v45  ;;  %v190_v36 = vsel %vm78_vm0, %v1348_v15, 0.0  ;;  %v1362_v45 = vld [vmem:[%s2159_s0 + $0x1d0] sm:$0xff] }
  0x6a   :  { %2198 = vst [vmem:[#allocation17_spill] sm:$0xff] %v1362_v45 }
  0x6b   :  { %v185_v11 = vadd.f32 %v184_v51, %v183_v63  ;;  %v192_v51 = vsel %vm78_vm0, %v1355_v32, 0.0  ;;  %v1369_v63 = vld [vmem:[%s2159_s0 + $0x1d8] sm:$0xff] }
  0x6c   :  { %2199 = vst [vmem:[#allocation18_spill] sm:$0xff] %v1369_v63  ;;  %v196_v15 = vsel %vm78_vm0, %v1369_v63, 0.0 }
  0x6d   :  { %v187_v24 = vadd.f32 %v186_v5, %v185_v11  ;;  %v194_v11 = vsel %vm78_vm0, %v1362_v45, 0.0 }
  0x6f   :  { %v189_v42 = vadd.f32 %v188_v23, %v187_v24  ;;  %v1378_v24 = vld [vmem:[%s2159_s0 + $0x1e0] sm:$0xff] }
  0x70   :  { %2200 = vst [vmem:[#allocation19_spill] sm:$0xff] %v1378_v24  ;;  %v198_v59 = vsel %vm78_vm0, %v1378_v24, 0.0 }
  0x71   :  { %v191_v56 = vadd.f32 %v190_v36, %v189_v42  ;;  %v1385_v42 = vld [vmem:[%s2159_s0 + $0x1e8] sm:$0xff] }
  0x72   :  { %2201 = vst [vmem:[#allocation20_spill] sm:$0xff] %v1385_v42 }
  0x73   :  { %v193_v5 = vadd.f32 %v192_v51, %v191_v56  ;;  %v200_v56 = vsel %vm78_vm0, %v1385_v42, 0.0  ;;  %v1392_v51 = vld [vmem:[%s2159_s0 + $0x1f0] sm:$0xff] }
  0x74   :  { %2202 = vst [vmem:[#allocation21_spill] sm:$0xff] %v1392_v51 }
  0x75   :  { %v195_v23 = vadd.f32 %v194_v11, %v193_v5  ;;  %v1399_v11 = vld [vmem:[%s2159_s0 + $0x1f8] sm:$0xff] }
  0x77   :  { %v197_v32 = vadd.f32 %v196_v15, %v195_v23  ;;  %v202_v15 = vsel %vm78_vm0, %v1392_v51, 0.0 }
  0x79   :  { %v199_v36 = vadd.f32 %v198_v59, %v197_v32  ;;  %v204_v59 = vsel %vm78_vm0, %v1399_v11, 0.0 }
  0x7b   :  { %v201_v63 = vadd.f32 %v200_v56, %v199_v36 }
  0x7d   :  { %v203_v5 = vadd.f32 %v202_v15, %v201_v63 }
  0x7f   :  { %v205_v32 = vadd.f32 %v204_v59, %v203_v5 }
  0x81   :  { %v206_v23 = vrot.slane %v205_v32, 4 }
  0x83   :  { %v207_v42 = vadd.f32 %v206_v23, %v205_v32 }
  0x85   :  { %v208_v24 = vrot.slane %v207_v42, 2 }
  0x87   :  { %v209_v45 = vadd.f32 %v208_v24, %v207_v42 }
  0x89   :  { %v210_v50 = vrot.slane %v209_v45, 1 }
  0x8b   :  { %v211_v38 = vadd.f32 %v210_v50, %v209_v45 }
  0x8d   :  { %v1403_v36 = vmul.f32 0.001953125, %v211_v38 }
  0x8f   :  { %v214_v56 = vsub.f32 %v958_v0, %v1403_v36  ;;  %v215_v51 = vsub.f32 %v963_v1, %v1403_v36  ;;  %v216_v63 = vsub.f32 %v968_v2, %v1403_v36  ;;  %v217_v15 = vsub.f32 %v973_v3, %v1403_v36 }
  0x90   :  { %v218_v5 = vsub.f32 %v984_v7, %v1403_v36  ;;  %v219_v38 = vsub.f32 %v991_v10, %v1403_v36  ;;  %v220_v59 = vsub.f32 %v998_v13, %v1403_v36 }
  0x91   :  { %v278_v24 = vmul.f32 %v214_v56, %v214_v56  ;;  %v279_v42 = vmul.f32 %v215_v51, %v215_v51  ;;  %v280_v50 = vmul.f32 %v216_v63, %v216_v63  ;;  %v281_v45 = vmul.f32 %v217_v15, %v217_v15 }
  0x92   :  { %v282_v32 = vmul.f32 %v218_v5, %v218_v5  ;;  %v221_v56 = vsub.f32 %v1005_v16, %v1403_v36  ;;  %v283_v51 = vmul.f32 %v219_v38, %v219_v38  ;;  %v222_v15 = vsub.f32 %v1012_v19, %v1403_v36 }
  0x93   :  { %v342_v23 = vsel %vm78_vm0, %v278_v24, 0.0  ;;  %v343_v2 = vsel %vm78_vm0, %v279_v42, 0.0  ;;  %v345_v3 = vsel %vm78_vm0, %v280_v50, 0.0  ;;  %v347_v63 = vsel %vm78_vm0, %v281_v45, 0.0 }
  0x94   :  { %v344_v1 = vadd.f32 %v343_v2, %v342_v23  ;;  %v284_v10 = vmul.f32 %v220_v59, %v220_v59  ;;  %v349_v5 = vsel %vm78_vm0, %v282_v32, 0.0  ;;  %v223_v24 = vsub.f32 %v1019_v22, %v1403_v36 }
  0x95   :  { %v285_v42 = vmul.f32 %v221_v56, %v221_v56  ;;  %v351_v2 = vsel %vm78_vm0, %v283_v51, 0.0  ;;  %v224_v38 = vsub.f32 %v1026_v25, %v1403_v36  ;;  %v286_v23 = vmul.f32 %v222_v15, %v222_v15 }
  0x96   :  { %v346_v7 = vadd.f32 %v345_v3, %v344_v1  ;;  %v353_v1 = vsel %vm78_vm0, %v284_v10, 0.0  ;;  %v225_v45 = vsub.f32 %v1033_v28, %v1403_v36  ;;  %v287_v59 = vmul.f32 %v223_v24, %v223_v24 }
  0x97   :  { %v226_v56 = vsub.f32 %v1040_v31, %v1403_v36  ;;  %v227_v15 = vsub.f32 %v1047_v34, %v1403_v36  ;;  %v228_v24 = vsub.f32 %v1054_v37, %v1403_v36  ;;  %v231_v37 = vsub.f32 %v1075_v46, %v1403_v36 }
  0x98   :  { %v348_v13 = vadd.f32 %v347_v63, %v346_v7  ;;  %v355_v7 = vsel %vm78_vm0, %v285_v42, 0.0  ;;  %v288_v63 = vmul.f32 %v224_v38, %v224_v38  ;;  %v359_v10 = vsel %vm78_vm0, %v287_v59, 0.0 }
  0x99   :  { %v229_v38 = vsub.f32 %v1061_v40, %v1403_v36  ;;  %v232_v40 = vsub.f32 %v1082_v49, %v1403_v36  ;;  %v234_v46 = vsub.f32 %v1096_v55, %v1403_v36  ;;  %v235_v49 = vsub.f32 %v1103_v58, %v1403_v36 }
  0x9a   :  { %v350_v50 = vadd.f32 %v349_v5, %v348_v13  ;;  %v357_v13 = vsel %vm78_vm0, %v286_v23, 0.0  ;;  %v289_v5 = vmul.f32 %v225_v45, %v225_v45  ;;  %v361_v42 = vsel %vm78_vm0, %v288_v63, 0.0 }
  0x9b   :  { %v230_v45 = vsub.f32 %v1068_v43, %v1403_v36  ;;  %v233_v43 = vsub.f32 %v1089_v52, %v1403_v36  ;;  %v236_v52 = vsub.f32 %v1110_v61, %v1403_v36  ;;  %v237_v55 = vsub.f32 %v1117_v4, %v1403_v36 }
  0x9c   :  { %v352_v3 = vadd.f32 %v351_v2, %v350_v50  ;;  %v290_v50 = vmul.f32 %v226_v56, %v226_v56  ;;  %v363_v23 = vsel %vm78_vm0, %v289_v5, 0.0  ;;  %v293_v56 = vmul.f32 %v229_v38, %v229_v38 }
  0x9d   :  { %v238_v58 = vsub.f32 %v1124_v8, %v1403_v36  ;;  %v239_v61 = vsub.f32 %v1131_v12, %v1403_v36  ;;  %v240_v4 = vsub.f32 %v1138_v17, %v1403_v36  ;;  %v241_v8 = vsub.f32 %v1145_v21, %v1403_v36 }
  0x9e   :  { %v354_v32 = vadd.f32 %v353_v1, %v352_v3  ;;  %v291_v3 = vmul.f32 %v227_v15, %v227_v15  ;;  %v365_v59 = vsel %vm78_vm0, %v290_v50, 0.0  ;;  %v294_v15 = vmul.f32 %v230_v45, %v230_v45 }
  0x9f   :  { %v298_v45 = vmul.f32 %v234_v46, %v234_v46  ;;  %v242_v12 = vsub.f32 %v1152_v26, %v1403_v36  ;;  %v243_v17 = vsub.f32 %v1159_v30, %v1403_v36  ;;  %v244_v21 = vsub.f32 %v1166_v35, %v1403_v36 }
  0xa0   :  { %v356_v51 = vadd.f32 %v355_v7, %v354_v32  ;;  %v292_v32 = vmul.f32 %v228_v24, %v228_v24  ;;  %v367_v63 = vsel %vm78_vm0, %v291_v3, 0.0  ;;  %v371_v24 = vsel %vm78_vm0, %v293_v56, 0.0 }
  0xa1   :  { %v297_v3 = vmul.f32 %v233_v43, %v233_v43  ;;  %v302_v43 = vmul.f32 %v238_v58, %v238_v58  ;;  %v245_v26 = vsub.f32 %v1173_v39, %v1403_v36  ;;  %v246_v30 = vsub.f32 %v1180_v44, %v1403_v36 }
  0xa2   :  { %v358_v2 = vadd.f32 %v357_v13, %v356_v51  ;;  %v369_v5 = vsel %vm78_vm0, %v292_v32, 0.0  ;;  %v247_v35 = vsub.f32 %v1187_v48, %v1403_v36  ;;  %v248_v39 = vsub.f32 %v1194_v53, %v1403_v36 }
  0xa3   :  { %v249_v44 = vsub.f32 %v1201_v57, %v1403_v36  ;;  %v250_v48 = vsub.f32 %v1208_v62, %v1403_v36  ;;  %v251_v53 = vsub.f32 %v1215_v6, %v1403_v36  ;;  %v252_v57 = vsub.f32 %v1222_v14, %v1403_v36 }
  0xa4   :  { %v360_v1 = vadd.f32 %v359_v10, %v358_v2  ;;  %v295_v2 = vmul.f32 %v231_v37, %v231_v37  ;;  %v379_v37 = vsel %vm78_vm0, %v297_v3, 0.0  ;;  %v305_v3 = vmul.f32 %v241_v8, %v241_v8 }
  0xa5   :  { %v253_v62 = vsub.f32 %v1229_v20, %v1403_v36  ;;  %v254_v6 = vsub.f32 %v1236_v27, %v1403_v36  ;;  %v255_v14 = vsub.f32 %v1243_v33, %v1403_v36  ;;  %v256_v20 = vsub.f32 %v1250_v41, %v1403_v36 }
  0xa6   :  { %v362_v7 = vadd.f32 %v361_v42, %v360_v1  ;;  %v296_v42 = vmul.f32 %v232_v40, %v232_v40  ;;  %v373_v1 = vsel %vm78_vm0, %v294_v15, 0.0  ;;  %v301_v15 = vmul.f32 %v237_v55, %v237_v55 }
  0xa7   :  { %v395_v55 = vsel %vm78_vm0, %v305_v3, 0.0  ;;  %v257_v27 = vsub.f32 %v1257_v47, %v1403_v36  ;;  %v258_v33 = vsub.f32 %v1264_v54, %v1403_v36  ;;  %v259_v41 = vsub.f32 %v1271_v60, %v1403_v36 }
  0xa8   :  { %v364_v13 = vadd.f32 %v363_v23, %v362_v7  ;;  %v375_v23 = vsel %vm78_vm0, %v295_v2, 0.0  ;;  %v377_v32 = vsel %vm78_vm0, %v296_v42, 0.0  ;;  %v387_v46 = vsel %vm78_vm0, %v301_v15, 0.0 }
  0xa9   :  { %v260_v47 = vsub.f32 %v1278_v9, %v1403_v36  ;;  %v261_v54 = vsub.f32 %v1285_v18, %v1403_v36  ;;  %v262_v60 = vsub.f32 %v1292_v29, %v1403_v36  ;;  %v2203_v9 = vld [vmem:[#allocation8_spill] sm:$0xff]  ;;  %v2204_v18 = vld [vmem:[#allocation9_spill] sm:$0xff]  ;;  %v2205_v29 = vld [vmem:[#allocation10_spill] sm:$0xff] }
  0xaa   :  { %v366_v51 = vadd.f32 %v365_v59, %v364_v13  ;;  %v299_v13 = vmul.f32 %v235_v49, %v235_v49 }
  0xac   :  { %v368_v10 = vadd.f32 %v367_v63, %v366_v51  ;;  %v300_v63 = vmul.f32 %v236_v52, %v236_v52  ;;  %v381_v51 = vsel %vm78_vm0, %v298_v45, 0.0  ;;  %v306_v52 = vmul.f32 %v242_v12, %v242_v12 }
  0xad   :  { %v314_v12 = vmul.f32 %v250_v48, %v250_v48 }
  0xae   :  { %v370_v50 = vadd.f32 %v369_v5, %v368_v10  ;;  %v383_v5 = vsel %vm78_vm0, %v299_v13, 0.0  ;;  %v385_v2 = vsel %vm78_vm0, %v300_v63, 0.0  ;;  %v309_v63 = vmul.f32 %v245_v26, %v245_v26 }
  0xaf   :  { %v318_v26 = vmul.f32 %v254_v6, %v254_v6 }
  0xb0   :  { %v372_v38 = vadd.f32 %v371_v24, %v370_v50  ;;  %v303_v50 = vmul.f32 %v239_v61, %v239_v61  ;;  %v310_v61 = vmul.f32 %v246_v30, %v246_v30 }
  0xb2   :  { %v374_v7 = vadd.f32 %v373_v1, %v372_v38  ;;  %v304_v1 = vmul.f32 %v240_v4, %v240_v4  ;;  %v389_v38 = vsel %vm78_vm0, %v302_v43, 0.0  ;;  %v403_v4 = vsel %vm78_vm0, %v309_v63, 0.0 }
  0xb3   :  { %v321_v63 = vmul.f32 %v257_v27, %v257_v27  ;;  %v2209_v27 = vld [vmem:[#allocation14_spill] sm:$0xff] }
  0xb4   :  { %v376_v59 = vadd.f32 %v375_v23, %v374_v7  ;;  %v391_v23 = vsel %vm78_vm0, %v303_v50, 0.0  ;;  %v393_v45 = vsel %vm78_vm0, %v304_v1, 0.0  ;;  %v313_v50 = vmul.f32 %v249_v44, %v249_v44 }
  0xb5   :  { %v427_v44 = vsel %vm78_vm0, %v321_v63, 0.0 }
  0xb6   :  { %v378_v56 = vadd.f32 %v377_v32, %v376_v59  ;;  %v307_v59 = vmul.f32 %v243_v17, %v243_v17  ;;  %v411_v17 = vsel %vm78_vm0, %v313_v50, 0.0  ;;  %v264_v50 = vsub.f32 %v2204_v18, %v1403_v36 }
  0xb8   :  { %v380_v40 = vadd.f32 %v379_v37, %v378_v56  ;;  %v308_v37 = vmul.f32 %v244_v21, %v244_v21  ;;  %v397_v56 = vsel %vm78_vm0, %v306_v52, 0.0  ;;  %v317_v52 = vmul.f32 %v253_v62, %v253_v62 }
  0xba   :  { %v382_v10 = vadd.f32 %v381_v51, %v380_v40  ;;  %v399_v51 = vsel %vm78_vm0, %v307_v59, 0.0  ;;  %v401_v15 = vsel %vm78_vm0, %v308_v37, 0.0  ;;  %v419_v30 = vsel %vm78_vm0, %v317_v52, 0.0 }
  0xbc   :  { %v384_v24 = vadd.f32 %v383_v5, %v382_v10  ;;  %v311_v10 = vmul.f32 %v247_v35, %v247_v35 }
  0xbe   :  { %v386_v42 = vadd.f32 %v385_v2, %v384_v24  ;;  %v312_v2 = vmul.f32 %v248_v39, %v248_v39  ;;  %v405_v24 = vsel %vm78_vm0, %v310_v61, 0.0  ;;  %v322_v39 = vmul.f32 %v258_v33, %v258_v33 }
  0xc0   :  { %v388_v49 = vadd.f32 %v387_v46, %v386_v42  ;;  %v407_v46 = vsel %vm78_vm0, %v311_v10, 0.0  ;;  %v409_v1 = vsel %vm78_vm0, %v312_v2, 0.0  ;;  %v263_v2 = vsub.f32 %v2203_v9, %v1403_v36 }
  0xc2   :  { %v390_v7 = vadd.f32 %v389_v38, %v388_v49  ;;  %v315_v49 = vmul.f32 %v251_v53, %v251_v53 }
  0xc4   :  { %v392_v32 = vadd.f32 %v391_v23, %v390_v7  ;;  %v316_v23 = vmul.f32 %v252_v57, %v252_v57  ;;  %v413_v7 = vsel %vm78_vm0, %v314_v12, 0.0  ;;  %v265_v12 = vsub.f32 %v2205_v29, %v1403_v36 }
  0xc6   :  { %v394_v13 = vadd.f32 %v393_v45, %v392_v32  ;;  %v415_v45 = vsel %vm78_vm0, %v315_v49, 0.0  ;;  %v417_v59 = vsel %vm78_vm0, %v316_v23, 0.0  ;;  %v2206_v49 = vld [vmem:[#allocation11_spill] sm:$0xff] }
  0xc8   :  { %v396_v58 = vadd.f32 %v395_v55, %v394_v13  ;;  %v319_v13 = vmul.f32 %v255_v14, %v255_v14  ;;  %v329_v14 = vmul.f32 %v265_v12, %v265_v12  ;;  %v2216_v12 = vld [vmem:[#allocation21_spill] sm:$0xff] }
  0xca   :  { %v398_v40 = vadd.f32 %v397_v56, %v396_v58  ;;  %v320_v56 = vmul.f32 %v256_v20, %v256_v20  ;;  %v421_v58 = vsel %vm78_vm0, %v318_v26, 0.0 }
  0xcc   :  { %v400_v5 = vadd.f32 %v399_v51, %v398_v40  ;;  %v423_v51 = vsel %vm78_vm0, %v319_v13, 0.0  ;;  %v425_v61 = vsel %vm78_vm0, %v320_v56, 0.0  ;;  %v269_v13 = vsub.f32 %v2209_v27, %v1403_v36  ;;  %v2210_v56 = vld [vmem:[#allocation15_spill] sm:$0xff] }
  0xce   :  { %v402_v43 = vadd.f32 %v401_v15, %v400_v5  ;;  %v323_v5 = vmul.f32 %v259_v41, %v259_v41 }
  0xd0   :  { %v404_v8 = vadd.f32 %v403_v4, %v402_v43  ;;  %v324_v4 = vmul.f32 %v260_v47, %v260_v47  ;;  %v429_v43 = vsel %vm78_vm0, %v322_v39, 0.0  ;;  %v333_v47 = vmul.f32 %v269_v13, %v269_v13 }
  0xd2   :  { %v406_v42 = vadd.f32 %v405_v24, %v404_v8  ;;  %v325_v24 = vmul.f32 %v261_v54, %v261_v54  ;;  %v431_v8 = vsel %vm78_vm0, %v323_v5, 0.0 }
  0xd4   :  { %v408_v38 = vadd.f32 %v407_v46, %v406_v42  ;;  %v326_v46 = vmul.f32 %v262_v60, %v262_v60  ;;  %v433_v42 = vsel %vm78_vm0, %v324_v4, 0.0  ;;  %v2213_v60 = vld [vmem:[#allocation18_spill] sm:$0xff] }
  0xd5   :  { %v273_v4 = vsub.f32 %v2213_v60, %v1403_v36 }
  0xd6   :  { %v410_v3 = vadd.f32 %v409_v1, %v408_v38  ;;  %v327_v1 = vmul.f32 %v263_v2, %v263_v2  ;;  %v435_v38 = vsel %vm78_vm0, %v325_v24, 0.0  ;;  %v437_v6 = vsel %vm78_vm0, %v326_v46, 0.0  ;;  %v2214_v2 = vld [vmem:[#allocation19_spill] sm:$0xff] }
  0xd7   :  { %v274_v24 = vsub.f32 %v2214_v2, %v1403_v36  ;;  %v2220_v2 = vld [vmem:[#allocation5_spill] sm:$0xff] }
  0xd8   :  { %v412_v21 = vadd.f32 %v411_v17, %v410_v3  ;;  %v266_v17 = vsub.f32 %v2206_v49, %v1403_v36  ;;  %v328_v3 = vmul.f32 %v264_v50, %v264_v50  ;;  %v439_v52 = vsel %vm78_vm0, %v327_v1, 0.0  ;;  %v2215_v50 = vld [vmem:[#allocation20_spill] sm:$0xff] }
  0xd9   :  { %v275_v46 = vsub.f32 %v2215_v50, %v1403_v36  ;;  %v276_v1 = vsub.f32 %v2216_v12, %v1403_v36 }
  0xda   :  { %v414_v32 = vadd.f32 %v413_v7, %v412_v21  ;;  %v2207_v7 = vld [vmem:[#allocation12_spill] sm:$0xff]  ;;  %v330_v26 = vmul.f32 %v266_v17, %v266_v17  ;;  %v277_v17 = vsub.f32 %v1399_v11, %v1403_v36 }
  0xdb   :  { %v267_v21 = vsub.f32 %v2207_v7, %v1403_v36  ;;  %v340_v7 = vmul.f32 %v276_v1, %v276_v1 }
  0xdc   :  { %v416_v55 = vadd.f32 %v415_v45, %v414_v32  ;;  %v2208_v32 = vld [vmem:[#allocation13_spill] sm:$0xff]  ;;  %v445_v41 = vsel %vm78_vm0, %v330_v26, 0.0 }
  0xdd   :  { %v268_v20 = vsub.f32 %v2208_v32, %v1403_v36 }
  0xde   :  { %v418_v37 = vadd.f32 %v417_v59, %v416_v55  ;;  %v441_v59 = vsel %vm78_vm0, %v328_v3, 0.0  ;;  %v339_v3 = vmul.f32 %v275_v46, %v275_v46 }
  0xe0   :  { %v420_v35 = vadd.f32 %v419_v30, %v418_v37  ;;  %v331_v30 = vmul.f32 %v267_v21, %v267_v21  ;;  %v443_v37 = vsel %vm78_vm0, %v329_v14, 0.0 }
  0xe2   :  { %v422_v40 = vadd.f32 %v421_v58, %v420_v35  ;;  %v270_v58 = vsub.f32 %v2210_v56, %v1403_v36  ;;  %v332_v35 = vmul.f32 %v268_v20, %v268_v20  ;;  %v447_v39 = vsel %vm78_vm0, %v331_v30, 0.0 }
  0xe3   :  { %v465_v20 = vsel %vm78_vm0, %v340_v7, 0.0 }
  0xe4   :  { %v424_v15 = vadd.f32 %v423_v51, %v422_v40  ;;  %v2211_v51 = vld [vmem:[#allocation16_spill] sm:$0xff]  ;;  %v334_v5 = vmul.f32 %v270_v58, %v270_v58 }
  0xe5   :  { %v271_v40 = vsub.f32 %v2211_v51, %v1403_v36  ;;  %v476_v51 = vld [vmem:[%s2160_s1] sm:$0x1] }
  0xe6   :  { %v426_v10 = vadd.f32 %v425_v61, %v424_v15  ;;  %v2212_v15 = vld [vmem:[#allocation17_spill] sm:$0xff] }
  0xe7   :  { %v272_v54 = vsub.f32 %v2212_v15, %v1403_v36 }
  0xe8   :  { %v428_v48 = vadd.f32 %v427_v44, %v426_v10  ;;  %v449_v44 = vsel %vm78_vm0, %v332_v35, 0.0 }
  0xea   :  { %v430_v53 = vadd.f32 %v429_v43, %v428_v48  ;;  %v335_v43 = vmul.f32 %v271_v40, %v271_v40  ;;  %v451_v48 = vsel %vm78_vm0, %v333_v47, 0.0 }
  0xec   :  { %v432_v57 = vadd.f32 %v431_v8, %v430_v53  ;;  %v336_v8 = vmul.f32 %v272_v54, %v272_v54  ;;  %v453_v53 = vsel %vm78_vm0, %v334_v5, 0.0 }
  0xee   :  { %v434_v62 = vadd.f32 %v433_v42, %v432_v57  ;;  %v337_v42 = vmul.f32 %v273_v4, %v273_v4  ;;  %v455_v57 = vsel %vm78_vm0, %v335_v43, 0.0  ;;  %v2218_v4 = vld [vmem:[#allocation3_spill] sm:$0xff] }
  0xf0   :  { %v436_v23 = vadd.f32 %v435_v38, %v434_v62  ;;  %v338_v38 = vmul.f32 %v274_v24, %v274_v24  ;;  %v457_v62 = vsel %vm78_vm0, %v336_v8, 0.0  ;;  %v2221_v8 = vld [vmem:[#allocation6_spill] sm:$0xff] }
  0xf2   :  { %v438_v45 = vadd.f32 %v437_v6, %v436_v23  ;;  %v459_v6 = vsel %vm78_vm0, %v337_v42, 0.0  ;;  %v461_v21 = vsel %vm78_vm0, %v338_v38, 0.0 }
  0xf4   :  { %v440_v55 = vadd.f32 %v439_v52, %v438_v45  ;;  %v341_v52 = vmul.f32 %v277_v17, %v277_v17  ;;  %v463_v45 = vsel %vm78_vm0, %v339_v3, 0.0 }
  0xf6   :  { %v442_v33 = vadd.f32 %v441_v59, %v440_v55  ;;  %v467_v59 = vsel %vm78_vm0, %v341_v52, 0.0 }
  0xf8   :  { %v444_v63 = vadd.f32 %v443_v37, %v442_v33 }
  0xfa   :  { %v446_v61 = vadd.f32 %v445_v41, %v444_v63  ;;  %v484_v41 = vlaneseq }
  0xfc   :  { %v448_v10 = vadd.f32 %v447_v39, %v446_v61  ;;  %v485_v63 = vshrl.u32 %v484_v41, 7  ;;  %v480_v61 = vld [vmem:[%s2161_s2] sm:$0x1] }
  0xfe   :  { %v450_v9 = vadd.f32 %v449_v44, %v448_v10  ;;  %v486_v40 = vsub.s32 0, %v485_v63  ;;  %v2217_v10 = vld [vmem:[#allocation2_spill] sm:$0xff] }
 0x100   :  { %v452_v18 = vadd.f32 %v451_v48, %v450_v9  ;;  %v2219_v48 = vld [vmem:[#allocation4_spill] sm:$0xff] }
 0x102   :  { %v454_v29 = vadd.f32 %v453_v53, %v452_v18  ;;  %v2222_v53 = vld [vmem:[#allocation7_spill] sm:$0xff] }
 0x104   :  { %v456_v49 = vadd.f32 %v455_v57, %v454_v29 }
 0x106   :  { %v458_v23 = vadd.f32 %v457_v62, %v456_v49 }
 0x108   :  { %v460_v14 = vadd.f32 %v459_v6, %v458_v23 }
 0x10a   :  { %v462_v32 = vadd.f32 %v461_v21, %v460_v14 }
 0x10c   :  { %v464_v26 = vadd.f32 %v463_v45, %v462_v32 }
 0x10e   :  { %v466_v55 = vadd.f32 %v465_v20, %v464_v26 }
 0x110   :  { %v468_v27 = vadd.f32 %v467_v59, %v466_v55 }
 0x112   :  { %v469_v11 = vrot.slane %v468_v27, 4 }
 0x114   :  { %v470_v13 = vadd.f32 %v469_v11, %v468_v27 }
 0x116   :  { %v471_v30 = vrot.slane %v470_v13, 2 }
 0x118   :  { %v472_v37 = vadd.f32 %v471_v30, %v470_v13 }
 0x11a   :  { %v473_v33 = vrot.slane %v472_v37, 1 }
 0x11c   :  { %v474_v56 = vadd.f32 %v473_v33, %v472_v37 }
 0x11e   :  { %v475_v58 = vmul.f32 0.001953125, %v474_v56 }
 0x120   :  { %v477_v35 = vadd.f32 1e-05, %v475_v58 }
 0x122   :  { %883 = vrsqrt.f32 %v477_v35 }
 0x12c   :  { %v884_v47 = vpop.eup %883 }
 0x12d   :  { %v479_v39 = vmul.f32 %v884_v47, %v476_v51 }
 0x12f   :  { %v481_v15 = vmul.f32 %v479_v39, %v1403_v36  ;;  %v1604_v54 = vrot.slane %v479_v39, %v486_v40  ;;  %v885_v39 = vld [vmem:[%s2159_s0 + $0x70] sm:$0xff] }
 0x131   :  { %v482_v5 = vsub.f32 %v480_v61, %v481_v15  ;;  %v489_v44 = vmul.f32 %v1604_v54, %v958_v0  ;;  %v490_v60 = vmul.f32 %v1604_v54, %v2217_v10  ;;  %v491_v43 = vmul.f32 %v1604_v54, %v2218_v4 }
 0x132   :  { %v492_v9 = vmul.f32 %v1604_v54, %v2219_v48  ;;  %v493_v24 = vmul.f32 %v1604_v54, %v2220_v2  ;;  %v494_v36 = vmul.f32 %v1604_v54, %v2221_v8  ;;  %v495_v18 = vmul.f32 %v1604_v54, %v2222_v53 }
 0x133   :  { %v1620_v50 = vrot.slane %v482_v5, %v486_v40  ;;  %v496_v0 = vmul.f32 %v1604_v54, %v1005_v16  ;;  %v497_v46 = vmul.f32 %v1604_v54, %v1012_v19  ;;  %v498_v42 = vmul.f32 %v1604_v54, %v1019_v22 }
 0x134   :  { %v499_v57 = vmul.f32 %v1604_v54, %v1026_v25  ;;  %v500_v29 = vmul.f32 %v1604_v54, %v1033_v28  ;;  %v501_v12 = vmul.f32 %v1604_v54, %v1040_v31  ;;  %v502_v1 = vmul.f32 %v1604_v54, %v1047_v34 }
 0x135   :  { %v559_v16 = vadd.f32 %v1620_v50, %v489_v44  ;;  %v560_v38 = vadd.f32 %v1620_v50, %v490_v60  ;;  %v561_v19 = vadd.f32 %v1620_v50, %v491_v43  ;;  %v562_v22 = vadd.f32 %v1620_v50, %v492_v9  ;;  %v886_v44 = vld [vmem:[%s2159_s0 + $0x78] sm:$0xff]  ;;  %v887_v60 = vld [vmem:[%s2159_s0 + $0x80] sm:$0xff]  ;;  %v888_v9 = vld [vmem:[%s2159_s0 + $0x88] sm:$0xff] }
 0x136   :  { %v563_v62 = vadd.f32 %v1620_v50, %v493_v24  ;;  %v564_v25 = vadd.f32 %v1620_v50, %v494_v36  ;;  %v565_v28 = vadd.f32 %v1620_v50, %v495_v18  ;;  %v566_v49 = vadd.f32 %v1620_v50, %v496_v0  ;;  %v889_v36 = vld [vmem:[%s2159_s0 + $0x90] sm:$0xff]  ;;  %v890_v18 = vld [vmem:[%s2159_s0 + $0x98] sm:$0xff] }
 0x137   :  { %vm623_vm1 = vcmp.ge.f32.partialorder %v559_v16, 0.0  ;;  %v687_v31 = vmul.f32 0.2, %v559_v16  ;;  %vm624_vm2 = vcmp.ge.f32.partialorder %v560_v38, 0.0  ;;  %v688_v34 = vmul.f32 0.2, %v560_v38 }
 0x138   :  { %vm625_vm3 = vcmp.ge.f32.partialorder %v561_v19, 0.0  ;;  %v689_v17 = vmul.f32 0.2, %v561_v19  ;;  %vm626_vm4 = vcmp.ge.f32.partialorder %v562_v22, 0.0  ;;  %v690_v3 = vmul.f32 0.2, %v562_v22 }
 0x139   :  { %v751_v6 = vsel %vm623_vm1, %v559_v16, %v687_v31  ;;  %v752_v23 = vsel %vm624_vm2, %v560_v38, %v688_v34  ;;  %vm627_vm5 = vcmp.ge.f32.partialorder %v563_v62, 0.0  ;;  %v691_v7 = vmul.f32 0.2, %v563_v62  ;;  %v892_v34 = vld [vmem:[%s2159_s0 + $0xa8] sm:$0xff] }
 0x13a   :  { %815 = vst.msk [vmem:[%s2162_s3] sm:$0xff] %vm78_vm0, %v751_v6  ;;  %816 = vst.msk [vmem:[%s2162_s3 + $0x8] sm:$0xff] %vm78_vm0, %v752_v23  ;;  %v753_v21 = vsel %vm625_vm3, %v561_v19, %v689_v17  ;;  %v754_v14 = vsel %vm626_vm4, %v562_v22, %v690_v3  ;;  %vm628_vm6 = vcmp.ge.f32.partialorder %v564_v25, 0.0  ;;  %v692_v52 = vmul.f32 0.2, %v564_v25  ;;  %v893_v23 = vld [vmem:[%s2159_s0 + $0xb0] sm:$0xff] }
 0x13b   :  { %817 = vst.msk [vmem:[%s2162_s3 + $0x10] sm:$0xff] %vm78_vm0, %v753_v21  ;;  %818 = vst.msk [vmem:[%s2162_s3 + $0x18] sm:$0xff] %vm78_vm0, %v754_v14  ;;  %v755_v45 = vsel %vm627_vm5, %v563_v62, %v691_v7  ;;  %vm629_vm7 = vcmp.ge.f32.partialorder %v565_v28, 0.0  ;;  %v693_v32 = vmul.f32 0.2, %v565_v28  ;;  %vm630_vm8 = vcmp.ge.f32.partialorder %v566_v49, 0.0 }
 0x13c   :  { %819 = vst.msk [vmem:[%s2162_s3 + $0x20] sm:$0xff] %vm78_vm0, %v755_v45  ;;  %v756_v20 = vsel %vm628_vm6, %v564_v25, %v692_v52  ;;  %v694_v26 = vmul.f32 0.2, %v566_v49  ;;  %v567_v59 = vadd.f32 %v1620_v50, %v497_v46  ;;  %v568_v55 = vadd.f32 %v1620_v50, %v498_v42  ;;  %v891_v25 = vld [vmem:[%s2159_s0 + $0xa0] sm:$0xff]  ;;  %v894_v52 = vld [vmem:[%s2159_s0 + $0xb8] sm:$0xff] }
 0x13d   :  { %820 = vst.msk [vmem:[%s2162_s3 + $0x28] sm:$0xff] %vm78_vm0, %v756_v20  ;;  %v757_v27 = vsel %vm629_vm7, %v565_v28, %v693_v32  ;;  %v569_v11 = vadd.f32 %v1620_v50, %v499_v57  ;;  %v570_v13 = vadd.f32 %v1620_v50, %v500_v29  ;;  %v571_v30 = vadd.f32 %v1620_v50, %v501_v12  ;;  %v895_v32 = vld [vmem:[%s2159_s0 + $0xc0] sm:$0xff] }
 0x13e   :  { %821 = vst.msk [vmem:[%s2162_s3 + $0x30] sm:$0xff] %vm78_vm0, %v757_v27  ;;  %v758_v37 = vsel %vm630_vm8, %v566_v49, %v694_v26  ;;  %vm631_vm9 = vcmp.ge.f32.partialorder %v567_v59, 0.0  ;;  %v695_v33 = vmul.f32 0.2, %v567_v59  ;;  %vm632_vm10 = vcmp.ge.f32.partialorder %v568_v55, 0.0 }
 0x13f   :  { %822 = vst.msk [vmem:[%s2162_s3 + $0x38] sm:$0xff] %vm78_vm0, %v758_v37  ;;  %v696_v56 = vmul.f32 0.2, %v568_v55  ;;  %vm633_vm11 = vcmp.ge.f32.partialorder %v569_v11, 0.0  ;;  %v697_v58 = vmul.f32 0.2, %v569_v11  ;;  %v572_v47 = vadd.f32 %v1620_v50, %v502_v1 }
 0x140   :  { %vm634_vm12 = vcmp.ge.f32.partialorder %v570_v13, 0.0  ;;  %v759_v35 = vsel %vm631_vm9, %v567_v59, %v695_v33  ;;  %v698_v41 = vmul.f32 0.2, %v570_v13  ;;  %vm635_vm13 = vcmp.ge.f32.partialorder %v571_v30, 0.0  ;;  %v896_v33 = vld [vmem:[%s2159_s0 + $0xc8] sm:$0xff] }
 0x141   :  { %v699_v63 = vmul.f32 0.2, %v571_v30  ;;  %823 = vst.msk [vmem:[%s2162_s3 + $0x40] sm:$0xff] %vm78_vm0, %v759_v35  ;;  %v760_v51 = vsel %vm632_vm10, %v568_v55, %v696_v56  ;;  %v761_v40 = vsel %vm633_vm11, %v569_v11, %v697_v58  ;;  %v503_v61 = vmul.f32 %v885_v39, %v1604_v54 }
 0x142   :  { %824 = vst.msk [vmem:[%s2162_s3 + $0x48] sm:$0xff] %vm78_vm0, %v760_v51  ;;  %825 = vst.msk [vmem:[%s2162_s3 + $0x50] sm:$0xff] %vm78_vm0, %v761_v40  ;;  %v762_v15 = vsel %vm634_vm12, %v570_v13, %v698_v41  ;;  %v504_v10 = vmul.f32 %v886_v44, %v1604_v54  ;;  %v505_v4 = vmul.f32 %v887_v60, %v1604_v54  ;;  %vm636_vm14 = vcmp.ge.f32.partialorder %v572_v47, 0.0  ;;  %v897_v40 = vld [vmem:[%s2159_s0 + $0xd0] sm:$0xff] }
 0x143   :  { %v763_v5 = vsel %vm635_vm13, %v571_v30, %v699_v63  ;;  %826 = vst.msk [vmem:[%s2162_s3 + $0x58] sm:$0xff] %vm78_vm0, %v762_v15  ;;  %v700_v43 = vmul.f32 0.2, %v572_v47  ;;  %v573_v48 = vadd.f32 %v1620_v50, %v503_v61  ;;  %v506_v2 = vmul.f32 %v888_v9, %v1604_v54  ;;  %v898_v61 = vld [vmem:[%s2159_s0 + $0xd8] sm:$0xff] }
 0x144   :  { %827 = vst.msk [vmem:[%s2162_s3 + $0x60] sm:$0xff] %vm78_vm0, %v763_v5  ;;  %v574_v24 = vadd.f32 %v1620_v50, %v504_v10  ;;  %v575_v8 = vadd.f32 %v1620_v50, %v505_v4  ;;  %v507_v53 = vmul.f32 %v889_v36, %v1604_v54  ;;  %v508_v0 = vmul.f32 %v890_v18, %v1604_v54  ;;  %v899_v5 = vld [vmem:[%s2159_s0 + $0xe0] sm:$0xff]  ;;  %v900_v10 = vld [vmem:[%s2159_s0 + $0xe8] sm:$0xff] }
 0x145   :  { %v764_v46 = vsel %vm636_vm14, %v572_v47, %v700_v43  ;;  %vm637_vm15 = vcmp.ge.f32.partialorder %v573_v48, 0.0  ;;  %v701_v42 = vmul.f32 0.2, %v573_v48  ;;  %v576_v57 = vadd.f32 %v1620_v50, %v506_v2 }
 0x146   :  { %828 = vst.msk [vmem:[%s2162_s3 + $0x68] sm:$0xff] %vm78_vm0, %v764_v46  ;;  %vm638_vm1 = vcmp.ge.f32.partialorder %v574_v24, 0.0  ;;  %v702_v29 = vmul.f32 0.2, %v574_v24  ;;  %vm639_vm2 = vcmp.ge.f32.partialorder %v575_v8, 0.0  ;;  %v577_v38 = vadd.f32 %v1620_v50, %v507_v53 }
 0x147   :  { %v703_v12 = vmul.f32 0.2, %v575_v8  ;;  %v765_v1 = vsel %vm637_vm15, %v573_v48, %v701_v42  ;;  %vm640_vm3 = vcmp.ge.f32.partialorder %v576_v57, 0.0  ;;  %v704_v16 = vmul.f32 0.2, %v576_v57 }
 0x148   :  { %829 = vst.msk [vmem:[%s2162_s3 + $0x70] sm:$0xff] %vm78_vm0, %v765_v1  ;;  %v766_v19 = vsel %vm638_vm1, %v574_v24, %v702_v29  ;;  %v578_v62 = vadd.f32 %v1620_v50, %v508_v0  ;;  %v509_v28 = vmul.f32 %v891_v25, %v1604_v54  ;;  %vm641_vm4 = vcmp.ge.f32.partialorder %v577_v38, 0.0  ;;  %v902_v0 = vld [vmem:[%s2159_s0 + $0xf8] sm:$0xff] }
 0x149   :  { %v767_v22 = vsel %vm639_vm2, %v575_v8, %v703_v12  ;;  %830 = vst.msk [vmem:[%s2162_s3 + $0x78] sm:$0xff] %vm78_vm0, %v766_v19  ;;  %v768_v49 = vsel %vm640_vm3, %v576_v57, %v704_v16  ;;  %v705_v31 = vmul.f32 0.2, %v577_v38  ;;  %v510_v17 = vmul.f32 %v892_v34, %v1604_v54  ;;  %v901_v8 = vld [vmem:[%s2159_s0 + $0xf0] sm:$0xff] }
 0x14a   :  { %831 = vst.msk [vmem:[%s2162_s3 + $0x80] sm:$0xff] %vm78_vm0, %v767_v22  ;;  %832 = vst.msk [vmem:[%s2162_s3 + $0x88] sm:$0xff] %vm78_vm0, %v768_v49  ;;  %vm642_vm5 = vcmp.ge.f32.partialorder %v578_v62, 0.0  ;;  %v706_v3 = vmul.f32 0.2, %v578_v62  ;;  %v579_v6 = vadd.f32 %v1620_v50, %v509_v28  ;;  %v511_v7 = vmul.f32 %v893_v23, %v1604_v54  ;;  %v903_v22 = vld [vmem:[%s2159_s0 + $0x100] sm:$0xff] }
 0x14b   :  { %v769_v21 = vsel %vm641_vm4, %v577_v38, %v705_v31  ;;  %v580_v14 = vadd.f32 %v1620_v50, %v510_v17  ;;  %v512_v45 = vmul.f32 %v894_v52, %v1604_v54  ;;  %v513_v20 = vmul.f32 %v895_v32, %v1604_v54  ;;  %v904_v49 = vld [vmem:[%s2159_s0 + $0x108] sm:$0xff]  ;;  %v907_v52 = vld [vmem:[%s2159_s0 + $0x120] sm:$0xff] }
 0x14c   :  { %833 = vst.msk [vmem:[%s2162_s3 + $0x90] sm:$0xff] %vm78_vm0, %v769_v21  ;;  %v770_v26 = vsel %vm642_vm5, %v578_v62, %v706_v3  ;;  %vm643_vm6 = vcmp.ge.f32.partialorder %v579_v6, 0.0  ;;  %v707_v59 = vmul.f32 0.2, %v579_v6  ;;  %v581_v55 = vadd.f32 %v1620_v50, %v511_v7  ;;  %v905_v3 = vld [vmem:[%s2159_s0 + $0x110] sm:$0xff]  ;;  %v906_v21 = vld [vmem:[%s2159_s0 + $0x118] sm:$0xff] }
 0x14d   :  { %834 = vst.msk [vmem:[%s2162_s3 + $0x98] sm:$0xff] %vm78_vm0, %v770_v26  ;;  %vm644_vm7 = vcmp.ge.f32.partialorder %v580_v14, 0.0  ;;  %v708_v27 = vmul.f32 0.2, %v580_v14  ;;  %v582_v11 = vadd.f32 %v1620_v50, %v512_v45  ;;  %v583_v13 = vadd.f32 %v1620_v50, %v513_v20 }
 0x14e   :  { %v771_v30 = vsel %vm643_vm6, %v579_v6, %v707_v59  ;;  %vm645_vm8 = vcmp.ge.f32.partialorder %v581_v55, 0.0  ;;  %v709_v37 = vmul.f32 0.2, %v581_v55  ;;  %v514_v56 = vmul.f32 %v896_v33, %v1604_v54 }
 0x14f   :  { %835 = vst.msk [vmem:[%s2162_s3 + $0xa0] sm:$0xff] %vm78_vm0, %v771_v30  ;;  %v772_v58 = vsel %vm644_vm7, %v580_v14, %v708_v27  ;;  %vm646_vm9 = vcmp.ge.f32.partialorder %v582_v11, 0.0  ;;  %v710_v35 = vmul.f32 0.2, %v582_v11  ;;  %vm647_vm10 = vcmp.ge.f32.partialorder %v583_v13, 0.0  ;;  %v908_v30 = vld [vmem:[%s2159_s0 + $0x128] sm:$0xff] }
 0x150   :  { %836 = vst.msk [vmem:[%s2162_s3 + $0xa8] sm:$0xff] %vm78_vm0, %v772_v58  ;;  %v773_v41 = vsel %vm645_vm8, %v581_v55, %v709_v37  ;;  %v711_v63 = vmul.f32 0.2, %v583_v13  ;;  %v584_v51 = vadd.f32 %v1620_v50, %v514_v56  ;;  %v515_v47 = vmul.f32 %v897_v40, %v1604_v54 }
 0x151   :  { %837 = vst.msk [vmem:[%s2162_s3 + $0xb0] sm:$0xff] %vm78_vm0, %v773_v41  ;;  %v774_v39 = vsel %vm646_vm9, %v582_v11, %v710_v35  ;;  %v516_v15 = vmul.f32 %v898_v61, %v1604_v54  ;;  %v517_v44 = vmul.f32 %v899_v5, %v1604_v54  ;;  %v518_v60 = vmul.f32 %v900_v10, %v1604_v54  ;;  %v911_v61 = vld [vmem:[%s2159_s0 + $0x140] sm:$0xff]  ;;  %v912_v5 = vld [vmem:[%s2159_s0 + $0x148] sm:$0xff] }
 0x152   :  { %838 = vst.msk [vmem:[%s2162_s3 + $0xb8] sm:$0xff] %vm78_vm0, %v774_v39  ;;  %v775_v4 = vsel %vm647_vm10, %v583_v13, %v711_v63  ;;  %vm648_vm11 = vcmp.ge.f32.partialorder %v584_v51, 0.0  ;;  %v712_v43 = vmul.f32 0.2, %v584_v51  ;;  %v585_v48 = vadd.f32 %v1620_v50, %v515_v47  ;;  %v909_v63 = vld [vmem:[%s2159_s0 + $0x130] sm:$0xff]  ;;  %v910_v47 = vld [vmem:[%s2159_s0 + $0x138] sm:$0xff] }
 0x153   :  { %839 = vst.msk [vmem:[%s2162_s3 + $0xc0] sm:$0xff] %vm78_vm0, %v775_v4  ;;  %v586_v9 = vadd.f32 %v1620_v50, %v516_v15  ;;  %v587_v2 = vadd.f32 %v1620_v50, %v517_v44  ;;  %v588_v24 = vadd.f32 %v1620_v50, %v518_v60  ;;  %v519_v36 = vmul.f32 %v901_v8, %v1604_v54 }
 0x154   :  { %v776_v53 = vsel %vm648_vm11, %v584_v51, %v712_v43  ;;  %vm649_vm12 = vcmp.ge.f32.partialorder %v585_v48, 0.0  ;;  %v713_v18 = vmul.f32 0.2, %v585_v48  ;;  %v520_v46 = vmul.f32 %v902_v0, %v1604_v54 }
 0x155   :  { %840 = vst.msk [vmem:[%s2162_s3 + $0xc8] sm:$0xff] %vm78_vm0, %v776_v53  ;;  %vm650_vm13 = vcmp.ge.f32.partialorder %v586_v9, 0.0  ;;  %v714_v42 = vmul.f32 0.2, %v586_v9  ;;  %vm651_vm14 = vcmp.ge.f32.partialorder %v587_v2, 0.0  ;;  %vm652_vm15 = vcmp.ge.f32.partialorder %v588_v24, 0.0 }
 0x156   :  { %v715_v57 = vmul.f32 0.2, %v587_v2  ;;  %v777_v29 = vsel %vm649_vm12, %v585_v48, %v713_v18  ;;  %v716_v12 = vmul.f32 0.2, %v588_v24  ;;  %v589_v1 = vadd.f32 %v1620_v50, %v519_v36  ;;  %v914_v53 = vld [vmem:[%s2159_s0 + $0x158] sm:$0xff] }
 0x157   :  { %841 = vst.msk [vmem:[%s2162_s3 + $0xd0] sm:$0xff] %vm78_vm0, %v777_v29  ;;  %v778_v16 = vsel %vm650_vm13, %v586_v9, %v714_v42  ;;  %v590_v19 = vadd.f32 %v1620_v50, %v520_v46  ;;  %v521_v62 = vmul.f32 %v903_v22, %v1604_v54  ;;  %v522_v31 = vmul.f32 %v904_v49, %v1604_v54 }
 0x158   :  { %v779_v38 = vsel %vm651_vm14, %v587_v2, %v715_v57  ;;  %842 = vst.msk [vmem:[%s2162_s3 + $0xd8] sm:$0xff] %vm78_vm0, %v778_v16  ;;  %v780_v25 = vsel %vm652_vm15, %v588_v24, %v716_v12  ;;  %vm653_vm1 = vcmp.ge.f32.partialorder %v589_v1, 0.0  ;;  %v717_v28 = vmul.f32 0.2, %v589_v1  ;;  %v913_v2 = vld [vmem:[%s2159_s0 + $0x150] sm:$0xff] }
 0x159   :  { %843 = vst.msk [vmem:[%s2162_s3 + $0xe0] sm:$0xff] %vm78_vm0, %v779_v38  ;;  %844 = vst.msk [vmem:[%s2162_s3 + $0xe8] sm:$0xff] %vm78_vm0, %v780_v25  ;;  %vm654_vm2 = vcmp.ge.f32.partialorder %v590_v19, 0.0  ;;  %v718_v34 = vmul.f32 0.2, %v590_v19  ;;  %v591_v17 = vadd.f32 %v1620_v50, %v521_v62  ;;  %v523_v6 = vmul.f32 %v905_v3, %v1604_v54  ;;  %v915_v38 = vld [vmem:[%s2159_s0 + $0x160] sm:$0xff] }
 0x15a   :  { %v781_v23 = vsel %vm653_vm1, %v589_v1, %v717_v28  ;;  %v592_v7 = vadd.f32 %v1620_v50, %v522_v31  ;;  %v524_v14 = vmul.f32 %v906_v21, %v1604_v54  ;;  %v525_v45 = vmul.f32 %v907_v52, %v1604_v54  ;;  %v916_v25 = vld [vmem:[%s2159_s0 + $0x168] sm:$0xff]  ;;  %v919_v21 = vld [vmem:[%s2159_s0 + $0x180] sm:$0xff] }
 0x15b   :  { %845 = vst.msk [vmem:[%s2162_s3 + $0xf0] sm:$0xff] %vm78_vm0, %v781_v23  ;;  %v782_v32 = vsel %vm654_vm2, %v590_v19, %v718_v34  ;;  %vm655_vm3 = vcmp.ge.f32.partialorder %v591_v17, 0.0  ;;  %v719_v20 = vmul.f32 0.2, %v591_v17  ;;  %v593_v26 = vadd.f32 %v1620_v50, %v523_v6  ;;  %v917_v34 = vld [vmem:[%s2159_s0 + $0x170] sm:$0xff]  ;;  %v918_v23 = vld [vmem:[%s2159_s0 + $0x178] sm:$0xff] }
 0x15c   :  { %846 = vst.msk [vmem:[%s2162_s3 + $0xf8] sm:$0xff] %vm78_vm0, %v782_v32  ;;  %vm656_vm4 = vcmp.ge.f32.partialorder %v592_v7, 0.0  ;;  %v720_v59 = vmul.f32 0.2, %v592_v7  ;;  %v594_v55 = vadd.f32 %v1620_v50, %v524_v14  ;;  %v595_v27 = vadd.f32 %v1620_v50, %v525_v45 }
 0x15d   :  { %v783_v11 = vsel %vm655_vm3, %v591_v17, %v719_v20  ;;  %vm657_vm5 = vcmp.ge.f32.partialorder %v593_v26, 0.0  ;;  %v721_v13 = vmul.f32 0.2, %v593_v26  ;;  %v526_v37 = vmul.f32 %v908_v30, %v1604_v54 }
 0x15e   :  { %847 = vst.msk [vmem:[%s2162_s3 + $0x100] sm:$0xff] %vm78_vm0, %v783_v11  ;;  %v784_v33 = vsel %vm656_vm4, %v592_v7, %v720_v59  ;;  %vm658_vm6 = vcmp.ge.f32.partialorder %v594_v55, 0.0  ;;  %v722_v56 = vmul.f32 0.2, %v594_v55  ;;  %vm659_vm7 = vcmp.ge.f32.partialorder %v595_v27, 0.0  ;;  %v920_v11 = vld [vmem:[%s2159_s0 + $0x188] sm:$0xff] }
 0x15f   :  { %848 = vst.msk [vmem:[%s2162_s3 + $0x108] sm:$0xff] %vm78_vm0, %v784_v33  ;;  %v785_v58 = vsel %vm657_vm5, %v593_v26, %v721_v13  ;;  %v723_v35 = vmul.f32 0.2, %v595_v27  ;;  %v596_v41 = vadd.f32 %v1620_v50, %v526_v37  ;;  %v527_v51 = vmul.f32 %v909_v63, %v1604_v54 }
 0x160   :  { %849 = vst.msk [vmem:[%s2162_s3 + $0x110] sm:$0xff] %vm78_vm0, %v785_v58  ;;  %v786_v40 = vsel %vm658_vm6, %v594_v55, %v722_v56  ;;  %v528_v39 = vmul.f32 %v910_v47, %v1604_v54  ;;  %v529_v15 = vmul.f32 %v911_v61, %v1604_v54  ;;  %v530_v44 = vmul.f32 %v912_v5, %v1604_v54  ;;  %v923_v47 = vld [vmem:[%s2159_s0 + $0x1a0] sm:$0xff]  ;;  %v924_v61 = vld [vmem:[%s2159_s0 + $0x1a8] sm:$0xff] }
 0x161   :  { %850 = vst.msk [vmem:[%s2162_s3 + $0x118] sm:$0xff] %vm78_vm0, %v786_v40  ;;  %v787_v10 = vsel %vm659_vm7, %v595_v27, %v723_v35  ;;  %vm660_vm8 = vcmp.ge.f32.partialorder %v596_v41, 0.0  ;;  %v724_v60 = vmul.f32 0.2, %v596_v41  ;;  %v597_v4 = vadd.f32 %v1620_v50, %v527_v51  ;;  %v921_v35 = vld [vmem:[%s2159_s0 + $0x190] sm:$0xff]  ;;  %v922_v51 = vld [vmem:[%s2159_s0 + $0x198] sm:$0xff] }
 0x162   :  { %851 = vst.msk [vmem:[%s2162_s3 + $0x120] sm:$0xff] %vm78_vm0, %v787_v10  ;;  %v598_v43 = vadd.f32 %v1620_v50, %v528_v39  ;;  %v599_v48 = vadd.f32 %v1620_v50, %v529_v15  ;;  %v600_v9 = vadd.f32 %v1620_v50, %v530_v44  ;;  %v531_v24 = vmul.f32 %v913_v2, %v1604_v54 }
 0x163   :  { %v788_v8 = vsel %vm660_vm8, %v596_v41, %v724_v60  ;;  %vm661_vm9 = vcmp.ge.f32.partialorder %v597_v4, 0.0  ;;  %v725_v36 = vmul.f32 0.2, %v597_v4  ;;  %v532_v18 = vmul.f32 %v914_v53, %v1604_v54 }
 0x164   :  { %852 = vst.msk [vmem:[%s2162_s3 + $0x128] sm:$0xff] %vm78_vm0, %v788_v8  ;;  %vm662_vm10 = vcmp.ge.f32.partialorder %v598_v43, 0.0  ;;  %v726_v0 = vmul.f32 0.2, %v598_v43  ;;  %vm663_vm11 = vcmp.ge.f32.partialorder %v599_v48, 0.0  ;;  %vm664_vm12 = vcmp.ge.f32.partialorder %v600_v9, 0.0 }
 0x165   :  { %v727_v46 = vmul.f32 0.2, %v599_v48  ;;  %v789_v42 = vsel %vm661_vm9, %v597_v4, %v725_v36  ;;  %v728_v57 = vmul.f32 0.2, %v600_v9  ;;  %v601_v29 = vadd.f32 %v1620_v50, %v531_v24  ;;  %v926_v8 = vld [vmem:[%s2159_s0 + $0x1b8] sm:$0xff] }
 0x166   :  { %853 = vst.msk [vmem:[%s2162_s3 + $0x130] sm:$0xff] %vm78_vm0, %v789_v42  ;;  %v790_v12 = vsel %vm662_vm10, %v598_v43, %v726_v0  ;;  %v602_v16 = vadd.f32 %v1620_v50, %v532_v18  ;;  %v533_v19 = vmul.f32 %v915_v38, %v1604_v54  ;;  %v534_v28 = vmul.f32 %v916_v25, %v1604_v54 }
 0x167   :  { %v791_v1 = vsel %vm663_vm11, %v599_v48, %v727_v46  ;;  %854 = vst.msk [vmem:[%s2162_s3 + $0x138] sm:$0xff] %vm78_vm0, %v790_v12  ;;  %v792_v22 = vsel %vm664_vm12, %v600_v9, %v728_v57  ;;  %vm665_vm13 = vcmp.ge.f32.partialorder %v601_v29, 0.0  ;;  %v729_v62 = vmul.f32 0.2, %v601_v29  ;;  %v925_v48 = vld [vmem:[%s2159_s0 + $0x1b0] sm:$0xff] }
 0x168   :  { %855 = vst.msk [vmem:[%s2162_s3 + $0x140] sm:$0xff] %vm78_vm0, %v791_v1  ;;  %856 = vst.msk [vmem:[%s2162_s3 + $0x148] sm:$0xff] %vm78_vm0, %v792_v22  ;;  %vm666_vm14 = vcmp.ge.f32.partialorder %v602_v16, 0.0  ;;  %v730_v49 = vmul.f32 0.2, %v602_v16  ;;  %v603_v31 = vadd.f32 %v1620_v50, %v533_v19  ;;  %v535_v17 = vmul.f32 %v917_v34, %v1604_v54  ;;  %v927_v1 = vld [vmem:[%s2159_s0 + $0x1c0] sm:$0xff] }
 0x169   :  { %v793_v3 = vsel %vm665_vm13, %v601_v29, %v729_v62  ;;  %v604_v6 = vadd.f32 %v1620_v50, %v534_v28  ;;  %v536_v7 = vmul.f32 %v918_v23, %v1604_v54  ;;  %v537_v14 = vmul.f32 %v919_v21, %v1604_v54  ;;  %v928_v22 = vld [vmem:[%s2159_s0 + $0x1c8] sm:$0xff]  ;;  %v931_v23 = vld [vmem:[%s2159_s0 + $0x1e0] sm:$0xff] }
 0x16a   :  { %857 = vst.msk [vmem:[%s2162_s3 + $0x150] sm:$0xff] %vm78_vm0, %v793_v3  ;;  %v794_v52 = vsel %vm666_vm14, %v602_v16, %v730_v49  ;;  %vm667_vm15 = vcmp.ge.f32.partialorder %v603_v31, 0.0  ;;  %v731_v45 = vmul.f32 0.2, %v603_v31  ;;  %v605_v32 = vadd.f32 %v1620_v50, %v535_v17  ;;  %v929_v49 = vld [vmem:[%s2159_s0 + $0x1d0] sm:$0xff]  ;;  %v930_v3 = vld [vmem:[%s2159_s0 + $0x1d8] sm:$0xff] }
 0x16b   :  { %858 = vst.msk [vmem:[%s2162_s3 + $0x158] sm:$0xff] %vm78_vm0, %v794_v52  ;;  %vm668_vm1 = vcmp.ge.f32.partialorder %v604_v6, 0.0  ;;  %v732_v20 = vmul.f32 0.2, %v604_v6  ;;  %v606_v26 = vadd.f32 %v1620_v50, %v536_v7  ;;  %v607_v59 = vadd.f32 %v1620_v50, %v537_v14 }
 0x16c   :  { %v795_v55 = vsel %vm667_vm15, %v603_v31, %v731_v45  ;;  %vm669_vm2 = vcmp.ge.f32.partialorder %v605_v32, 0.0  ;;  %v733_v27 = vmul.f32 0.2, %v605_v32  ;;  %v538_v13 = vmul.f32 %v920_v11, %v1604_v54 }
 0x16d   :  { %859 = vst.msk [vmem:[%s2162_s3 + $0x160] sm:$0xff] %vm78_vm0, %v795_v55  ;;  %v796_v30 = vsel %vm668_vm1, %v604_v6, %v732_v20  ;;  %vm670_vm3 = vcmp.ge.f32.partialorder %v606_v26, 0.0  ;;  %v734_v37 = vmul.f32 0.2, %v606_v26  ;;  %vm671_vm4 = vcmp.ge.f32.partialorder %v607_v59, 0.0  ;;  %v932_v55 = vld [vmem:[%s2159_s0 + $0x1e8] sm:$0xff] }
 0x16e   :  { %860 = vst.msk [vmem:[%s2162_s3 + $0x168] sm:$0xff] %vm78_vm0, %v796_v30  ;;  %v797_v33 = vsel %vm669_vm2, %v605_v32, %v733_v27  ;;  %v735_v56 = vmul.f32 0.2, %v607_v59  ;;  %v608_v58 = vadd.f32 %v1620_v50, %v538_v13  ;;  %v539_v41 = vmul.f32 %v921_v35, %v1604_v54 }
 0x16f   :  { %861 = vst.msk [vmem:[%s2162_s3 + $0x170] sm:$0xff] %vm78_vm0, %v797_v33  ;;  %v798_v63 = vsel %vm670_vm3, %v606_v26, %v734_v37  ;;  %v540_v40 = vmul.f32 %v922_v51, %v1604_v54  ;;  %v541_v39 = vmul.f32 %v923_v47, %v1604_v54  ;;  %v542_v15 = vmul.f32 %v924_v61, %v1604_v54 }
 0x170   :  { %862 = vst.msk [vmem:[%s2162_s3 + $0x178] sm:$0xff] %vm78_vm0, %v798_v63  ;;  %v799_v5 = vsel %vm671_vm4, %v607_v59, %v735_v56  ;;  %vm672_vm5 = vcmp.ge.f32.partialorder %v608_v58, 0.0  ;;  %v736_v44 = vmul.f32 0.2, %v608_v58  ;;  %v609_v10 = vadd.f32 %v1620_v50, %v539_v41  ;;  %v933_v56 = vld [vmem:[%s2159_s0 + $0x1f0] sm:$0xff]  ;;  %v934_v41 = vld [vmem:[%s2159_s0 + $0x1f8] sm:$0xff] }
 0x171   :  { %863 = vst.msk [vmem:[%s2162_s3 + $0x180] sm:$0xff] %vm78_vm0, %v799_v5  ;;  %v610_v60 = vadd.f32 %v1620_v50, %v540_v40  ;;  %v611_v4 = vadd.f32 %v1620_v50, %v541_v39  ;;  %v612_v43 = vadd.f32 %v1620_v50, %v542_v15  ;;  %v543_v9 = vmul.f32 %v925_v48, %v1604_v54 }
 0x172   :  { %v800_v2 = vsel %vm672_vm5, %v608_v58, %v736_v44  ;;  %vm673_vm6 = vcmp.ge.f32.partialorder %v609_v10, 0.0  ;;  %v737_v24 = vmul.f32 0.2, %v609_v10  ;;  %v544_v36 = vmul.f32 %v926_v8, %v1604_v54 }
 0x173   :  { %864 = vst.msk [vmem:[%s2162_s3 + $0x188] sm:$0xff] %vm78_vm0, %v800_v2  ;;  %vm674_vm7 = vcmp.ge.f32.partialorder %v610_v60, 0.0  ;;  %v738_v53 = vmul.f32 0.2, %v610_v60  ;;  %vm675_vm8 = vcmp.ge.f32.partialorder %v611_v4, 0.0  ;;  %vm676_vm9 = vcmp.ge.f32.partialorder %v612_v43, 0.0 }
 0x174   :  { %v739_v18 = vmul.f32 0.2, %v611_v4  ;;  %v801_v0 = vsel %vm673_vm6, %v609_v10, %v737_v24  ;;  %v740_v46 = vmul.f32 0.2, %v612_v43  ;;  %v613_v42 = vadd.f32 %v1620_v50, %v543_v9 }
 0x175   :  { %865 = vst.msk [vmem:[%s2162_s3 + $0x190] sm:$0xff] %vm78_vm0, %v801_v0  ;;  %v802_v57 = vsel %vm674_vm7, %v610_v60, %v738_v53  ;;  %v614_v12 = vadd.f32 %v1620_v50, %v544_v36  ;;  %v545_v16 = vmul.f32 %v927_v1, %v1604_v54  ;;  %v546_v62 = vmul.f32 %v928_v22, %v1604_v54 }
 0x176   :  { %v803_v29 = vsel %vm675_vm8, %v611_v4, %v739_v18  ;;  %866 = vst.msk [vmem:[%s2162_s3 + $0x198] sm:$0xff] %vm78_vm0, %v802_v57  ;;  %v804_v38 = vsel %vm676_vm9, %v612_v43, %v740_v46  ;;  %vm677_vm10 = vcmp.ge.f32.partialorder %v613_v42, 0.0  ;;  %v741_v19 = vmul.f32 0.2, %v613_v42 }
 0x177   :  { %867 = vst.msk [vmem:[%s2162_s3 + $0x1a0] sm:$0xff] %vm78_vm0, %v803_v29  ;;  %868 = vst.msk [vmem:[%s2162_s3 + $0x1a8] sm:$0xff] %vm78_vm0, %v804_v38  ;;  %vm678_vm11 = vcmp.ge.f32.partialorder %v614_v12, 0.0  ;;  %v742_v25 = vmul.f32 0.2, %v614_v12  ;;  %v615_v28 = vadd.f32 %v1620_v50, %v545_v16  ;;  %v547_v31 = vmul.f32 %v929_v49, %v1604_v54 }
 0x178   :  { %v805_v34 = vsel %vm677_vm10, %v613_v42, %v741_v19  ;;  %v616_v17 = vadd.f32 %v1620_v50, %v546_v62  ;;  %v548_v6 = vmul.f32 %v930_v3, %v1604_v54  ;;  %v549_v7 = vmul.f32 %v931_v23, %v1604_v54 }
 0x179   :  { %869 = vst.msk [vmem:[%s2162_s3 + $0x1b0] sm:$0xff] %vm78_vm0, %v805_v34  ;;  %v806_v21 = vsel %vm678_vm11, %v614_v12, %v742_v25  ;;  %vm679_vm12 = vcmp.ge.f32.partialorder %v615_v28, 0.0  ;;  %v743_v14 = vmul.f32 0.2, %v615_v28  ;;  %v617_v52 = vadd.f32 %v1620_v50, %v547_v31 }
 0x17a   :  { %870 = vst.msk [vmem:[%s2162_s3 + $0x1b8] sm:$0xff] %vm78_vm0, %v806_v21  ;;  %vm680_vm13 = vcmp.ge.f32.partialorder %v616_v17, 0.0  ;;  %v744_v45 = vmul.f32 0.2, %v616_v17  ;;  %v618_v32 = vadd.f32 %v1620_v50, %v548_v6  ;;  %v619_v20 = vadd.f32 %v1620_v50, %v549_v7 }
 0x17b   :  { %v807_v26 = vsel %vm679_vm12, %v615_v28, %v743_v14  ;;  %vm681_vm14 = vcmp.ge.f32.partialorder %v617_v52, 0.0  ;;  %v745_v59 = vmul.f32 0.2, %v617_v52  ;;  %v550_v27 = vmul.f32 %v932_v55, %v1604_v54 }
 0x17c   :  { %871 = vst.msk [vmem:[%s2162_s3 + $0x1c0] sm:$0xff] %vm78_vm0, %v807_v26  ;;  %v808_v11 = vsel %vm680_vm13, %v616_v17, %v744_v45  ;;  %vm682_vm15 = vcmp.ge.f32.partialorder %v618_v32, 0.0  ;;  %v746_v13 = vmul.f32 0.2, %v618_v32  ;;  %vm683_vm1 = vcmp.ge.f32.partialorder %v619_v20, 0.0 }
 0x17d   :  { %872 = vst.msk [vmem:[%s2162_s3 + $0x1c8] sm:$0xff] %vm78_vm0, %v808_v11  ;;  %v809_v30 = vsel %vm681_vm14, %v617_v52, %v745_v59  ;;  %v747_v37 = vmul.f32 0.2, %v619_v20  ;;  %v620_v33 = vadd.f32 %v1620_v50, %v550_v27  ;;  %v551_v58 = vmul.f32 %v933_v56, %v1604_v54 }
 0x17e   :  { %873 = vst.msk [vmem:[%s2162_s3 + $0x1d0] sm:$0xff] %vm78_vm0, %v809_v30  ;;  %v810_v35 = vsel %vm682_vm15, %v618_v32, %v746_v13  ;;  %v552_v63 = vmul.f32 %v934_v41, %v1604_v54 }
 0x17f   :  { %874 = vst.msk [vmem:[%s2162_s3 + $0x1d8] sm:$0xff] %vm78_vm0, %v810_v35  ;;  %v811_v51 = vsel %vm683_vm1, %v619_v20, %v747_v37  ;;  %vm684_vm2 = vcmp.ge.f32.partialorder %v620_v33, 0.0  ;;  %v748_v40 = vmul.f32 0.2, %v620_v33  ;;  %v621_v47 = vadd.f32 %v1620_v50, %v551_v58 }
 0x180   :  { %875 = vst.msk [vmem:[%s2162_s3 + $0x1e0] sm:$0xff] %vm78_vm0, %v811_v51  ;;  %v622_v39 = vadd.f32 %v1620_v50, %v552_v63 }
 0x181   :  { %v812_v61 = vsel %vm684_vm2, %v620_v33, %v748_v40  ;;  %vm685_vm3 = vcmp.ge.f32.partialorder %v621_v47, 0.0  ;;  %v749_v54 = vmul.f32 0.2, %v621_v47 }
 0x182   :  { %876 = vst.msk [vmem:[%s2162_s3 + $0x1e8] sm:$0xff] %vm78_vm0, %v812_v61  ;;  %vm686_vm4 = vcmp.ge.f32.partialorder %v622_v39, 0.0  ;;  %v750_v15 = vmul.f32 0.2, %v622_v39 }
 0x183   :  { %v813_v5 = vsel %vm685_vm3, %v621_v47, %v749_v54 }
 0x184   :  { %877 = vst.msk [vmem:[%s2162_s3 + $0x1f0] sm:$0xff] %vm78_vm0, %v813_v5  ;;  %v814_v44 = vsel %vm686_vm4, %v622_v39, %v750_v15 }
 0x185   :  { %878 = vst.msk [vmem:[%s2162_s3 + $0x1f8] sm:$0xff] %vm78_vm0, %v814_v44 }

// kernel: generator_forward.38
= control target key start
LH: loop header
LB: loop body
LE: loop exit
PB: predicated region body
PF: predicated region fallthrough
CT: control target
= control target key end

     0   :  { %vm252_vm0 = vcmask 261120   ;;  %vm702_vm1 = vcmask 23552   ;;  %s1510_s1 = inlined_call_operand.vmem [shape: bf16[32,3], index: 1, kind: input, shape index: {}]   ;;  %s1511_s0 = inlined_call_operand.vmem [shape: bf16[512,32], index: 0, kind: input, shape index: {}]   ;;  %s1512_s2 = inlined_call_operand.vmem [shape: f32[512,3], index: 2, kind: output, shape index: {}]  }
   0x1   :  { %v943_v0 = vld [vmem:[%s1510_s1] sm:$0xff]   ;;  %v944_v1 = vld [vmem:[%s1510_s1 + $0x8] sm:$0xff]   ;;  %v949_v6 = vld [vmem:[%s1511_s0 + $0x10] sm:$0xff]  }
   0x2   :  { %871 = vmatprep.subr.bf16.mxu0 %v943_v0  ;;  %939 = vmatprep.subr.bf16.mxu1 %v943_v0  ;;  %v945_v2 = vld [vmem:[%s1511_s0] sm:$0xff]   ;;  %v947_v4 = vld [vmem:[%s1511_s0 + $0x8] sm:$0xff]   ;;  %v950_v7 = vld [vmem:[%s1511_s0 + $0x90] sm:$0xff]  }
   0x3   :  { %872 = vmatpush3.bf16.msra.mxu0 %v943_v0  ;;  %941 = vmatpush3.bf16.msra.mxu1 %v943_v0  ;;  %v946_v3 = vld [vmem:[%s1511_s0 + $0x80] sm:$0xff]   ;;  %v948_v5 = vld [vmem:[%s1511_s0 + $0x88] sm:$0xff]   ;;  %v951_v8 = vld [vmem:[%s1511_s0 + $0x18] sm:$0xff]  }
   0x4   :  { %873 = vmatprep.subr.bf16.mxu0 %v944_v1  ;;  %940 = vmatprep.subr.bf16.mxu1 %v944_v1  ;;  %v952_v9 = vld [vmem:[%s1511_s0 + $0x98] sm:$0xff]   ;;  %v953_v10 = vld [vmem:[%s1511_s0 + $0x20] sm:$0xff]   ;;  %v955_v12 = vld [vmem:[%s1511_s0 + $0x28] sm:$0xff]  }
   0x5   :  { %875 = vmatprep.mubr.msk.bf16.mxu0 %vm252_vm0, %v945_v2  ;;  %907 = vmatprep.mubr.msk.bf16.mxu1 %vm252_vm0, %v946_v3  ;;  %v954_v11 = vld [vmem:[%s1511_s0 + $0xa0] sm:$0xff]   ;;  %v956_v13 = vld [vmem:[%s1511_s0 + $0xa8] sm:$0xff]   ;;  %v957_v14 = vld [vmem:[%s1511_s0 + $0x30] sm:$0xff]  }
   0x6   :  { %v958_v15 = vld [vmem:[%s1511_s0 + $0xb0] sm:$0xff]   ;;  %v959_v16 = vld [vmem:[%s1511_s0 + $0x38] sm:$0xff]   ;;  %v961_v18 = vld [vmem:[%s1511_s0 + $0x40] sm:$0xff]  }
   0x7   :  { %874 = vmatpush3.bf16.msra.mxu0 %v944_v1  ;;  %942 = vmatpush3.bf16.msra.mxu1 %v944_v1  ;;  %v960_v17 = vld [vmem:[%s1511_s0 + $0xb8] sm:$0xff]   ;;  %v962_v19 = vld [vmem:[%s1511_s0 + $0xc0] sm:$0xff]   ;;  %v963_v20 = vld [vmem:[%s1511_s0 + $0x48] sm:$0xff]  }
   0x8   :  { %v964_v21 = vld [vmem:[%s1511_s0 + $0xc8] sm:$0xff]   ;;  %v965_v22 = vld [vmem:[%s1511_s0 + $0x50] sm:$0xff]   ;;  %v967_v24 = vld [vmem:[%s1511_s0 + $0x58] sm:$0xff]  }
   0x9   :  { %v966_v23 = vld [vmem:[%s1511_s0 + $0xd0] sm:$0xff]   ;;  %v968_v25 = vld [vmem:[%s1511_s0 + $0xd8] sm:$0xff]   ;;  %v969_v26 = vld [vmem:[%s1511_s0 + $0x60] sm:$0xff]  }
   0xa   :  { %876 = vmatmul.mubr.msk.bf16.vlgmr.msra.gmra.mrb[0].mxu0 %vm252_vm0, %v947_v4  ;;  %908 = vmatmul.mubr.msk.bf16.vlgmr.msra.gmra.mrb[0].mxu1 %vm252_vm0, %v948_v5  ;;  %v970_v27 = vld [vmem:[%s1511_s0 + $0xe0] sm:$0xff]   ;;  %v971_v28 = vld [vmem:[%s1511_s0 + $0x68] sm:$0xff]   ;;  %v973_v30 = vld [vmem:[%s1511_s0 + $0x70] sm:$0xff]  }
   0xb   :  { %879 = vmatprep.mubr.msk.bf16.mxu0 %vm252_vm0, %v949_v6  ;;  %911 = vmatprep.mubr.msk.bf16.mxu1 %vm252_vm0, %v950_v7  ;;  %v972_v29 = vld [vmem:[%s1511_s0 + $0xe8] sm:$0xff]   ;;  %v974_v31 = vld [vmem:[%s1511_s0 + $0xf0] sm:$0xff]   ;;  %v975_v32 = vld [vmem:[%s1511_s0 + $0x78] sm:$0xff]  }
   0xc   :  { %v976_v33 = vld [vmem:[%s1511_s0 + $0xf8] sm:$0xff]  }
  0x12   :  { %880 = vmatmul.mubr.msk.bf16.gmra.mrb[4].mxu0 %vm252_vm0, %v951_v8  ;;  %912 = vmatmul.mubr.msk.bf16.gmra.mrb[4].mxu1 %vm252_vm0, %v952_v9 }
  0x13   :  { %883 = vmatprep.mubr.msk.bf16.mxu0 %vm252_vm0, %v953_v10  ;;  %915 = vmatprep.mubr.msk.bf16.mxu1 %vm252_vm0, %v954_v11 }
  0x1a   :  { %884 = vmatmul.mubr.msk.bf16.gmra.mrb[8].mxu0 %vm252_vm0, %v955_v12  ;;  %916 = vmatmul.mubr.msk.bf16.gmra.mrb[8].mxu1 %vm252_vm0, %v956_v13 }
  0x1b   :  { %887 = vmatprep.mubr.msk.bf16.mxu0 %vm252_vm0, %v957_v14  ;;  %919 = vmatprep.mubr.msk.bf16.mxu1 %vm252_vm0, %v958_v15 }
  0x22   :  { %888 = vmatmul.mubr.msk.bf16.gmra.mrb[12].mxu0 %vm252_vm0, %v959_v16  ;;  %920 = vmatmul.mubr.msk.bf16.gmra.mrb[12].mxu1 %vm252_vm0, %v960_v17 }
  0x23   :  { %891 = vmatprep.mubr.msk.bf16.mxu0 %vm252_vm0, %v961_v18  ;;  %923 = vmatprep.mubr.msk.bf16.mxu1 %vm252_vm0, %v962_v19 }
  0x2a   :  { %892 = vmatmul.mubr.msk.bf16.gmra.mrb[16].mxu0 %vm252_vm0, %v963_v20  ;;  %924 = vmatmul.mubr.msk.bf16.gmra.mrb[16].mxu1 %vm252_vm0, %v964_v21 }
  0x2b   :  { %895 = vmatprep.mubr.msk.bf16.mxu0 %vm252_vm0, %v965_v22  ;;  %927 = vmatprep.mubr.msk.bf16.mxu1 %vm252_vm0, %v966_v23 }
  0x32   :  { %896 = vmatmul.mubr.msk.bf16.gmra.mrb[20].mxu0 %vm252_vm0, %v967_v24  ;;  %928 = vmatmul.mubr.msk.bf16.gmra.mrb[20].mxu1 %vm252_vm0, %v968_v25 }
  0x33   :  { %899 = vmatprep.mubr.msk.bf16.mxu0 %vm252_vm0, %v969_v26  ;;  %931 = vmatprep.mubr.msk.bf16.mxu1 %vm252_vm0, %v970_v27 }
  0x3a   :  { %900 = vmatmul.mubr.msk.bf16.gmra.mrb[24].mxu0 %vm252_vm0, %v971_v28  ;;  %932 = vmatmul.mubr.msk.bf16.gmra.mrb[24].mxu1 %vm252_vm0, %v972_v29 }
  0x3b   :  { %903 = vmatprep.mubr.msk.bf16.mxu0 %vm252_vm0, %v973_v30  ;;  %935 = vmatprep.mubr.msk.bf16.mxu1 %vm252_vm0, %v974_v31 }
  0x42   :  { %904 = vmatmul.mubr.msk.bf16.gmra.mrb[28].mxu0 %vm252_vm0, %v975_v32  ;;  %936 = vmatmul.mubr.msk.bf16.gmra.mrb[28].mxu1 %vm252_vm0, %v976_v33 }
  0xdd   :  { %v877_v34 = vpop.f32.mrb[0].mxu0  ;;  %v909_v35 = vpop.f32.mrb[0].mxu1 }
  0xde   :  { %977 = vtanh.f32 %v877_v34  ;;  %v383_v36 = vpop.f32.mrb[1].mxu0  ;;  %v511_v37 = vpop.f32.mrb[1].mxu1 }
  0xdf   :  { %979 = vtanh.f32 %v909_v35  ;;  %v878_v38 = vpop.f32.mrb[2].mxu0  ;;  %v910_v39 = vpop.f32.mrb[2].mxu1 }
  0xe0   :  { %981 = vtanh.f32 %v383_v36  ;;  %v386_v40 = vpop.f32.mrb[3].mxu0  ;;  %v514_v41 = vpop.f32.mrb[3].mxu1 }
  0xe1   :  { %983 = vtanh.f32 %v511_v37 }
  0xe2   :  { %985 = vtanh.f32 %v878_v38 }
  0xe3   :  { %987 = vtanh.f32 %v910_v39 }
  0xe4   :  { %989 = vtanh.f32 %v386_v40 }
  0xe5   :  { %991 = vtanh.f32 %v514_v41  ;;  %v881_v42 = vpop.f32.mrb[4].mxu0  ;;  %v913_v43 = vpop.f32.mrb[4].mxu1 }
  0xe6   :  { %993 = vtanh.f32 %v881_v42  ;;  %v399_v44 = vpop.f32.mrb[5].mxu0  ;;  %v527_v45 = vpop.f32.mrb[5].mxu1 }
  0xe7   :  { %995 = vtanh.f32 %v913_v43  ;;  %v882_v46 = vpop.f32.mrb[6].mxu0  ;;  %v914_v47 = vpop.f32.mrb[6].mxu1 }
  0xe8   :  { %v978_v48 = vpop.eup %977  ;;  %997 = vtanh.f32 %v399_v44  ;;  %v402_v49 = vpop.f32.mrb[7].mxu0 }
  0xe9   :  { %v530_v50 = vpop.f32.mrb[7].mxu1  ;;  %v980_v51 = vpop.eup %979  ;;  %705 = vst.msk [vmem:[%s1512_s2 + $0x10] sm:$0xff] %vm702_vm1, %v978_v48  ;;  %999 = vtanh.f32 %v527_v45 }
  0xea   :  { %v982_v52 = vpop.eup %981  ;;  %737 = vst.msk [vmem:[%s1512_s2 + $0x110] sm:$0xff] %vm702_vm1, %v980_v51  ;;  %1001 = vtanh.f32 %v882_v46 }
  0xeb   :  { %v984_v53 = vpop.eup %983  ;;  %703 = vst.msk [vmem:[%s1512_s2] sm:$0xff] %vm702_vm1, %v982_v52  ;;  %1003 = vtanh.f32 %v914_v47 }
  0xec   :  { %v986_v54 = vpop.eup %985  ;;  %735 = vst.msk [vmem:[%s1512_s2 + $0x100] sm:$0xff] %vm702_vm1, %v984_v53  ;;  %1005 = vtanh.f32 %v402_v49 }
  0xed   :  { %v988_v55 = vpop.eup %987  ;;  %706 = vst.msk [vmem:[%s1512_s2 + $0x18] sm:$0xff] %vm702_vm1, %v986_v54  ;;  %1007 = vtanh.f32 %v530_v50  ;;  %v885_v56 = vpop.f32.mrb[8].mxu0 }
  0xee   :  { %v917_v57 = vpop.f32.mrb[8].mxu1  ;;  %v990_v58 = vpop.eup %989  ;;  %738 = vst.msk [vmem:[%s1512_s2 + $0x118] sm:$0xff] %vm702_vm1, %v988_v55  ;;  %1009 = vtanh.f32 %v885_v56 }
  0xef   :  { %v415_v59 = vpop.f32.mrb[9].mxu0  ;;  %v543_v60 = vpop.f32.mrb[9].mxu1  ;;  %704 = vst.msk [vmem:[%s1512_s2 + $0x8] sm:$0xff] %vm702_vm1, %v990_v58  ;;  %1011 = vtanh.f32 %v917_v57 }
  0xf0   :  { %v992_v61 = vpop.eup %991  ;;  %v886_v62 = vpop.f32.mrb[10].mxu0  ;;  %1013 = vtanh.f32 %v415_v59 }
  0xf1   :  { %v918_v63 = vpop.f32.mrb[10].mxu1  ;;  %v994_v0 = vpop.eup %993  ;;  %736 = vst.msk [vmem:[%s1512_s2 + $0x108] sm:$0xff] %vm702_vm1, %v992_v61  ;;  %1015 = vtanh.f32 %v543_v60 }
  0xf2   :  { %v418_v1 = vpop.f32.mrb[11].mxu0  ;;  %v546_v2 = vpop.f32.mrb[11].mxu1  ;;  %709 = vst.msk [vmem:[%s1512_s2 + $0x30] sm:$0xff] %vm702_vm1, %v994_v0  ;;  %1017 = vtanh.f32 %v886_v62 }
  0xf3   :  { %v996_v3 = vpop.eup %995  ;;  %1019 = vtanh.f32 %v918_v63 }
  0xf4   :  { %v998_v4 = vpop.eup %997  ;;  %741 = vst.msk [vmem:[%s1512_s2 + $0x130] sm:$0xff] %vm702_vm1, %v996_v3  ;;  %1021 = vtanh.f32 %v418_v1 }
  0xf5   :  { %v1000_v5 = vpop.eup %999  ;;  %707 = vst.msk [vmem:[%s1512_s2 + $0x20] sm:$0xff] %vm702_vm1, %v998_v4  ;;  %1023 = vtanh.f32 %v546_v2  ;;  %v889_v8 = vpop.f32.mrb[12].mxu0 }
  0xf6   :  { %v1002_v6 = vpop.eup %1001  ;;  %739 = vst.msk [vmem:[%s1512_s2 + $0x120] sm:$0xff] %vm702_vm1, %v1000_v5  ;;  %v921_v9 = vpop.f32.mrb[12].mxu1  ;;  %1025 = vtanh.f32 %v889_v8 }
  0xf7   :  { %v1004_v7 = vpop.eup %1003  ;;  %710 = vst.msk [vmem:[%s1512_s2 + $0x38] sm:$0xff] %vm702_vm1, %v1002_v6  ;;  %v431_v11 = vpop.f32.mrb[13].mxu0  ;;  %1027 = vtanh.f32 %v921_v9 }
  0xf8   :  { %v1006_v10 = vpop.eup %1005  ;;  %742 = vst.msk [vmem:[%s1512_s2 + $0x138] sm:$0xff] %vm702_vm1, %v1004_v7  ;;  %v559_v12 = vpop.f32.mrb[13].mxu1  ;;  %1029 = vtanh.f32 %v431_v11 }
  0xf9   :  { %v1008_v13 = vpop.eup %1007  ;;  %708 = vst.msk [vmem:[%s1512_s2 + $0x28] sm:$0xff] %vm702_vm1, %v1006_v10  ;;  %v890_v14 = vpop.f32.mrb[14].mxu0  ;;  %1031 = vtanh.f32 %v559_v12 }
  0xfa   :  { %v922_v15 = vpop.f32.mrb[14].mxu1  ;;  %v1010_v16 = vpop.eup %1009  ;;  %740 = vst.msk [vmem:[%s1512_s2 + $0x128] sm:$0xff] %vm702_vm1, %v1008_v13  ;;  %1033 = vtanh.f32 %v890_v14 }
  0xfb   :  { %v434_v17 = vpop.f32.mrb[15].mxu0  ;;  %v562_v18 = vpop.f32.mrb[15].mxu1  ;;  %713 = vst.msk [vmem:[%s1512_s2 + $0x50] sm:$0xff] %vm702_vm1, %v1010_v16  ;;  %1035 = vtanh.f32 %v922_v15 }
  0xfc   :  { %v1012_v19 = vpop.eup %1011  ;;  %1037 = vtanh.f32 %v434_v17 }
  0xfd   :  { %v1014_v20 = vpop.eup %1013  ;;  %745 = vst.msk [vmem:[%s1512_s2 + $0x150] sm:$0xff] %vm702_vm1, %v1012_v19  ;;  %1039 = vtanh.f32 %v562_v18  ;;  %v893_v24 = vpop.f32.mrb[16].mxu0 }
  0xfe   :  { %v1016_v21 = vpop.eup %1015  ;;  %711 = vst.msk [vmem:[%s1512_s2 + $0x40] sm:$0xff] %vm702_vm1, %v1014_v20  ;;  %v925_v25 = vpop.f32.mrb[16].mxu1  ;;  %1041 = vtanh.f32 %v893_v24 }
  0xff   :  { %v1018_v22 = vpop.eup %1017  ;;  %743 = vst.msk [vmem:[%s1512_s2 + $0x140] sm:$0xff] %vm702_vm1, %v1016_v21  ;;  %v447_v27 = vpop.f32.mrb[17].mxu0  ;;  %1043 = vtanh.f32 %v925_v25 }
 0x100   :  { %v1020_v23 = vpop.eup %1019  ;;  %714 = vst.msk [vmem:[%s1512_s2 + $0x58] sm:$0xff] %vm702_vm1, %v1018_v22  ;;  %v575_v28 = vpop.f32.mrb[17].mxu1  ;;  %1045 = vtanh.f32 %v447_v27 }
 0x101   :  { %v1022_v26 = vpop.eup %1021  ;;  %746 = vst.msk [vmem:[%s1512_s2 + $0x158] sm:$0xff] %vm702_vm1, %v1020_v23  ;;  %v894_v30 = vpop.f32.mrb[18].mxu0  ;;  %1047 = vtanh.f32 %v575_v28 }
 0x102   :  { %v1024_v29 = vpop.eup %1023  ;;  %712 = vst.msk [vmem:[%s1512_s2 + $0x48] sm:$0xff] %vm702_vm1, %v1022_v26  ;;  %v926_v31 = vpop.f32.mrb[18].mxu1  ;;  %1049 = vtanh.f32 %v894_v30 }
 0x103   :  { %v1026_v32 = vpop.eup %1025  ;;  %744 = vst.msk [vmem:[%s1512_s2 + $0x148] sm:$0xff] %vm702_vm1, %v1024_v29  ;;  %v450_v33 = vpop.f32.mrb[19].mxu0  ;;  %1051 = vtanh.f32 %v926_v31 }
 0x104   :  { %v578_v34 = vpop.f32.mrb[19].mxu1  ;;  %v1028_v35 = vpop.eup %1027  ;;  %717 = vst.msk [vmem:[%s1512_s2 + $0x70] sm:$0xff] %vm702_vm1, %v1026_v32  ;;  %1053 = vtanh.f32 %v450_v33 }
 0x105   :  { %v1030_v36 = vpop.eup %1029  ;;  %749 = vst.msk [vmem:[%s1512_s2 + $0x170] sm:$0xff] %vm702_vm1, %v1028_v35  ;;  %1055 = vtanh.f32 %v578_v34  ;;  %v897_v40 = vpop.f32.mrb[20].mxu0 }
 0x106   :  { %v1032_v37 = vpop.eup %1031  ;;  %715 = vst.msk [vmem:[%s1512_s2 + $0x60] sm:$0xff] %vm702_vm1, %v1030_v36  ;;  %v929_v41 = vpop.f32.mrb[20].mxu1  ;;  %1057 = vtanh.f32 %v897_v40 }
 0x107   :  { %v1034_v38 = vpop.eup %1033  ;;  %747 = vst.msk [vmem:[%s1512_s2 + $0x160] sm:$0xff] %vm702_vm1, %v1032_v37  ;;  %v463_v43 = vpop.f32.mrb[21].mxu0  ;;  %1059 = vtanh.f32 %v929_v41 }
 0x108   :  { %v1036_v39 = vpop.eup %1035  ;;  %718 = vst.msk [vmem:[%s1512_s2 + $0x78] sm:$0xff] %vm702_vm1, %v1034_v38  ;;  %v591_v44 = vpop.f32.mrb[21].mxu1  ;;  %1061 = vtanh.f32 %v463_v43 }
 0x109   :  { %v1038_v42 = vpop.eup %1037  ;;  %750 = vst.msk [vmem:[%s1512_s2 + $0x178] sm:$0xff] %vm702_vm1, %v1036_v39  ;;  %v898_v46 = vpop.f32.mrb[22].mxu0  ;;  %1063 = vtanh.f32 %v591_v44 }
 0x10a   :  { %v1040_v45 = vpop.eup %1039  ;;  %716 = vst.msk [vmem:[%s1512_s2 + $0x68] sm:$0xff] %vm702_vm1, %v1038_v42  ;;  %v930_v47 = vpop.f32.mrb[22].mxu1  ;;  %1065 = vtanh.f32 %v898_v46 }
 0x10b   :  { %v1042_v48 = vpop.eup %1041  ;;  %748 = vst.msk [vmem:[%s1512_s2 + $0x168] sm:$0xff] %vm702_vm1, %v1040_v45  ;;  %v466_v49 = vpop.f32.mrb[23].mxu0  ;;  %1067 = vtanh.f32 %v930_v47 }
 0x10c   :  { %v594_v50 = vpop.f32.mrb[23].mxu1  ;;  %v1044_v51 = vpop.eup %1043  ;;  %721 = vst.msk [vmem:[%s1512_s2 + $0x90] sm:$0xff] %vm702_vm1, %v1042_v48  ;;  %1069 = vtanh.f32 %v466_v49 }
 0x10d   :  { %v1046_v52 = vpop.eup %1045  ;;  %753 = vst.msk [vmem:[%s1512_s2 + $0x190] sm:$0xff] %vm702_vm1, %v1044_v51  ;;  %1071 = vtanh.f32 %v594_v50  ;;  %v901_v56 = vpop.f32.mrb[24].mxu0 }
 0x10e   :  { %v1048_v53 = vpop.eup %1047  ;;  %719 = vst.msk [vmem:[%s1512_s2 + $0x80] sm:$0xff] %vm702_vm1, %v1046_v52  ;;  %v933_v57 = vpop.f32.mrb[24].mxu1  ;;  %1073 = vtanh.f32 %v901_v56 }
 0x10f   :  { %v1050_v54 = vpop.eup %1049  ;;  %751 = vst.msk [vmem:[%s1512_s2 + $0x180] sm:$0xff] %vm702_vm1, %v1048_v53  ;;  %v479_v59 = vpop.f32.mrb[25].mxu0  ;;  %1075 = vtanh.f32 %v933_v57 }
 0x110   :  { %v1052_v55 = vpop.eup %1051  ;;  %722 = vst.msk [vmem:[%s1512_s2 + $0x98] sm:$0xff] %vm702_vm1, %v1050_v54  ;;  %v607_v60 = vpop.f32.mrb[25].mxu1  ;;  %1077 = vtanh.f32 %v479_v59 }
 0x111   :  { %v1054_v58 = vpop.eup %1053  ;;  %754 = vst.msk [vmem:[%s1512_s2 + $0x198] sm:$0xff] %vm702_vm1, %v1052_v55  ;;  %v902_v62 = vpop.f32.mrb[26].mxu0  ;;  %1079 = vtanh.f32 %v607_v60 }
 0x112   :  { %v1056_v61 = vpop.eup %1055  ;;  %720 = vst.msk [vmem:[%s1512_s2 + $0x88] sm:$0xff] %vm702_vm1, %v1054_v58  ;;  %v934_v63 = vpop.f32.mrb[26].mxu1  ;;  %1081 = vtanh.f32 %v902_v62 }
 0x113   :  { %v1058_v0 = vpop.eup %1057  ;;  %752 = vst.msk [vmem:[%s1512_s2 + $0x188] sm:$0xff] %vm702_vm1, %v1056_v61  ;;  %v482_v1 = vpop.f32.mrb[27].mxu0  ;;  %1083 = vtanh.f32 %v934_v63 }
 0x114   :  { %v610_v2 = vpop.f32.mrb[27].mxu1  ;;  %v1060_v3 = vpop.eup %1059  ;;  %725 = vst.msk [vmem:[%s1512_s2 + $0xb0] sm:$0xff] %vm702_vm1, %v1058_v0  ;;  %1085 = vtanh.f32 %v482_v1 }
 0x115   :  { %v1062_v4 = vpop.eup %1061  ;;  %757 = vst.msk [vmem:[%s1512_s2 + $0x1b0] sm:$0xff] %vm702_vm1, %v1060_v3  ;;  %1087 = vtanh.f32 %v610_v2  ;;  %v905_v8 = vpop.f32.mrb[28].mxu0 }
 0x116   :  { %v1064_v5 = vpop.eup %1063  ;;  %723 = vst.msk [vmem:[%s1512_s2 + $0xa0] sm:$0xff] %vm702_vm1, %v1062_v4  ;;  %v937_v9 = vpop.f32.mrb[28].mxu1  ;;  %1089 = vtanh.f32 %v905_v8 }
 0x117   :  { %v1066_v6 = vpop.eup %1065  ;;  %755 = vst.msk [vmem:[%s1512_s2 + $0x1a0] sm:$0xff] %vm702_vm1, %v1064_v5  ;;  %v495_v11 = vpop.f32.mrb[29].mxu0  ;;  %1091 = vtanh.f32 %v937_v9 }
 0x118   :  { %v1068_v7 = vpop.eup %1067  ;;  %726 = vst.msk [vmem:[%s1512_s2 + $0xb8] sm:$0xff] %vm702_vm1, %v1066_v6  ;;  %v623_v12 = vpop.f32.mrb[29].mxu1  ;;  %1093 = vtanh.f32 %v495_v11 }
 0x119   :  { %v1070_v10 = vpop.eup %1069  ;;  %758 = vst.msk [vmem:[%s1512_s2 + $0x1b8] sm:$0xff] %vm702_vm1, %v1068_v7  ;;  %v906_v14 = vpop.f32.mrb[30].mxu0  ;;  %1095 = vtanh.f32 %v623_v12 }
 0x11a   :  { %v1072_v13 = vpop.eup %1071  ;;  %724 = vst.msk [vmem:[%s1512_s2 + $0xa8] sm:$0xff] %vm702_vm1, %v1070_v10  ;;  %v938_v15 = vpop.f32.mrb[30].mxu1  ;;  %1097 = vtanh.f32 %v906_v14 }
 0x11b   :  { %v1074_v16 = vpop.eup %1073  ;;  %756 = vst.msk [vmem:[%s1512_s2 + $0x1a8] sm:$0xff] %vm702_vm1, %v1072_v13  ;;  %v498_v17 = vpop.f32.mrb[31].mxu0  ;;  %1099 = vtanh.f32 %v938_v15 }
 0x11c   :  { %v626_v18 = vpop.f32.mrb[31].mxu1  ;;  %v1076_v19 = vpop.eup %1075  ;;  %729 = vst.msk [vmem:[%s1512_s2 + $0xd0] sm:$0xff] %vm702_vm1, %v1074_v16  ;;  %1101 = vtanh.f32 %v498_v17 }
 0x11d   :  { %v1078_v20 = vpop.eup %1077  ;;  %761 = vst.msk [vmem:[%s1512_s2 + $0x1d0] sm:$0xff] %vm702_vm1, %v1076_v19  ;;  %1103 = vtanh.f32 %v626_v18 }
 0x11e   :  { %v1080_v21 = vpop.eup %1079  ;;  %727 = vst.msk [vmem:[%s1512_s2 + $0xc0] sm:$0xff] %vm702_vm1, %v1078_v20 }
 0x11f   :  { %v1082_v22 = vpop.eup %1081  ;;  %759 = vst.msk [vmem:[%s1512_s2 + $0x1c0] sm:$0xff] %vm702_vm1, %v1080_v21 }
 0x120   :  { %v1084_v23 = vpop.eup %1083  ;;  %730 = vst.msk [vmem:[%s1512_s2 + $0xd8] sm:$0xff] %vm702_vm1, %v1082_v22 }
 0x121   :  { %v1086_v24 = vpop.eup %1085  ;;  %762 = vst.msk [vmem:[%s1512_s2 + $0x1d8] sm:$0xff] %vm702_vm1, %v1084_v23 }
 0x122   :  { %v1088_v25 = vpop.eup %1087  ;;  %728 = vst.msk [vmem:[%s1512_s2 + $0xc8] sm:$0xff] %vm702_vm1, %v1086_v24 }
 0x123   :  { %v1090_v26 = vpop.eup %1089  ;;  %760 = vst.msk [vmem:[%s1512_s2 + $0x1c8] sm:$0xff] %vm702_vm1, %v1088_v25 }
 0x124   :  { %v1092_v27 = vpop.eup %1091  ;;  %733 = vst.msk [vmem:[%s1512_s2 + $0xf0] sm:$0xff] %vm702_vm1, %v1090_v26 }
 0x125   :  { %v1094_v28 = vpop.eup %1093  ;;  %765 = vst.msk [vmem:[%s1512_s2 + $0x1f0] sm:$0xff] %vm702_vm1, %v1092_v27 }
 0x126   :  { %v1096_v29 = vpop.eup %1095  ;;  %731 = vst.msk [vmem:[%s1512_s2 + $0xe0] sm:$0xff] %vm702_vm1, %v1094_v28 }
 0x127   :  { %v1098_v30 = vpop.eup %1097  ;;  %763 = vst.msk [vmem:[%s1512_s2 + $0x1e0] sm:$0xff] %vm702_vm1, %v1096_v29 }
 0x128   :  { %v1100_v31 = vpop.eup %1099  ;;  %734 = vst.msk [vmem:[%s1512_s2 + $0xf8] sm:$0xff] %vm702_vm1, %v1098_v30 }
 0x129   :  { %v1102_v32 = vpop.eup %1101  ;;  %766 = vst.msk [vmem:[%s1512_s2 + $0x1f8] sm:$0xff] %vm702_vm1, %v1100_v31 }
 0x12a   :  { %v1104_v33 = vpop.eup %1103  ;;  %732 = vst.msk [vmem:[%s1512_s2 + $0xe8] sm:$0xff] %vm702_vm1, %v1102_v32 }
 0x12b   :  { %764 = vst.msk [vmem:[%s1512_s2 + $0x1e8] sm:$0xff] %vm702_vm1, %v1104_v33 }

// kernel: generator_forward.45
= control target key start
LH: loop header
LB: loop body
LE: loop exit
PB: predicated region body
PF: predicated region fallthrough
CT: control target
= control target key end

     0   :  { %v90_v30 = vlaneseq  ;;  %v530_v34 = vmov 1966171168   ;;  %s658_s0 = inlined_call_operand.vmem [shape: bf16[2,512], index: 0, kind: input, shape index: {}]   ;;  %s659_s1 = inlined_call_operand.vmem [shape: bf16[512,16], index: 1, kind: input, shape index: {}]   ;;  %s660_s2 = inlined_call_operand.hbm [shape: f32[2,16], index: 2, kind: output, shape index: {}]  }
   0x1   :  { %v474_v0 = vld [vmem:[%s659_s1 + $0x40] sm:$0xff]   ;;  %v478_v4 = vld [vmem:[%s659_s1 + $0x48] sm:$0xff]   ;;  %v482_v8 = vld [vmem:[%s659_s1 + $0x50] sm:$0xff]   ;;  %v88_v35 = vunpack.c.l.s4 %v530_v34 }
   0x2   :  { %v475_v1 = vld [vmem:[%s659_s1 + $0xc0] sm:$0xff]   ;;  %428 = vmatprep.subr.bf16.mxu0 %v474_v0  ;;  %v479_v5 = vld [vmem:[%s659_s1 + $0xc8] sm:$0xff]   ;;  %v483_v9 = vld [vmem:[%s659_s1 + $0xd0] sm:$0xff]   ;;  %v91_v36 = vshrl.u32 %v90_v30, 7 }
   0x3   :  { %v476_v2 = vld [vmem:[%s659_s1] sm:$0xff]   ;;  %450 = vmatprep.subr.bf16.mxu1 %v475_v1  ;;  %v480_v6 = vld [vmem:[%s659_s1 + $0x8] sm:$0xff]   ;;  %v484_v10 = vld [vmem:[%s659_s1 + $0x10] sm:$0xff]  }
   0x4   :  { %v477_v3 = vld [vmem:[%s659_s1 + $0x80] sm:$0xff]   ;;  %429 = vmatpush3.bf16.msra.mxu0 %v476_v2  ;;  %v481_v7 = vld [vmem:[%s659_s1 + $0x88] sm:$0xff]   ;;  %v485_v11 = vld [vmem:[%s659_s1 + $0x90] sm:$0xff]  }
   0x5   :  { %451 = vmatpush3.bf16.msra.mxu1 %v477_v3  ;;  %430 = vmatprep.subr.bf16.mxu0 %v478_v4  ;;  %v486_v12 = vld [vmem:[%s659_s1 + $0x58] sm:$0xff]   ;;  %v490_v16 = vld [vmem:[%s659_s1 + $0x60] sm:$0xff]   ;;  %v494_v20 = vld [vmem:[%s659_s1 + $0x68] sm:$0xff]  }
   0x6   :  { %452 = vmatprep.subr.bf16.mxu1 %v479_v5  ;;  %v487_v13 = vld [vmem:[%s659_s1 + $0xd8] sm:$0xff]   ;;  %v491_v17 = vld [vmem:[%s659_s1 + $0xe0] sm:$0xff]   ;;  %v495_v21 = vld [vmem:[%s659_s1 + $0xe8] sm:$0xff]  }
   0x7   :  { %v488_v14 = vld [vmem:[%s659_s1 + $0x18] sm:$0xff]   ;;  %v492_v18 = vld [vmem:[%s659_s1 + $0x20] sm:$0xff]   ;;  %v496_v22 = vld [vmem:[%s659_s1 + $0x28] sm:$0xff]  }
   0x8   :  { %431 = vmatpush3.bf16.msra.mxu0 %v480_v6  ;;  %v489_v15 = vld [vmem:[%s659_s1 + $0x98] sm:$0xff]   ;;  %v493_v19 = vld [vmem:[%s659_s1 + $0xa0] sm:$0xff]   ;;  %v497_v23 = vld [vmem:[%s659_s1 + $0xa8] sm:$0xff]  }
   0x9   :  { %453 = vmatpush3.bf16.msra.mxu1 %v481_v7  ;;  %432 = vmatprep.subr.bf16.mxu0 %v482_v8  ;;  %v498_v24 = vld [vmem:[%s659_s1 + $0x70] sm:$0xff]   ;;  %v502_v28 = vld [vmem:[%s659_s1 + $0x78] sm:$0xff]   ;;  %v395_v33 = vld.sshfl [vmem:[%s658_s0] sm:$0x33 pattern:$0x75316420] }
   0xa   :  { %454 = vmatprep.subr.bf16.mxu1 %v483_v9  ;;  %v499_v25 = vld [vmem:[%s659_s1 + $0xf0] sm:$0xff]   ;;  %v503_v29 = vld [vmem:[%s659_s1 + $0xf8] sm:$0xff]  }
   0xb   :  { %v500_v26 = vld [vmem:[%s659_s1 + $0x30] sm:$0xff]   ;;  %v504_v31 = vld [vmem:[%s659_s1 + $0x38] sm:$0xff]  }
   0xc   :  { %433 = vmatpush3.bf16.msra.mxu0 %v484_v10  ;;  %v501_v27 = vld [vmem:[%s659_s1 + $0xb0] sm:$0xff]   ;;  %v505_v32 = vld [vmem:[%s659_s1 + $0xb8] sm:$0xff]  }
   0xd   :  { %455 = vmatpush3.bf16.msra.mxu1 %v485_v11  ;;  %434 = vmatprep.subr.bf16.mxu0 %v486_v12 }
   0xe   :  { %456 = vmatprep.subr.bf16.mxu1 %v487_v13 }
  0x10   :  { %435 = vmatpush3.bf16.msra.mxu0 %v488_v14 }
  0x11   :  { %457 = vmatpush3.bf16.msra.mxu1 %v489_v15  ;;  %436 = vmatprep.subr.bf16.mxu0 %v490_v16 }
  0x12   :  { %458 = vmatprep.subr.bf16.mxu1 %v491_v17 }
  0x14   :  { %437 = vmatpush3.bf16.msra.mxu0 %v492_v18 }
  0x15   :  { %459 = vmatpush3.bf16.msra.mxu1 %v493_v19  ;;  %438 = vmatprep.subr.bf16.mxu0 %v494_v20 }
  0x16   :  { %460 = vmatprep.subr.bf16.mxu1 %v495_v21 }
  0x18   :  { %439 = vmatpush3.bf16.msra.mxu0 %v496_v22 }
  0x19   :  { %461 = vmatpush3.bf16.msra.mxu1 %v497_v23  ;;  %440 = vmatprep.subr.bf16.mxu0 %v498_v24 }
  0x1a   :  { %462 = vmatprep.subr.bf16.mxu1 %v499_v25 }
  0x1c   :  { %441 = vmatpush3.bf16.msra.mxu0 %v500_v26 }
  0x1d   :  { %463 = vmatpush3.bf16.msra.mxu1 %v501_v27  ;;  %442 = vmatprep.subr.bf16.mxu0 %v502_v28 }
  0x1e   :  { %464 = vmatprep.subr.bf16.mxu1 %v503_v29 }
  0x20   :  { %443 = vmatpush3.bf16.msra.mxu0 %v504_v31 }
  0x21   :  { %465 = vmatpush3.bf16.msra.mxu1 %v505_v32 }
  0x22   :  { %7 = vsyncpa [#allocation3], 0  ;;  %v86_v37 = vcombine.high %v395_v33, %v395_v33  ;;  %v89_v38 = vunpack.c.0.s8 %v88_v35  ;;  %s531_s0 = smov [#allocation2]   ;;  %vm379_vm0 = vcmask 123904  }
  0x23   :  { %s387_s1 = sshll.u32 %s531_s0, 4  ;;  %s388_s1 = int_to_ptr.vmem [resolvable:$true] %s387_s1 }
  0x24   :  { %v92_v39 = vsub.s32 %v89_v38, %v91_v36  ;;  %s506_s19 = scalar_lea.vmem %s388_s1, 32  ;;  %p511_p1 = scmp.lt.s32.totalorder %s388_s1, %s388_s1 }
  0x25   :  { %p507_p0 = scmp.ne.s32.totalorder %s388_s1, %s506_s19  ;;  %p512_p2 = scmp.lt.s32.totalorder %s506_s19, %s506_s19 }
  0x26   :  { %v100_v40 = vrot.slane %v86_v37, %v92_v39  ;;  %v93_v41 = vrot.slane %v395_v33, %v92_v39 }
  0x27   :  { %p513_p3 = por %p512_p2, %p511_p1 }
  0x28   :  { %331 = vmatprep.mubr.bf16.mxu0 %v100_v40  ;;  %v102_v42 = vcombine.high %v100_v40, %v100_v40  ;;  %v101_v43 = vcombine.high %v93_v41, %v93_v41 }
  0x29   :  { %332 = vmatmul.mubr.bf16.vlgmr.msra.gmra.mrb[0].mxu0 %v93_v41  ;;  %p514_p4 = pnand %p513_p3, %p507_p0 }
  0x2a   :  { %371 = vmatprep.mubr.bf16.mxu1 %v102_v42 }
  0x2b   :  { %372 = vmatmul.mubr.bf16.vlgmr.msra.gmra.mrb[0].mxu1 %v101_v43 }
  0xfc   :  { %v444_v44 = vpop.f32.mrb[0].mxu0 }
  0xfd   :  { %v445_v45 = vpop.f32.mrb[1].mxu0 }
  0xfe   :  { %v466_v46 = vpop.f32.mrb[0].mxu1  ;;  %v446_v47 = vadd.f32 %v445_v45, %v444_v44  ;;  %v447_v48 = vpop.f32.mrb[2].mxu0 }
  0xff   :  { %v467_v49 = vpop.f32.mrb[1].mxu1  ;;  %v448_v50 = vpop.f32.mrb[3].mxu0 }
 0x100   :  { %v468_v51 = vadd.f32 %v467_v49, %v466_v46  ;;  %v469_v52 = vpop.f32.mrb[2].mxu1 }
 0x101   :  { %v470_v53 = vpop.f32.mrb[3].mxu1 }
 0x102   :  { %v374_v54 = vadd.f32 %v468_v51, %v446_v47 }
 0x104   :  { %380 = vst.msk [vmem:[#allocation2] sm:$0x3] %vm379_vm0, %v374_v54 }
 0x105   :  { %517 = shalt.err (!%p514_p4)
}
 0x106   :  { %s518_s22 = scalar_lea.hbm %s660_s2, 32 }
 0x107   :  { %p519_p5 = scmp.ne.s32.totalorder %s660_s2, %s518_s22  ;;  %p522_p6 = scmp.lt.u32.totalorder %s518_s22, %s660_s2 }
 0x109   :  { %p524_p7 = pnand %p522_p6, %p519_p5 }
 0x10b   :  { %527 = shalt.err (!%p524_p7)
}
 0x10c   :  { %390 = dma.vmem_to_hbm [thread:$0]  %s388_s1, 32, %s660_s2, [#allocation3]  }
 0x10d   :  { %528 = dma.done.wait [#allocation3], 32  }
 0x10e   :  { %529 = vsyncadd [#allocation3], 4294967264 }
 0x10f   :  { %394 = vsyncpa [#allocation3], 1 }

</bundles_post_ra>
